<compile_context>
chip_gen: v7x
topology: tpu7x:2x2x1
jax: 0.10.0
libtpu: 0.0.40
codegen_flags: <defaults>
</compile_context>

<pallas_src>
import jax
import jax.numpy as jnp
from jax import lax
from jax.experimental import pallas as pl
from jax.experimental.pallas import tpu as pltpu

LANES = 128


# --------------------------------------------------------------------------
# small helpers
# --------------------------------------------------------------------------
def _round_up(x, m):
    return ((x + m - 1) // m) * m


def _relu(v):
    return jnp.maximum(v, 0.0)


def _dot(a, w):
    # bf16 operands on the MXU, f32 accumulation; elementwise math stays f32.
    return jnp.dot(a.astype(w.dtype), w, preferred_element_type=jnp.float32)


def _hidden_stack(h, w_ref, b_ref):
    """Run h through the stacked hidden layers held in w_ref / b_ref."""
    n_layers = w_ref.shape[0]

    def body(l, hh):
        return _relu(_dot(hh, w_ref[l]) + b_ref[l])

    # unrolled fori_loop: LLO-visible, only one layer's activations live at once
    return lax.fori_loop(0, n_layers, body, h, unroll=True)


# --------------------------------------------------------------------------
# Fused forward kernel (one batch tile per grid step).
# Every logical width lives on fixed lanes of 128-lane registers; the lane
# placement is chosen at init time so the seven outputs occupy disjoint lanes
# of just two 128-lane groups (see init_base_vae_params).
# --------------------------------------------------------------------------
def _make_kernel(dims):
    D, H, Z, C = dims["D"], dims["H"], dims["Z"], dims["C"]
    NL_OFF, CL_OFF = dims["NL_OFF"], dims["CL_OFF"]
    MU_OFF, XH_OFF = dims["MU_OFF"], dims["XH_OFF"]

    def kernel(in_ref,
               wy_in, by_in, wy_hid, by_hid, wy_out, by_out,
               wz_in, bz_in, wz_hid, bz_hid, wz_head, bz_head,
               wx_in, bx_in, wx_hid, bx_hid, wx_out, bx_out,
               wt_in, bt_in, wt_hid, bt_hid, wt_out, bt_out,
               o_ref):
        slab = in_ref[...]                                   # (tile_n, 128) f32
        tile_n = slab.shape[0]
        lane = lax.broadcasted_iota(jnp.int32, (tile_n, LANES), 1)
        slab_bf = slab.astype(jnp.bfloat16)                  # cast once, reused

        # ---------------- Y encoder: x -> (c_embedding, c_logits) -----------
        # wy_in rows outside [0, D) are zero, so the gumbel / eps lanes packed
        # into the same input slab contribute nothing.
        h = _relu(_dot(slab_bf, wy_in[...]) + by_in[...])
        h = _hidden_stack(h, wy_hid, by_hid)                 # num_hidden_layers+10
        c_emb = h                                            # real lanes [0, H)
        c_logits = _dot(h, wy_out[...]) + by_out[...]        # real [CL_OFF, +C)

        # ------- _y_hat_reparameterize: F.gumbel_softmax (tau=1, soft) ------
        # gumbel noise sits on slab lanes [CL_OFF, CL_OFF+C), already aligned
        # with c_logits -> plain add, no lane movement.
        cls_mask = (lane >= CL_OFF) & (lane < CL_OFF + C)
        gl = jnp.where(cls_mask, c_logits + slab, -1e30)
        gl = gl - jnp.max(gl, axis=-1, keepdims=True)
        eg = jnp.exp(gl)
        y_hat = eg * pl.reciprocal(jnp.sum(eg, axis=-1, keepdims=True))
        y_bf = y_hat.astype(jnp.bfloat16)                    # cast once, reused 3x

        # -------- Z encoder: concat(x, y_hat) -> fused (mu | logvar) --------
        # single K=256 matmul for the concat layer, single (128, 256) head.
        h = _relu(_dot(jnp.concatenate([slab_bf, y_bf], axis=-1), wz_in[...])
                  + bz_in[...])
        h = _hidden_stack(h, wz_hid, bz_hid)
        head = _dot(h, wz_head[...]) + bz_head[...]          # (tile_n, 256)
        mu = head[:, :LANES]                                 # real [MU_OFF, +Z)
        logvar = head[:, LANES:]                             # real [MU_OFF, +Z)

        # ------- _z_reparameterize: eps ~ U[0,1) (torch.rand_like) ----------
        # eps sits on slab lanes [MU_OFF, MU_OFF+Z), aligned with mu / logvar.
        eps = jnp.where((lane >= MU_OFF) & (lane < MU_OFF + Z), slab, 0.0)
        z = mu + eps * jnp.exp(0.5 * logvar)                 # real [MU_OFF, +Z)

        # ---------------- X decoder: concat(z, y_hat) -> x_hat --------------
        h = _relu(_dot(jnp.concatenate([z.astype(jnp.bfloat16), y_bf], axis=-1),
                       wx_in[...]) + bx_in[...])
        h = _hidden_stack(h, wx_hid, bx_hid)
        # TODO(synk): X_Decoder output nonlinearity assumed sigmoid; sub-module
        #             source was not provided with BaseVAE.
        x_hat = jax.nn.sigmoid(_dot(h, wx_out[...]) + bx_out[...])
        x_hat = jnp.where((lane >= XH_OFF) & (lane < XH_OFF + D), x_hat, 0.0)

        # ------------- T decoder: concat(x_hat, y_hat) -> n_logits ----------
        h = _relu(_dot(jnp.concatenate([x_hat.astype(jnp.bfloat16), y_bf],
                                       axis=-1), wt_in[...]) + bt_in[...])
        h = _hidden_stack(h, wt_hid, bt_hid)
        n_logits = _dot(h, wt_out[...]) + bt_out[...]        # real [NL_OFF, +C)

        # ------------- pack outputs into a compact (tile_n, 256) slab -------
        # Disjoint lane placement (zeros everywhere else) -> packing is a pure
        # VPU add; both stores are full 128-lane, unmasked.
        #   lanes   0..127 : c_emb | n_logits | c_logits | mu | x_hat
        #   lanes 128..255 : y_hat | logvar
        o_ref[:, 0:LANES] = c_emb + n_logits + c_logits + mu + x_hat
        o_ref[:, LANES:2 * LANES] = y_hat + logvar

    return kernel


# --------------------------------------------------------------------------
# Parameter init: PyTorch nn.Linear default U(-1/sqrt(fan_in), 1/sqrt(fan_in)),
# then placed into lane-padded slots (weights bf16, biases f32).
# --------------------------------------------------------------------------
def _linear_init(key, fan_in, fan_out):
    kw, kb = jax.random.split(key)
    bound = 1.0 / float(fan_in) ** 0.5
    w = jax.random.uniform(kw, (fan_in, fan_out), jnp.float32, -bound, bound)
    b = jax.random.uniform(kb, (1, fan_out), jnp.float32, -bound, bound)
    return w, b


def _place(shape, block, row_off=0, col_off=0):
    out = jnp.zeros(shape, jnp.float32)
    return out.at[row_off:row_off + block.shape[0],
                  col_off:col_off + block.shape[1]].set(block)


def _hidden_stack_init(key, n_layers, h):
    ws, bs = [], []
    for k in jax.random.split(key, n_layers):
        w, b = _linear_init(k, h, h)
        ws.append(_place((LANES, LANES), w))
        bs.append(_place((1, LANES), b))
    return (jnp.stack(ws, 0).astype(jnp.bfloat16),
            jnp.stack(bs, 0).astype(jnp.float32))


def init_base_vae_params(key, feature_dim=28, num_hidden_layers=1, hidden_size=25,
                         z_dim=10, num_classes=10):
    D, H, Z, C = feature_dim, hidden_size, z_dim, num_classes
    # Disjoint lane layout for the compact output slab (group 1):
    #   c_emb [0,H) | n_logits [NL,+C) | c_logits [CL,+C) | mu [MU,+Z) | x_hat [XH,+D)
    # group 2 reuses CL/MU offsets for y_hat / logvar.
    NL_OFF = max(D, H)
    CL_OFF = NL_OFF + C
    MU_OFF = CL_OFF + C
    XH_OFF = MU_OFF + Z
    assert H <= LANES and XH_OFF + D <= LANES, \
        "lane-compact layout needs max(D,H)+2C+Z+D <= 128 and H <= 128"
    assert num_hidden_layers >= 1
    Ly = num_hidden_layers + 10                # as in BaseVAE.__init__ (y_encoder)
    Lz = Lx = Lt = num_hidden_layers
    K2 = 2 * LANES
    ks = jax.random.split(key, 13)
    bf = lambda a: a.astype(jnp.bfloat16)

    # ---- Y encoder ----
    wy_in_r, by_in_r = _linear_init(ks[0], D, H)
    wy_in, by_in = bf(_place((LANES, LANES), wy_in_r)), _place((1, LANES), by_in_r)
    wy_hid, by_hid = _hidden_stack_init(ks[1], Ly, H)
    wy_out_r, by_out_r = _linear_init(ks[2], H, C)
    wy_out = bf(_place((LANES, LANES), wy_out_r, 0, CL_OFF))
    by_out = _place((1, LANES), by_out_r, 0, CL_OFF)

    # ---- Z encoder: first layer on concat(x, y_hat), fused K=256 weight ----
    wz_cat, bz_in_r = _linear_init(ks[3], D + C, H)
    wz_in = jnp.zeros((K2, LANES), jnp.float32)
    wz_in = wz_in.at[:D, :H].set(wz_cat[:D])
    wz_in = wz_in.at[LANES + CL_OFF:LANES + CL_OFF + C, :H].set(wz_cat[D:])
    wz_in, bz_in = bf(wz_in), _place((1, LANES), bz_in_r)
    wz_hid, bz_hid = _hidden_stack_init(ks[4], Lz, H)
    wz_mu_r, bz_mu_r = _linear_init(ks[5], H, Z)
    wz_lv_r, bz_lv_r = _linear_init(ks[6], H, Z)
    wz_head = jnp.zeros((LANES, K2), jnp.float32)
    wz_head = wz_head.at[:H, MU_OFF:MU_OFF + Z].set(wz_mu_r)
    wz_head = wz_head.at[:H, LANES + MU_OFF:LANES + MU_OFF + Z].set(wz_lv_r)
    wz_head = bf(wz_head)
    bz_head = jnp.zeros((1, K2), jnp.float32)
    bz_head = bz_head.at[:, MU_OFF:MU_OFF + Z].set(bz_mu_r)
    bz_head = bz_head.at[:, LANES + MU_OFF:LANES + MU_OFF + Z].set(bz_lv_r)

    # ---- X decoder: first layer on concat(z, y_hat), fused K=256 weight ----
    wx_cat, bx_in_r = _linear_init(ks[7], Z + C, H)
    wx_in = jnp.zeros((K2, LANES), jnp.float32)
    wx_in = wx_in.at[MU_OFF:MU_OFF + Z, :H].set(wx_cat[:Z])
    wx_in = wx_in.at[LANES + CL_OFF:LANES + CL_OFF + C, :H].set(wx_cat[Z:])
    wx_in, bx_in = bf(wx_in), _place((1, LANES), bx_in_r)
    wx_hid, bx_hid = _hidden_stack_init(ks[8], Lx, H)
    wx_out_r, bx_out_r = _linear_init(ks[9], H, D)
    wx_out = bf(_place((LANES, LANES), wx_out_r, 0, XH_OFF))
    bx_out = _place((1, LANES), bx_out_r, 0, XH_OFF)

    # ---- T decoder: first layer on concat(x_hat, y_hat), fused K=256 -------
    wt_cat, bt_in_r = _linear_init(ks[10], D + C, H)
    wt_in = jnp.zeros((K2, LANES), jnp.float32)
    wt_in = wt_in.at[XH_OFF:XH_OFF + D, :H].set(wt_cat[:D])
    wt_in = wt_in.at[LANES + CL_OFF:LANES + CL_OFF + C, :H].set(wt_cat[D:])
    wt_in, bt_in = bf(wt_in), _place((1, LANES), bt_in_r)
    wt_hid, bt_hid = _hidden_stack_init(ks[11], Lt, H)
    wt_out_r, bt_out_r = _linear_init(ks[12], H, C)
    wt_out = bf(_place((LANES, LANES), wt_out_r, 0, NL_OFF))
    bt_out = _place((1, LANES), bt_out_r, 0, NL_OFF)

    params = (wy_in, by_in, wy_hid, by_hid, wy_out, by_out,
              wz_in, bz_in, wz_hid, bz_hid, wz_head, bz_head,
              wx_in, bx_in, wx_hid, bx_hid, wx_out, bx_out,
              wt_in, bt_in, wt_hid, bt_hid, wt_out, bt_out)
    dims = dict(D=D, H=H, Z=Z, C=C, Ly=Ly, Lz=Lz, Lx=Lx, Lt=Lt,
                NL_OFF=NL_OFF, CL_OFF=CL_OFF, MU_OFF=MU_OFF, XH_OFF=XH_OFF)
    return params, dims


# --------------------------------------------------------------------------
# Wrapper around pallas_call
# --------------------------------------------------------------------------
def _fixed_spec(shape):
    # Constant-index VMEM-resident operand (weights / biases).
    # TODO(synk): pipeline_mode=pl.Buffered(1) would drop the redundant double
    #             buffer for these (~0.9 MiB); left at the default to keep the
    #             lowering path maximally conservative.
    nd = len(shape)
    return pl.BlockSpec(tuple(shape), lambda i, _nd=nd: (0,) * _nd)


def _row_spec(tile_n, n_cols):
    return pl.BlockSpec((tile_n, n_cols), lambda i: (i, 0))


def _num_tensorcores():
    """1 for single-TC parts (v2/v3 per-device, v5e, v6e), else 2 (v4/v5p/v7x)."""
    try:
        kind = jax.devices()[0].device_kind.lower()
    except Exception:
        return 2
    single_tc = ("v2", "v3", "v5e", "v5 lite", "v5lite", "v6e", "v6 lite", "v6lite")
    return 1 if any(tag in kind for tag in single_tc) else 2


def _pack_input_slab(x, gumbel_noise, eps_uniform, dims, n_rows):
    """x | gumbel | eps packed into one lane-dense (n_rows, 128) f32 slab.
    Gumbel/eps are placed on the lanes where c_logits / mu come out."""
    D, Z, C = dims["D"], dims["Z"], dims["C"]
    CL_OFF, MU_OFF = dims["CL_OFF"], dims["MU_OFF"]
    N = x.shape[0]
    slab = jnp.zeros((n_rows, LANES), jnp.float32)
    slab = slab.at[:N, :D].set(x.astype(jnp.float32))
    slab = slab.at[:N, CL_OFF:CL_OFF + C].set(gumbel_noise.astype(jnp.float32))
    slab = slab.at[:N, MU_OFF:MU_OFF + Z].set(eps_uniform.astype(jnp.float32))
    return slab


def base_vae_forward(x, params, dims, gumbel_noise, eps_uniform, *, tile_n=None):
    N = x.shape[0]
    D, H, Z, C = dims["D"], dims["H"], dims["Z"], dims["C"]
    Ly, Lz, Lx, Lt = dims["Ly"], dims["Lz"], dims["Lx"], dims["Lt"]
    NL_OFF, CL_OFF = dims["NL_OFF"], dims["CL_OFF"]
    MU_OFF, XH_OFF = dims["MU_OFF"], dims["XH_OFF"]

    # ---- batch tiling: one big tile on single-TC parts (v5e/v6e),
    #      >= 2 even "parallel" tiles on 2-TC parts (v4/v5p/v7x) --------------
    n128 = _round_up(max(N, 1), LANES)
    if tile_n is None:
        if _num_tensorcores() >= 2 and n128 >= 2 * LANES:
            tile_n = n128 // 2 if n128 <= 512 else LANES
        else:
            tile_n = n128 if n128 <= 512 else LANES
    n_pad = _round_up(n128, tile_n)
    grid = (n_pad // tile_n,)

    in_slab = _pack_input_slab(x, gumbel_noise, eps_uniform, dims, n_pad)
    args = (in_slab,) + tuple(params)
    in_specs = [_row_spec(tile_n, LANES)] + [_fixed_spec(p.shape) for p in params]

    # advisory cost estimate in LOGICAL dims (not padded 128s)
    macs = (D * H + Ly * H * H + H * C
            + (D + C) * H + Lz * H * H + 2 * H * Z
            + (Z + C) * H + Lx * H * H + H * D
            + (D + C) * H + Lt * H * H + H * C)
    cost = pl.CostEstimate(
        flops=int(2 * N * macs),
        transcendentals=int(N * (C + Z + D)),
        bytes_accessed=int(sum(int(a.size) * a.dtype.itemsize for a in args)
                           + n_pad * 2 * LANES * 4))

    slab = pl.pallas_call(
        _make_kernel(dims),
        out_shape=jax.ShapeDtypeStruct((n_pad, 2 * LANES), jnp.float32),
        grid=grid,
        in_specs=in_specs,
        out_specs=_row_spec(tile_n, 2 * LANES),
        compiler_params=pltpu.CompilerParams(
            dimension_semantics=("parallel",)),
        cost_estimate=cost,
    )(*args)

    # compact (N, 256) slab -> logical outputs (cheap host-side slices)
    x_hat    = slab[:N, XH_OFF:XH_OFF + D]
    n_logits = slab[:N, NL_OFF:NL_OFF + C]
    mu       = slab[:N, MU_OFF:MU_OFF + Z]
    logvar   = slab[:N, LANES + MU_OFF:LANES + MU_OFF + Z]
    c_emb    = slab[:N, 0:H]
    c_logits = slab[:N, CL_OFF:CL_OFF + C]
    y_hat    = slab[:N, LANES + CL_OFF:LANES + CL_OFF + C]
    return x_hat, n_logits, mu, logvar, c_emb, c_logits, y_hat


# --------------------------------------------------------------------------
# Plain-JAX mirror of the kernel math (used as a correctness cross-check)
# --------------------------------------------------------------------------
def _ref_forward(slab, params, dims):
    (wy_in, by_in, wy_hid, by_hid, wy_out, by_out,
     wz_in, bz_in, wz_hid, bz_hid, wz_head, bz_head,
     wx_in, bx_in, wx_hid, bx_hid, wx_out, bx_out,
     wt_in, bt_in, wt_hid, bt_hid, wt_out, bt_out) = params
    D, H, Z, C = dims["D"], dims["H"], dims["Z"], dims["C"]
    NL_OFF, CL_OFF = dims["NL_OFF"], dims["CL_OFF"]
    MU_OFF, XH_OFF = dims["MU_OFF"], dims["XH_OFF"]
    lane = jnp.arange(LANES)[None, :]
    slab_bf = slab.astype(jnp.bfloat16)

    h = _relu(_dot(slab_bf, wy_in) + by_in)
    h = _hidden_stack(h, wy_hid, by_hid)
    c_emb = h
    c_logits = _dot(h, wy_out) + by_out
    cls_mask = (lane >= CL_OFF) & (lane < CL_OFF + C)
    gl = jnp.where(cls_mask, c_logits + slab, -1e30)
    gl = gl - jnp.max(gl, axis=-1, keepdims=True)
    eg = jnp.exp(gl)
    y_hat = eg / jnp.sum(eg, axis=-1, keepdims=True)
    y_bf = y_hat.astype(jnp.bfloat16)

    h = _relu(_dot(jnp.concatenate([slab_bf, y_bf], -1), wz_in) + bz_in)
    h = _hidden_stack(h, wz_hid, bz_hid)
    head = _dot(h, wz_head) + bz_head
    mu, logvar = head[:, :LANES], head[:, LANES:]
    eps = jnp.where((lane >= MU_OFF) & (lane < MU_OFF + Z), slab, 0.0)
    z = mu + eps * jnp.exp(0.5 * logvar)

    h = _relu(_dot(jnp.concatenate([z.astype(jnp.bfloat16), y_bf], -1), wx_in) + bx_in)
    h = _hidden_stack(h, wx_hid, bx_hid)
    x_hat = jax.nn.sigmoid(_dot(h, wx_out) + bx_out)

    h = _relu(_dot(jnp.concatenate(
        [jnp.where((lane >= XH_OFF) & (lane < XH_OFF + D), x_hat, 0.0)
         .astype(jnp.bfloat16), y_bf], -1), wt_in) + bt_in)
    h = _hidden_stack(h, wt_hid, bt_hid)
    n_logits = _dot(h, wt_out) + bt_out

    return (x_hat[:, XH_OFF:XH_OFF + D],
            n_logits[:, NL_OFF:NL_OFF + C],
            mu[:, MU_OFF:MU_OFF + Z],
            logvar[:, MU_OFF:MU_OFF + Z],
            c_emb[:, :H],
            c_logits[:, CL_OFF:CL_OFF + C],
            y_hat[:, CL_OFF:CL_OFF + C])


# --------------------------------------------------------------------------
# Main
# --------------------------------------------------------------------------
if __name__ == "__main__":
    # Module defaults: feature_dim=28, hidden_size=25, z_dim=10, num_classes=10,
    # num_hidden_layers=1. Batch = 256.
    N, D, H, Z, C, L = 256, 28, 25, 10, 10, 1

    key = jax.random.PRNGKey(0)
    k_x, k_p, k_g, k_e = jax.random.split(key, 4)

    x = jax.random.normal(k_x, (N, D), jnp.float32)
    params, dims = init_base_vae_params(k_p, feature_dim=D, num_hidden_layers=L,
                                        hidden_size=H, z_dim=Z, num_classes=C)
    gumbel_noise = jax.random.gumbel(k_g, (N, C), jnp.float32)   # F.gumbel_softmax noise
    eps_uniform = jax.random.uniform(k_e, (N, Z), jnp.float32)   # torch.rand_like (U[0,1))

    outs = base_vae_forward(x, params, dims, gumbel_noise, eps_uniform)
    outs = jax.block_until_ready(outs)
    x_hat, n_logits, mu, logvar, c_emb, c_logits, y_hat = outs

    assert x_hat.shape == (N, D) and n_logits.shape == (N, C)
    assert mu.shape == (N, Z) and logvar.shape == (N, Z)
    assert c_emb.shape == (N, H) and c_logits.shape == (N, C) and y_hat.shape == (N, C)
    # y_hat rows must be a valid softmax (exact reciprocal now -> tight tol)
    assert bool(jnp.all(jnp.abs(jnp.sum(y_hat, axis=-1) - 1.0) < 1e-3))
    # sigmoid decode stays in [0, 1]; everything finite
    assert bool(jnp.all((x_hat >= 0.0) & (x_hat <= 1.0)))
    for o in outs:
        assert bool(jnp.all(jnp.isfinite(o)))

    # cross-check the fused kernel against a plain-JAX mirror of the same math
    ref_slab = _pack_input_slab(x, gumbel_noise, eps_uniform, dims, N)
    refs = _ref_forward(ref_slab, params, dims)
    for got, want in zip(outs, refs):
        assert bool(jnp.allclose(got, want, atol=1e-2, rtol=0.0))

    print("KERNEL_OK")
</pallas_src>

<mosaic_0001>
module attributes {stable_mosaic.version = 11 : i64} {
  func.func @kernel(%arg0: i32, %arg1: memref<128x128xf32, #tpu.memory_space<vmem>>, %arg2: memref<128x128xbf16, #tpu.memory_space<vmem>>, %arg3: memref<1x128xf32, #tpu.memory_space<vmem>>, %arg4: memref<11x128x128xbf16, #tpu.memory_space<vmem>>, %arg5: memref<11x1x128xf32, #tpu.memory_space<vmem>>, %arg6: memref<128x128xbf16, #tpu.memory_space<vmem>>, %arg7: memref<1x128xf32, #tpu.memory_space<vmem>>, %arg8: memref<256x128xbf16, #tpu.memory_space<vmem>>, %arg9: memref<1x128xf32, #tpu.memory_space<vmem>>, %arg10: memref<1x128x128xbf16, #tpu.memory_space<vmem>>, %arg11: memref<1x1x128xf32, #tpu.memory_space<vmem>>, %arg12: memref<128x256xbf16, #tpu.memory_space<vmem>>, %arg13: memref<1x256xf32, #tpu.memory_space<vmem>>, %arg14: memref<256x128xbf16, #tpu.memory_space<vmem>>, %arg15: memref<1x128xf32, #tpu.memory_space<vmem>>, %arg16: memref<1x128x128xbf16, #tpu.memory_space<vmem>>, %arg17: memref<1x1x128xf32, #tpu.memory_space<vmem>>, %arg18: memref<128x128xbf16, #tpu.memory_space<vmem>>, %arg19: memref<1x128xf32, #tpu.memory_space<vmem>>, %arg20: memref<256x128xbf16, #tpu.memory_space<vmem>>, %arg21: memref<1x128xf32, #tpu.memory_space<vmem>>, %arg22: memref<1x128x128xbf16, #tpu.memory_space<vmem>>, %arg23: memref<1x1x128xf32, #tpu.memory_space<vmem>>, %arg24: memref<128x128xbf16, #tpu.memory_space<vmem>>, %arg25: memref<1x128xf32, #tpu.memory_space<vmem>>, %arg26: memref<128x256xf32, #tpu.memory_space<vmem>>) attributes {dimension_semantics = [#tpu.dimension_semantics<parallel>], iteration_bounds = array<i64: 2>, scalar_prefetch = 0 : i64, scratch_operands = 0 : i64, tpu.core_type = #tpu.core_type<tc>, window_params = [{transform_indices = @transform_0, window_bounds = array<i64: 128, 128>}, {pipeline_mode = #tpu.pipeline_mode<synchronous>, transform_indices = @transform_1, window_bounds = array<i64: 128, 128>}, {pipeline_mode = #tpu.pipeline_mode<synchronous>, transform_indices = @transform_2, window_bounds = array<i64: 1, 128>}, {pipeline_mode = #tpu.pipeline_mode<synchronous>, transform_indices = @transform_3, window_bounds = array<i64: 11, 128, 128>}, {pipeline_mode = #tpu.pipeline_mode<synchronous>, transform_indices = @transform_4, window_bounds = array<i64: 11, 1, 128>}, {pipeline_mode = #tpu.pipeline_mode<synchronous>, transform_indices = @transform_5, window_bounds = array<i64: 128, 128>}, {pipeline_mode = #tpu.pipeline_mode<synchronous>, transform_indices = @transform_6, window_bounds = array<i64: 1, 128>}, {pipeline_mode = #tpu.pipeline_mode<synchronous>, transform_indices = @transform_7, window_bounds = array<i64: 256, 128>}, {pipeline_mode = #tpu.pipeline_mode<synchronous>, transform_indices = @transform_8, window_bounds = array<i64: 1, 128>}, {pipeline_mode = #tpu.pipeline_mode<synchronous>, transform_indices = @transform_9, window_bounds = array<i64: 1, 128, 128>}, {pipeline_mode = #tpu.pipeline_mode<synchronous>, transform_indices = @transform_10, window_bounds = array<i64: 1, 1, 128>}, {pipeline_mode = #tpu.pipeline_mode<synchronous>, transform_indices = @transform_11, window_bounds = array<i64: 128, 256>}, {pipeline_mode = #tpu.pipeline_mode<synchronous>, transform_indices = @transform_12, window_bounds = array<i64: 1, 256>}, {pipeline_mode = #tpu.pipeline_mode<synchronous>, transform_indices = @transform_13, window_bounds = array<i64: 256, 128>}, {pipeline_mode = #tpu.pipeline_mode<synchronous>, transform_indices = @transform_14, window_bounds = array<i64: 1, 128>}, {pipeline_mode = #tpu.pipeline_mode<synchronous>, transform_indices = @transform_15, window_bounds = array<i64: 1, 128, 128>}, {pipeline_mode = #tpu.pipeline_mode<synchronous>, transform_indices = @transform_16, window_bounds = array<i64: 1, 1, 128>}, {pipeline_mode = #tpu.pipeline_mode<synchronous>, transform_indices = @transform_17, window_bounds = array<i64: 128, 128>}, {pipeline_mode = #tpu.pipeline_mode<synchronous>, transform_indices = @transform_18, window_bounds = array<i64: 1, 128>}, {pipeline_mode = #tpu.pipeline_mode<synchronous>, transform_indices = @transform_19, window_bounds = array<i64: 256, 128>}, {pipeline_mode = #tpu.pipeline_mode<synchronous>, transform_indices = @transform_20, window_bounds = array<i64: 1, 128>}, {pipeline_mode = #tpu.pipeline_mode<synchronous>, transform_indices = @transform_21, window_bounds = array<i64: 1, 128, 128>}, {pipeline_mode = #tpu.pipeline_mode<synchronous>, transform_indices = @transform_22, window_bounds = array<i64: 1, 1, 128>}, {pipeline_mode = #tpu.pipeline_mode<synchronous>, transform_indices = @transform_23, window_bounds = array<i64: 128, 128>}, {pipeline_mode = #tpu.pipeline_mode<synchronous>, transform_indices = @transform_24, window_bounds = array<i64: 1, 128>}, {transform_indices = @transform_25, window_bounds = array<i64: 128, 256>}]} {
    %c0 = arith.constant 0 : index
    %c0_0 = arith.constant 0 : index
    %0 = vector.load %arg1[%c0, %c0_0] : memref<128x128xf32, #tpu.memory_space<vmem>>, vector<128x128xf32>
    %1 = tpu.iota {dimensions = array<i32: 1>} : vector<128x128xi32>
    %2 = arith.truncf %0 : vector<128x128xf32> to vector<128x128xbf16>
    %c0_1 = arith.constant 0 : index
    %c0_2 = arith.constant 0 : index
    %3 = vector.load %arg2[%c0_1, %c0_2] : memref<128x128xbf16, #tpu.memory_space<vmem>>, vector<128x128xbf16>
    %cst = arith.constant dense<0.000000e+00> : vector<128x128xf32>
    %4 = tpu.matmul %2, %3, %cst {dimension_numbers = #tpu.dot_dimension_numbers<[1], [0], [0], [1], [0, 0, 1, 1], [], []>} : vector<128x128xbf16>, vector<128x128xbf16>, vector<128x128xf32> -> vector<128x128xf32>
    %c0_3 = arith.constant 0 : index
    %c0_4 = arith.constant 0 : index
    %5 = vector.load %arg3[%c0_3, %c0_4] : memref<1x128xf32, #tpu.memory_space<vmem>>, vector<1x128xf32>
    %6 = vector.broadcast %5 : vector<1x128xf32> to vector<128x128xf32>
    %7 = arith.addf %4, %6 : vector<128x128xf32>
    %cst_5 = arith.constant 0.000000e+00 : f32
    %8 = vector.broadcast %cst_5 : f32 to vector<128x128xf32>
    %9 = arith.maximumf %7, %8 : vector<128x128xf32>
    %c0_i32 = arith.constant 0 : i32
    %10 = arith.index_cast %c0_i32 : i32 to index
    %c0_6 = arith.constant 0 : index
    %c0_7 = arith.constant 0 : index
    %11 = vector.load %arg4[%10, %c0_6, %c0_7] : memref<11x128x128xbf16, #tpu.memory_space<vmem>>, vector<1x128x128xbf16>
    %12 = vector.shape_cast %11 : vector<1x128x128xbf16> to vector<128x128xbf16>
    %13 = arith.truncf %9 : vector<128x128xf32> to vector<128x128xbf16>
    %cst_8 = arith.constant dense<0.000000e+00> : vector<128x128xf32>
    %14 = tpu.matmul %13, %12, %cst_8 {dimension_numbers = #tpu.dot_dimension_numbers<[1], [0], [0], [1], [0, 0, 1, 1], [], []>} : vector<128x128xbf16>, vector<128x128xbf16>, vector<128x128xf32> -> vector<128x128xf32>
    %15 = arith.index_cast %c0_i32 : i32 to index
    %c0_9 = arith.constant 0 : index
    %c0_10 = arith.constant 0 : index
    %16 = vector.load %arg5[%15, %c0_9, %c0_10] : memref<11x1x128xf32, #tpu.memory_space<vmem>>, vector<1x1x128xf32>
    %17 = vector.shape_cast %16 : vector<1x1x128xf32> to vector<1x128xf32>
    %18 = vector.broadcast %17 : vector<1x128xf32> to vector<128x128xf32>
    %19 = arith.addf %14, %18 : vector<128x128xf32>
    %cst_11 = arith.constant 0.000000e+00 : f32
    %20 = vector.broadcast %cst_11 : f32 to vector<128x128xf32>
    %21 = arith.maximumf %19, %20 : vector<128x128xf32>
    %c1_i32 = arith.constant 1 : i32
    %22 = arith.index_cast %c1_i32 : i32 to index
    %c0_12 = arith.constant 0 : index
    %c0_13 = arith.constant 0 : index
    %23 = vector.load %arg4[%22, %c0_12, %c0_13] : memref<11x128x128xbf16, #tpu.memory_space<vmem>>, vector<1x128x128xbf16>
    %24 = vector.shape_cast %23 : vector<1x128x128xbf16> to vector<128x128xbf16>
    %25 = arith.truncf %21 : vector<128x128xf32> to vector<128x128xbf16>
    %cst_14 = arith.constant dense<0.000000e+00> : vector<128x128xf32>
    %26 = tpu.matmul %25, %24, %cst_14 {dimension_numbers = #tpu.dot_dimension_numbers<[1], [0], [0], [1], [0, 0, 1, 1], [], []>} : vector<128x128xbf16>, vector<128x128xbf16>, vector<128x128xf32> -> vector<128x128xf32>
    %27 = arith.index_cast %c1_i32 : i32 to index
    %c0_15 = arith.constant 0 : index
    %c0_16 = arith.constant 0 : index
    %28 = vector.load %arg5[%27, %c0_15, %c0_16] : memref<11x1x128xf32, #tpu.memory_space<vmem>>, vector<1x1x128xf32>
    %29 = vector.shape_cast %28 : vector<1x1x128xf32> to vector<1x128xf32>
    %30 = vector.broadcast %29 : vector<1x128xf32> to vector<128x128xf32>
    %31 = arith.addf %26, %30 : vector<128x128xf32>
    %cst_17 = arith.constant 0.000000e+00 : f32
    %32 = vector.broadcast %cst_17 : f32 to vector<128x128xf32>
    %33 = arith.maximumf %31, %32 : vector<128x128xf32>
    %c2_i32 = arith.constant 2 : i32
    %34 = arith.index_cast %c2_i32 : i32 to index
    %c0_18 = arith.constant 0 : index
    %c0_19 = arith.constant 0 : index
    %35 = vector.load %arg4[%34, %c0_18, %c0_19] : memref<11x128x128xbf16, #tpu.memory_space<vmem>>, vector<1x128x128xbf16>
    %36 = vector.shape_cast %35 : vector<1x128x128xbf16> to vector<128x128xbf16>
    %37 = arith.truncf %33 : vector<128x128xf32> to vector<128x128xbf16>
    %cst_20 = arith.constant dense<0.000000e+00> : vector<128x128xf32>
    %38 = tpu.matmul %37, %36, %cst_20 {dimension_numbers = #tpu.dot_dimension_numbers<[1], [0], [0], [1], [0, 0, 1, 1], [], []>} : vector<128x128xbf16>, vector<128x128xbf16>, vector<128x128xf32> -> vector<128x128xf32>
    %39 = arith.index_cast %c2_i32 : i32 to index
    %c0_21 = arith.constant 0 : index
    %c0_22 = arith.constant 0 : index
    %40 = vector.load %arg5[%39, %c0_21, %c0_22] : memref<11x1x128xf32, #tpu.memory_space<vmem>>, vector<1x1x128xf32>
    %41 = vector.shape_cast %40 : vector<1x1x128xf32> to vector<1x128xf32>
    %42 = vector.broadcast %41 : vector<1x128xf32> to vector<128x128xf32>
    %43 = arith.addf %38, %42 : vector<128x128xf32>
    %cst_23 = arith.constant 0.000000e+00 : f32
    %44 = vector.broadcast %cst_23 : f32 to vector<128x128xf32>
    %45 = arith.maximumf %43, %44 : vector<128x128xf32>
    %c3_i32 = arith.constant 3 : i32
    %46 = arith.index_cast %c3_i32 : i32 to index
    %c0_24 = arith.constant 0 : index
    %c0_25 = arith.constant 0 : index
    %47 = vector.load %arg4[%46, %c0_24, %c0_25] : memref<11x128x128xbf16, #tpu.memory_space<vmem>>, vector<1x128x128xbf16>
    %48 = vector.shape_cast %47 : vector<1x128x128xbf16> to vector<128x128xbf16>
    %49 = arith.truncf %45 : vector<128x128xf32> to vector<128x128xbf16>
    %cst_26 = arith.constant dense<0.000000e+00> : vector<128x128xf32>
    %50 = tpu.matmul %49, %48, %cst_26 {dimension_numbers = #tpu.dot_dimension_numbers<[1], [0], [0], [1], [0, 0, 1, 1], [], []>} : vector<128x128xbf16>, vector<128x128xbf16>, vector<128x128xf32> -> vector<128x128xf32>
    %51 = arith.index_cast %c3_i32 : i32 to index
    %c0_27 = arith.constant 0 : index
    %c0_28 = arith.constant 0 : index
    %52 = vector.load %arg5[%51, %c0_27, %c0_28] : memref<11x1x128xf32, #tpu.memory_space<vmem>>, vector<1x1x128xf32>
    %53 = vector.shape_cast %52 : vector<1x1x128xf32> to vector<1x128xf32>
    %54 = vector.broadcast %53 : vector<1x128xf32> to vector<128x128xf32>
    %55 = arith.addf %50, %54 : vector<128x128xf32>
    %cst_29 = arith.constant 0.000000e+00 : f32
    %56 = vector.broadcast %cst_29 : f32 to vector<128x128xf32>
    %57 = arith.maximumf %55, %56 : vector<128x128xf32>
    %c4_i32 = arith.constant 4 : i32
    %58 = arith.index_cast %c4_i32 : i32 to index
    %c0_30 = arith.constant 0 : index
    %c0_31 = arith.constant 0 : index
    %59 = vector.load %arg4[%58, %c0_30, %c0_31] : memref<11x128x128xbf16, #tpu.memory_space<vmem>>, vector<1x128x128xbf16>
    %60 = vector.shape_cast %59 : vector<1x128x128xbf16> to vector<128x128xbf16>
    %61 = arith.truncf %57 : vector<128x128xf32> to vector<128x128xbf16>
    %cst_32 = arith.constant dense<0.000000e+00> : vector<128x128xf32>
    %62 = tpu.matmul %61, %60, %cst_32 {dimension_numbers = #tpu.dot_dimension_numbers<[1], [0], [0], [1], [0, 0, 1, 1], [], []>} : vector<128x128xbf16>, vector<128x128xbf16>, vector<128x128xf32> -> vector<128x128xf32>
    %63 = arith.index_cast %c4_i32 : i32 to index
    %c0_33 = arith.constant 0 : index
    %c0_34 = arith.constant 0 : index
    %64 = vector.load %arg5[%63, %c0_33, %c0_34] : memref<11x1x128xf32, #tpu.memory_space<vmem>>, vector<1x1x128xf32>
    %65 = vector.shape_cast %64 : vector<1x1x128xf32> to vector<1x128xf32>
    %66 = vector.broadcast %65 : vector<1x128xf32> to vector<128x128xf32>
    %67 = arith.addf %62, %66 : vector<128x128xf32>
    %cst_35 = arith.constant 0.000000e+00 : f32
    %68 = vector.broadcast %cst_35 : f32 to vector<128x128xf32>
    %69 = arith.maximumf %67, %68 : vector<128x128xf32>
    %c5_i32 = arith.constant 5 : i32
    %70 = arith.index_cast %c5_i32 : i32 to index
    %c0_36 = arith.constant 0 : index
    %c0_37 = arith.constant 0 : index
    %71 = vector.load %arg4[%70, %c0_36, %c0_37] : memref<11x128x128xbf16, #tpu.memory_space<vmem>>, vector<1x128x128xbf16>
    %72 = vector.shape_cast %71 : vector<1x128x128xbf16> to vector<128x128xbf16>
    %73 = arith.truncf %69 : vector<128x128xf32> to vector<128x128xbf16>
    %cst_38 = arith.constant dense<0.000000e+00> : vector<128x128xf32>
    %74 = tpu.matmul %73, %72, %cst_38 {dimension_numbers = #tpu.dot_dimension_numbers<[1], [0], [0], [1], [0, 0, 1, 1], [], []>} : vector<128x128xbf16>, vector<128x128xbf16>, vector<128x128xf32> -> vector<128x128xf32>
    %75 = arith.index_cast %c5_i32 : i32 to index
    %c0_39 = arith.constant 0 : index
    %c0_40 = arith.constant 0 : index
    %76 = vector.load %arg5[%75, %c0_39, %c0_40] : memref<11x1x128xf32, #tpu.memory_space<vmem>>, vector<1x1x128xf32>
    %77 = vector.shape_cast %76 : vector<1x1x128xf32> to vector<1x128xf32>
    %78 = vector.broadcast %77 : vector<1x128xf32> to vector<128x128xf32>
    %79 = arith.addf %74, %78 : vector<128x128xf32>
    %cst_41 = arith.constant 0.000000e+00 : f32
    %80 = vector.broadcast %cst_41 : f32 to vector<128x128xf32>
    %81 = arith.maximumf %79, %80 : vector<128x128xf32>
    %c6_i32 = arith.constant 6 : i32
    %82 = arith.index_cast %c6_i32 : i32 to index
    %c0_42 = arith.constant 0 : index
    %c0_43 = arith.constant 0 : index
    %83 = vector.load %arg4[%82, %c0_42, %c0_43] : memref<11x128x128xbf16, #tpu.memory_space<vmem>>, vector<1x128x128xbf16>
    %84 = vector.shape_cast %83 : vector<1x128x128xbf16> to vector<128x128xbf16>
    %85 = arith.truncf %81 : vector<128x128xf32> to vector<128x128xbf16>
    %cst_44 = arith.constant dense<0.000000e+00> : vector<128x128xf32>
    %86 = tpu.matmul %85, %84, %cst_44 {dimension_numbers = #tpu.dot_dimension_numbers<[1], [0], [0], [1], [0, 0, 1, 1], [], []>} : vector<128x128xbf16>, vector<128x128xbf16>, vector<128x128xf32> -> vector<128x128xf32>
    %87 = arith.index_cast %c6_i32 : i32 to index
    %c0_45 = arith.constant 0 : index
    %c0_46 = arith.constant 0 : index
    %88 = vector.load %arg5[%87, %c0_45, %c0_46] : memref<11x1x128xf32, #tpu.memory_space<vmem>>, vector<1x1x128xf32>
    %89 = vector.shape_cast %88 : vector<1x1x128xf32> to vector<1x128xf32>
    %90 = vector.broadcast %89 : vector<1x128xf32> to vector<128x128xf32>
    %91 = arith.addf %86, %90 : vector<128x128xf32>
    %cst_47 = arith.constant 0.000000e+00 : f32
    %92 = vector.broadcast %cst_47 : f32 to vector<128x128xf32>
    %93 = arith.maximumf %91, %92 : vector<128x128xf32>
    %c7_i32 = arith.constant 7 : i32
    %94 = arith.index_cast %c7_i32 : i32 to index
    %c0_48 = arith.constant 0 : index
    %c0_49 = arith.constant 0 : index
    %95 = vector.load %arg4[%94, %c0_48, %c0_49] : memref<11x128x128xbf16, #tpu.memory_space<vmem>>, vector<1x128x128xbf16>
    %96 = vector.shape_cast %95 : vector<1x128x128xbf16> to vector<128x128xbf16>
    %97 = arith.truncf %93 : vector<128x128xf32> to vector<128x128xbf16>
    %cst_50 = arith.constant dense<0.000000e+00> : vector<128x128xf32>
    %98 = tpu.matmul %97, %96, %cst_50 {dimension_numbers = #tpu.dot_dimension_numbers<[1], [0], [0], [1], [0, 0, 1, 1], [], []>} : vector<128x128xbf16>, vector<128x128xbf16>, vector<128x128xf32> -> vector<128x128xf32>
    %99 = arith.index_cast %c7_i32 : i32 to index
    %c0_51 = arith.constant 0 : index
    %c0_52 = arith.constant 0 : index
    %100 = vector.load %arg5[%99, %c0_51, %c0_52] : memref<11x1x128xf32, #tpu.memory_space<vmem>>, vector<1x1x128xf32>
    %101 = vector.shape_cast %100 : vector<1x1x128xf32> to vector<1x128xf32>
    %102 = vector.broadcast %101 : vector<1x128xf32> to vector<128x128xf32>
    %103 = arith.addf %98, %102 : vector<128x128xf32>
    %cst_53 = arith.constant 0.000000e+00 : f32
    %104 = vector.broadcast %cst_53 : f32 to vector<128x128xf32>
    %105 = arith.maximumf %103, %104 : vector<128x128xf32>
    %c8_i32 = arith.constant 8 : i32
    %106 = arith.index_cast %c8_i32 : i32 to index
    %c0_54 = arith.constant 0 : index
    %c0_55 = arith.constant 0 : index
    %107 = vector.load %arg4[%106, %c0_54, %c0_55] : memref<11x128x128xbf16, #tpu.memory_space<vmem>>, vector<1x128x128xbf16>
    %108 = vector.shape_cast %107 : vector<1x128x128xbf16> to vector<128x128xbf16>
    %109 = arith.truncf %105 : vector<128x128xf32> to vector<128x128xbf16>
    %cst_56 = arith.constant dense<0.000000e+00> : vector<128x128xf32>
    %110 = tpu.matmul %109, %108, %cst_56 {dimension_numbers = #tpu.dot_dimension_numbers<[1], [0], [0], [1], [0, 0, 1, 1], [], []>} : vector<128x128xbf16>, vector<128x128xbf16>, vector<128x128xf32> -> vector<128x128xf32>
    %111 = arith.index_cast %c8_i32 : i32 to index
    %c0_57 = arith.constant 0 : index
    %c0_58 = arith.constant 0 : index
    %112 = vector.load %arg5[%111, %c0_57, %c0_58] : memref<11x1x128xf32, #tpu.memory_space<vmem>>, vector<1x1x128xf32>
    %113 = vector.shape_cast %112 : vector<1x1x128xf32> to vector<1x128xf32>
    %114 = vector.broadcast %113 : vector<1x128xf32> to vector<128x128xf32>
    %115 = arith.addf %110, %114 : vector<128x128xf32>
    %cst_59 = arith.constant 0.000000e+00 : f32
    %116 = vector.broadcast %cst_59 : f32 to vector<128x128xf32>
    %117 = arith.maximumf %115, %116 : vector<128x128xf32>
    %c9_i32 = arith.constant 9 : i32
    %118 = arith.index_cast %c9_i32 : i32 to index
    %c0_60 = arith.constant 0 : index
    %c0_61 = arith.constant 0 : index
    %119 = vector.load %arg4[%118, %c0_60, %c0_61] : memref<11x128x128xbf16, #tpu.memory_space<vmem>>, vector<1x128x128xbf16>
    %120 = vector.shape_cast %119 : vector<1x128x128xbf16> to vector<128x128xbf16>
    %121 = arith.truncf %117 : vector<128x128xf32> to vector<128x128xbf16>
    %cst_62 = arith.constant dense<0.000000e+00> : vector<128x128xf32>
    %122 = tpu.matmul %121, %120, %cst_62 {dimension_numbers = #tpu.dot_dimension_numbers<[1], [0], [0], [1], [0, 0, 1, 1], [], []>} : vector<128x128xbf16>, vector<128x128xbf16>, vector<128x128xf32> -> vector<128x128xf32>
    %123 = arith.index_cast %c9_i32 : i32 to index
    %c0_63 = arith.constant 0 : index
    %c0_64 = arith.constant 0 : index
    %124 = vector.load %arg5[%123, %c0_63, %c0_64] : memref<11x1x128xf32, #tpu.memory_space<vmem>>, vector<1x1x128xf32>
    %125 = vector.shape_cast %124 : vector<1x1x128xf32> to vector<1x128xf32>
    %126 = vector.broadcast %125 : vector<1x128xf32> to vector<128x128xf32>
    %127 = arith.addf %122, %126 : vector<128x128xf32>
    %cst_65 = arith.constant 0.000000e+00 : f32
    %128 = vector.broadcast %cst_65 : f32 to vector<128x128xf32>
    %129 = arith.maximumf %127, %128 : vector<128x128xf32>
    %c10_i32 = arith.constant 10 : i32
    %130 = arith.index_cast %c10_i32 : i32 to index
    %c0_66 = arith.constant 0 : index
    %c0_67 = arith.constant 0 : index
    %131 = vector.load %arg4[%130, %c0_66, %c0_67] : memref<11x128x128xbf16, #tpu.memory_space<vmem>>, vector<1x128x128xbf16>
    %132 = vector.shape_cast %131 : vector<1x128x128xbf16> to vector<128x128xbf16>
    %133 = arith.truncf %129 : vector<128x128xf32> to vector<128x128xbf16>
    %cst_68 = arith.constant dense<0.000000e+00> : vector<128x128xf32>
    %134 = tpu.matmul %133, %132, %cst_68 {dimension_numbers = #tpu.dot_dimension_numbers<[1], [0], [0], [1], [0, 0, 1, 1], [], []>} : vector<128x128xbf16>, vector<128x128xbf16>, vector<128x128xf32> -> vector<128x128xf32>
    %135 = arith.index_cast %c10_i32 : i32 to index
    %c0_69 = arith.constant 0 : index
    %c0_70 = arith.constant 0 : index
    %136 = vector.load %arg5[%135, %c0_69, %c0_70] : memref<11x1x128xf32, #tpu.memory_space<vmem>>, vector<1x1x128xf32>
    %137 = vector.shape_cast %136 : vector<1x1x128xf32> to vector<1x128xf32>
    %138 = vector.broadcast %137 : vector<1x128xf32> to vector<128x128xf32>
    %139 = arith.addf %134, %138 : vector<128x128xf32>
    %cst_71 = arith.constant 0.000000e+00 : f32
    %140 = vector.broadcast %cst_71 : f32 to vector<128x128xf32>
    %141 = arith.maximumf %139, %140 : vector<128x128xf32>
    %c11_i32 = arith.constant 11 : i32
    %c0_72 = arith.constant 0 : index
    %c0_73 = arith.constant 0 : index
    %142 = vector.load %arg6[%c0_72, %c0_73] : memref<128x128xbf16, #tpu.memory_space<vmem>>, vector<128x128xbf16>
    %143 = arith.truncf %141 : vector<128x128xf32> to vector<128x128xbf16>
    %cst_74 = arith.constant dense<0.000000e+00> : vector<128x128xf32>
    %144 = tpu.matmul %143, %142, %cst_74 {dimension_numbers = #tpu.dot_dimension_numbers<[1], [0], [0], [1], [0, 0, 1, 1], [], []>} : vector<128x128xbf16>, vector<128x128xbf16>, vector<128x128xf32> -> vector<128x128xf32>
    %c0_75 = arith.constant 0 : index
    %c0_76 = arith.constant 0 : index
    %145 = vector.load %arg7[%c0_75, %c0_76] : memref<1x128xf32, #tpu.memory_space<vmem>>, vector<1x128xf32>
    %146 = vector.broadcast %145 : vector<1x128xf32> to vector<128x128xf32>
    %147 = arith.addf %144, %146 : vector<128x128xf32>
    %c38_i32 = arith.constant 38 : i32
    %148 = vector.broadcast %c38_i32 : i32 to vector<128x128xi32>
    %149 = arith.cmpi sge, %1, %148 : vector<128x128xi32>
    %c48_i32 = arith.constant 48 : i32
    %150 = vector.broadcast %c48_i32 : i32 to vector<128x128xi32>
    %151 = arith.cmpi slt, %1, %150 : vector<128x128xi32>
    %152 = arith.andi %149, %151 : vector<128x128xi1>
    %153 = arith.addf %147, %0 : vector<128x128xf32>
    %cst_77 = arith.constant -1.000000e+30 : f32
    %154 = vector.broadcast %cst_77 : f32 to vector<128x128xf32>
    %155 = arith.select %152, %153, %154 : vector<128x128xi1>, vector<128x128xf32>
    %cst_78 = arith.constant dense<0xFF800000> : vector<128xf32>
    %156 = vector.multi_reduction <maximumf>, %155, %cst_78 [1] : vector<128x128xf32> to vector<128xf32>
    %157 = vector.shape_cast %156 : vector<128xf32> to vector<128x1xf32>
    %158 = vector.broadcast %157 : vector<128x1xf32> to vector<128x128xf32>
    %159 = arith.subf %155, %158 : vector<128x128xf32>
    %160 = math.exp %159 : vector<128x128xf32>
    %cst_79 = arith.constant dense<0.000000e+00> : vector<128xf32>
    %161 = vector.multi_reduction <add>, %160, %cst_79 [1] : vector<128x128xf32> to vector<128xf32>
    %162 = vector.shape_cast %161 : vector<128xf32> to vector<128x1xf32>
    %163 = tpu.reciprocal %162 : vector<128x1xf32> -> vector<128x1xf32>
    %164 = vector.broadcast %163 : vector<128x1xf32> to vector<128x128xf32>
    %165 = arith.mulf %160, %164 : vector<128x128xf32>
    %166 = arith.truncf %165 : vector<128x128xf32> to vector<128x128xbf16>
    %167 = tpu.concatenate %2, %166 in 1 : vector<128x128xbf16>, vector<128x128xbf16> -> vector<128x256xbf16>
    %c0_80 = arith.constant 0 : index
    %c0_81 = arith.constant 0 : index
    %168 = vector.load %arg8[%c0_80, %c0_81] : memref<256x128xbf16, #tpu.memory_space<vmem>>, vector<256x128xbf16>
    %cst_82 = arith.constant dense<0.000000e+00> : vector<128x128xf32>
    %169 = tpu.matmul %167, %168, %cst_82 {dimension_numbers = #tpu.dot_dimension_numbers<[1], [0], [0], [1], [0, 0, 1, 1], [], []>} : vector<128x256xbf16>, vector<256x128xbf16>, vector<128x128xf32> -> vector<128x128xf32>
    %c0_83 = arith.constant 0 : index
    %c0_84 = arith.constant 0 : index
    %170 = vector.load %arg9[%c0_83, %c0_84] : memref<1x128xf32, #tpu.memory_space<vmem>>, vector<1x128xf32>
    %171 = vector.broadcast %170 : vector<1x128xf32> to vector<128x128xf32>
    %172 = arith.addf %169, %171 : vector<128x128xf32>
    %cst_85 = arith.constant 0.000000e+00 : f32
    %173 = vector.broadcast %cst_85 : f32 to vector<128x128xf32>
    %174 = arith.maximumf %172, %173 : vector<128x128xf32>
    %c0_i32_86 = arith.constant 0 : i32
    %175 = arith.index_cast %c0_i32_86 : i32 to index
    %c0_87 = arith.constant 0 : index
    %c0_88 = arith.constant 0 : index
    %176 = vector.load %arg10[%175, %c0_87, %c0_88] : memref<1x128x128xbf16, #tpu.memory_space<vmem>>, vector<1x128x128xbf16>
    %177 = vector.shape_cast %176 : vector<1x128x128xbf16> to vector<128x128xbf16>
    %178 = arith.truncf %174 : vector<128x128xf32> to vector<128x128xbf16>
    %cst_89 = arith.constant dense<0.000000e+00> : vector<128x128xf32>
    %179 = tpu.matmul %178, %177, %cst_89 {dimension_numbers = #tpu.dot_dimension_numbers<[1], [0], [0], [1], [0, 0, 1, 1], [], []>} : vector<128x128xbf16>, vector<128x128xbf16>, vector<128x128xf32> -> vector<128x128xf32>
    %180 = arith.index_cast %c0_i32_86 : i32 to index
    %c0_90 = arith.constant 0 : index
    %c0_91 = arith.constant 0 : index
    %181 = vector.load %arg11[%180, %c0_90, %c0_91] : memref<1x1x128xf32, #tpu.memory_space<vmem>>, vector<1x1x128xf32>
    %182 = vector.shape_cast %181 : vector<1x1x128xf32> to vector<1x128xf32>
    %183 = vector.broadcast %182 : vector<1x128xf32> to vector<128x128xf32>
    %184 = arith.addf %179, %183 : vector<128x128xf32>
    %cst_92 = arith.constant 0.000000e+00 : f32
    %185 = vector.broadcast %cst_92 : f32 to vector<128x128xf32>
    %186 = arith.maximumf %184, %185 : vector<128x128xf32>
    %c1_i32_93 = arith.constant 1 : i32
    %c0_94 = arith.constant 0 : index
    %c0_95 = arith.constant 0 : index
    %187 = vector.load %arg12[%c0_94, %c0_95] : memref<128x256xbf16, #tpu.memory_space<vmem>>, vector<128x256xbf16>
    %188 = arith.truncf %186 : vector<128x128xf32> to vector<128x128xbf16>
    %cst_96 = arith.constant dense<0.000000e+00> : vector<128x256xf32>
    %189 = tpu.matmul %188, %187, %cst_96 {dimension_numbers = #tpu.dot_dimension_numbers<[1], [0], [0], [1], [0, 0, 1, 1], [], []>} : vector<128x128xbf16>, vector<128x256xbf16>, vector<128x256xf32> -> vector<128x256xf32>
    %c0_97 = arith.constant 0 : index
    %c0_98 = arith.constant 0 : index
    %190 = vector.load %arg13[%c0_97, %c0_98] : memref<1x256xf32, #tpu.memory_space<vmem>>, vector<1x256xf32>
    %191 = vector.broadcast %190 : vector<1x256xf32> to vector<128x256xf32>
    %192 = arith.addf %189, %191 : vector<128x256xf32>
    %193 = vector.extract_strided_slice %192 {offsets = [0, 0], sizes = [128, 128], strides = [1, 1]} : vector<128x256xf32> to vector<128x128xf32>
    %194 = vector.extract_strided_slice %192 {offsets = [0, 128], sizes = [128, 128], strides = [1, 1]} : vector<128x256xf32> to vector<128x128xf32>
    %c48_i32_99 = arith.constant 48 : i32
    %195 = vector.broadcast %c48_i32_99 : i32 to vector<128x128xi32>
    %196 = arith.cmpi sge, %1, %195 : vector<128x128xi32>
    %c58_i32 = arith.constant 58 : i32
    %197 = vector.broadcast %c58_i32 : i32 to vector<128x128xi32>
    %198 = arith.cmpi slt, %1, %197 : vector<128x128xi32>
    %199 = arith.andi %196, %198 : vector<128x128xi1>
    %cst_100 = arith.constant 0.000000e+00 : f32
    %200 = vector.broadcast %cst_100 : f32 to vector<128x128xf32>
    %201 = arith.select %199, %0, %200 : vector<128x128xi1>, vector<128x128xf32>
    %cst_101 = arith.constant 5.000000e-01 : f32
    %202 = vector.broadcast %cst_101 : f32 to vector<128x128xf32>
    %203 = arith.mulf %202, %194 : vector<128x128xf32>
    %204 = math.exp %203 : vector<128x128xf32>
    %205 = arith.mulf %201, %204 : vector<128x128xf32>
    %206 = arith.addf %193, %205 : vector<128x128xf32>
    %207 = arith.truncf %206 : vector<128x128xf32> to vector<128x128xbf16>
    %208 = tpu.concatenate %207, %166 in 1 : vector<128x128xbf16>, vector<128x128xbf16> -> vector<128x256xbf16>
    %c0_102 = arith.constant 0 : index
    %c0_103 = arith.constant 0 : index
    %209 = vector.load %arg14[%c0_102, %c0_103] : memref<256x128xbf16, #tpu.memory_space<vmem>>, vector<256x128xbf16>
    %cst_104 = arith.constant dense<0.000000e+00> : vector<128x128xf32>
    %210 = tpu.matmul %208, %209, %cst_104 {dimension_numbers = #tpu.dot_dimension_numbers<[1], [0], [0], [1], [0, 0, 1, 1], [], []>} : vector<128x256xbf16>, vector<256x128xbf16>, vector<128x128xf32> -> vector<128x128xf32>
    %c0_105 = arith.constant 0 : index
    %c0_106 = arith.constant 0 : index
    %211 = vector.load %arg15[%c0_105, %c0_106] : memref<1x128xf32, #tpu.memory_space<vmem>>, vector<1x128xf32>
    %212 = vector.broadcast %211 : vector<1x128xf32> to vector<128x128xf32>
    %213 = arith.addf %210, %212 : vector<128x128xf32>
    %cst_107 = arith.constant 0.000000e+00 : f32
    %214 = vector.broadcast %cst_107 : f32 to vector<128x128xf32>
    %215 = arith.maximumf %213, %214 : vector<128x128xf32>
    %c0_i32_108 = arith.constant 0 : i32
    %216 = arith.index_cast %c0_i32_108 : i32 to index
    %c0_109 = arith.constant 0 : index
    %c0_110 = arith.constant 0 : index
    %217 = vector.load %arg16[%216, %c0_109, %c0_110] : memref<1x128x128xbf16, #tpu.memory_space<vmem>>, vector<1x128x128xbf16>
    %218 = vector.shape_cast %217 : vector<1x128x128xbf16> to vector<128x128xbf16>
    %219 = arith.truncf %215 : vector<128x128xf32> to vector<128x128xbf16>
    %cst_111 = arith.constant dense<0.000000e+00> : vector<128x128xf32>
    %220 = tpu.matmul %219, %218, %cst_111 {dimension_numbers = #tpu.dot_dimension_numbers<[1], [0], [0], [1], [0, 0, 1, 1], [], []>} : vector<128x128xbf16>, vector<128x128xbf16>, vector<128x128xf32> -> vector<128x128xf32>
    %221 = arith.index_cast %c0_i32_108 : i32 to index
    %c0_112 = arith.constant 0 : index
    %c0_113 = arith.constant 0 : index
    %222 = vector.load %arg17[%221, %c0_112, %c0_113] : memref<1x1x128xf32, #tpu.memory_space<vmem>>, vector<1x1x128xf32>
    %223 = vector.shape_cast %222 : vector<1x1x128xf32> to vector<1x128xf32>
    %224 = vector.broadcast %223 : vector<1x128xf32> to vector<128x128xf32>
    %225 = arith.addf %220, %224 : vector<128x128xf32>
    %cst_114 = arith.constant 0.000000e+00 : f32
    %226 = vector.broadcast %cst_114 : f32 to vector<128x128xf32>
    %227 = arith.maximumf %225, %226 : vector<128x128xf32>
    %c1_i32_115 = arith.constant 1 : i32
    %c0_116 = arith.constant 0 : index
    %c0_117 = arith.constant 0 : index
    %228 = vector.load %arg18[%c0_116, %c0_117] : memref<128x128xbf16, #tpu.memory_space<vmem>>, vector<128x128xbf16>
    %229 = arith.truncf %227 : vector<128x128xf32> to vector<128x128xbf16>
    %cst_118 = arith.constant dense<0.000000e+00> : vector<128x128xf32>
    %230 = tpu.matmul %229, %228, %cst_118 {dimension_numbers = #tpu.dot_dimension_numbers<[1], [0], [0], [1], [0, 0, 1, 1], [], []>} : vector<128x128xbf16>, vector<128x128xbf16>, vector<128x128xf32> -> vector<128x128xf32>
    %c0_119 = arith.constant 0 : index
    %c0_120 = arith.constant 0 : index
    %231 = vector.load %arg19[%c0_119, %c0_120] : memref<1x128xf32, #tpu.memory_space<vmem>>, vector<1x128xf32>
    %232 = vector.broadcast %231 : vector<1x128xf32> to vector<128x128xf32>
    %233 = arith.addf %230, %232 : vector<128x128xf32>
    %234 = arith.negf %233 : vector<128x128xf32>
    %235 = math.exp %234 : vector<128x128xf32>
    %cst_121 = arith.constant 1.000000e+00 : f32
    %236 = vector.broadcast %cst_121 : f32 to vector<128x128xf32>
    %237 = arith.addf %236, %235 : vector<128x128xf32>
    %238 = arith.divf %236, %237 : vector<128x128xf32>
    %c58_i32_122 = arith.constant 58 : i32
    %239 = vector.broadcast %c58_i32_122 : i32 to vector<128x128xi32>
    %240 = arith.cmpi sge, %1, %239 : vector<128x128xi32>
    %c86_i32 = arith.constant 86 : i32
    %241 = vector.broadcast %c86_i32 : i32 to vector<128x128xi32>
    %242 = arith.cmpi slt, %1, %241 : vector<128x128xi32>
    %243 = arith.andi %240, %242 : vector<128x128xi1>
    %cst_123 = arith.constant 0.000000e+00 : f32
    %244 = vector.broadcast %cst_123 : f32 to vector<128x128xf32>
    %245 = arith.select %243, %238, %244 : vector<128x128xi1>, vector<128x128xf32>
    %246 = arith.truncf %245 : vector<128x128xf32> to vector<128x128xbf16>
    %247 = tpu.concatenate %246, %166 in 1 : vector<128x128xbf16>, vector<128x128xbf16> -> vector<128x256xbf16>
    %c0_124 = arith.constant 0 : index
    %c0_125 = arith.constant 0 : index
    %248 = vector.load %arg20[%c0_124, %c0_125] : memref<256x128xbf16, #tpu.memory_space<vmem>>, vector<256x128xbf16>
    %cst_126 = arith.constant dense<0.000000e+00> : vector<128x128xf32>
    %249 = tpu.matmul %247, %248, %cst_126 {dimension_numbers = #tpu.dot_dimension_numbers<[1], [0], [0], [1], [0, 0, 1, 1], [], []>} : vector<128x256xbf16>, vector<256x128xbf16>, vector<128x128xf32> -> vector<128x128xf32>
    %c0_127 = arith.constant 0 : index
    %c0_128 = arith.constant 0 : index
    %250 = vector.load %arg21[%c0_127, %c0_128] : memref<1x128xf32, #tpu.memory_space<vmem>>, vector<1x128xf32>
    %251 = vector.broadcast %250 : vector<1x128xf32> to vector<128x128xf32>
    %252 = arith.addf %249, %251 : vector<128x128xf32>
    %cst_129 = arith.constant 0.000000e+00 : f32
    %253 = vector.broadcast %cst_129 : f32 to vector<128x128xf32>
    %254 = arith.maximumf %252, %253 : vector<128x128xf32>
    %c0_i32_130 = arith.constant 0 : i32
    %255 = arith.index_cast %c0_i32_130 : i32 to index
    %c0_131 = arith.constant 0 : index
    %c0_132 = arith.constant 0 : index
    %256 = vector.load %arg22[%255, %c0_131, %c0_132] : memref<1x128x128xbf16, #tpu.memory_space<vmem>>, vector<1x128x128xbf16>
    %257 = vector.shape_cast %256 : vector<1x128x128xbf16> to vector<128x128xbf16>
    %258 = arith.truncf %254 : vector<128x128xf32> to vector<128x128xbf16>
    %cst_133 = arith.constant dense<0.000000e+00> : vector<128x128xf32>
    %259 = tpu.matmul %258, %257, %cst_133 {dimension_numbers = #tpu.dot_dimension_numbers<[1], [0], [0], [1], [0, 0, 1, 1], [], []>} : vector<128x128xbf16>, vector<128x128xbf16>, vector<128x128xf32> -> vector<128x128xf32>
    %260 = arith.index_cast %c0_i32_130 : i32 to index
    %c0_134 = arith.constant 0 : index
    %c0_135 = arith.constant 0 : index
    %261 = vector.load %arg23[%260, %c0_134, %c0_135] : memref<1x1x128xf32, #tpu.memory_space<vmem>>, vector<1x1x128xf32>
    %262 = vector.shape_cast %261 : vector<1x1x128xf32> to vector<1x128xf32>
    %263 = vector.broadcast %262 : vector<1x128xf32> to vector<128x128xf32>
    %264 = arith.addf %259, %263 : vector<128x128xf32>
    %cst_136 = arith.constant 0.000000e+00 : f32
    %265 = vector.broadcast %cst_136 : f32 to vector<128x128xf32>
    %266 = arith.maximumf %264, %265 : vector<128x128xf32>
    %c1_i32_137 = arith.constant 1 : i32
    %c0_138 = arith.constant 0 : index
    %c0_139 = arith.constant 0 : index
    %267 = vector.load %arg24[%c0_138, %c0_139] : memref<128x128xbf16, #tpu.memory_space<vmem>>, vector<128x128xbf16>
    %268 = arith.truncf %266 : vector<128x128xf32> to vector<128x128xbf16>
    %cst_140 = arith.constant dense<0.000000e+00> : vector<128x128xf32>
    %269 = tpu.matmul %268, %267, %cst_140 {dimension_numbers = #tpu.dot_dimension_numbers<[1], [0], [0], [1], [0, 0, 1, 1], [], []>} : vector<128x128xbf16>, vector<128x128xbf16>, vector<128x128xf32> -> vector<128x128xf32>
    %c0_141 = arith.constant 0 : index
    %c0_142 = arith.constant 0 : index
    %270 = vector.load %arg25[%c0_141, %c0_142] : memref<1x128xf32, #tpu.memory_space<vmem>>, vector<1x128xf32>
    %271 = vector.broadcast %270 : vector<1x128xf32> to vector<128x128xf32>
    %272 = arith.addf %269, %271 : vector<128x128xf32>
    %273 = arith.addf %141, %272 : vector<128x128xf32>
    %274 = arith.addf %273, %147 : vector<128x128xf32>
    %275 = arith.addf %274, %193 : vector<128x128xf32>
    %276 = arith.addf %275, %245 : vector<128x128xf32>
    %c0_143 = arith.constant 0 : index
    %c0_144 = arith.constant 0 : index
    %277 = vector.load %arg26[%c0_143, %c0_144] : memref<128x256xf32, #tpu.memory_space<vmem>>, vector<128x128xf32>
    tpu.vector_store %arg26[%c0_143, %c0_144], %276 {strides = array<i32>} : memref<128x256xf32, #tpu.memory_space<vmem>>, vector<128x128xf32>,
    %278 = arith.addf %165, %194 : vector<128x128xf32>
    %c0_145 = arith.constant 0 : index
    %c128 = arith.constant 128 : index
    %279 = vector.load %arg26[%c0_145, %c128] : memref<128x256xf32, #tpu.memory_space<vmem>>, vector<128x128xf32>
    tpu.vector_store %arg26[%c0_145, %c128], %278 {strides = array<i32>} : memref<128x256xf32, #tpu.memory_space<vmem>>, vector<128x128xf32>,
    return
  }
  func.func @transform_0(%arg0: i32) -> (i32, i32) {
    %c0_i32 = arith.constant 0 : i32
    %c0_i32_0 = arith.constant 0 : i32
    return %arg0, %c0_i32 : i32, i32
  }
  func.func @transform_1(%arg0: i32) -> (i32, i32) {
    %c0_i32 = arith.constant 0 : i32
    %c0_i32_0 = arith.constant 0 : i32
    %c0_i32_1 = arith.constant 0 : i32
    return %c0_i32, %c0_i32_0 : i32, i32
  }
  func.func @transform_2(%arg0: i32) -> (i32, i32) {
    %c0_i32 = arith.constant 0 : i32
    %c0_i32_0 = arith.constant 0 : i32
    %c0_i32_1 = arith.constant 0 : i32
    return %c0_i32, %c0_i32_0 : i32, i32
  }
  func.func @transform_3(%arg0: i32) -> (i32, i32, i32) {
    %c0_i32 = arith.constant 0 : i32
    %c0_i32_0 = arith.constant 0 : i32
    %c0_i32_1 = arith.constant 0 : i32
    %c0_i32_2 = arith.constant 0 : i32
    return %c0_i32, %c0_i32_0, %c0_i32_1 : i32, i32, i32
  }
  func.func @transform_4(%arg0: i32) -> (i32, i32, i32) {
    %c0_i32 = arith.constant 0 : i32
    %c0_i32_0 = arith.constant 0 : i32
    %c0_i32_1 = arith.constant 0 : i32
    %c0_i32_2 = arith.constant 0 : i32
    return %c0_i32, %c0_i32_0, %c0_i32_1 : i32, i32, i32
  }
  func.func @transform_5(%arg0: i32) -> (i32, i32) {
    %c0_i32 = arith.constant 0 : i32
    %c0_i32_0 = arith.constant 0 : i32
    %c0_i32_1 = arith.constant 0 : i32
    return %c0_i32, %c0_i32_0 : i32, i32
  }
  func.func @transform_6(%arg0: i32) -> (i32, i32) {
    %c0_i32 = arith.constant 0 : i32
    %c0_i32_0 = arith.constant 0 : i32
    %c0_i32_1 = arith.constant 0 : i32
    return %c0_i32, %c0_i32_0 : i32, i32
  }
  func.func @transform_7(%arg0: i32) -> (i32, i32) {
    %c0_i32 = arith.constant 0 : i32
    %c0_i32_0 = arith.constant 0 : i32
    %c0_i32_1 = arith.constant 0 : i32
    return %c0_i32, %c0_i32_0 : i32, i32
  }
  func.func @transform_8(%arg0: i32) -> (i32, i32) {
    %c0_i32 = arith.constant 0 : i32
    %c0_i32_0 = arith.constant 0 : i32
    %c0_i32_1 = arith.constant 0 : i32
    return %c0_i32, %c0_i32_0 : i32, i32
  }
  func.func @transform_9(%arg0: i32) -> (i32, i32, i32) {
    %c0_i32 = arith.constant 0 : i32
    %c0_i32_0 = arith.constant 0 : i32
    %c0_i32_1 = arith.constant 0 : i32
    %c0_i32_2 = arith.constant 0 : i32
    return %c0_i32, %c0_i32_0, %c0_i32_1 : i32, i32, i32
  }
  func.func @transform_10(%arg0: i32) -> (i32, i32, i32) {
    %c0_i32 = arith.constant 0 : i32
    %c0_i32_0 = arith.constant 0 : i32
    %c0_i32_1 = arith.constant 0 : i32
    %c0_i32_2 = arith.constant 0 : i32
    return %c0_i32, %c0_i32_0, %c0_i32_1 : i32, i32, i32
  }
  func.func @transform_11(%arg0: i32) -> (i32, i32) {
    %c0_i32 = arith.constant 0 : i32
    %c0_i32_0 = arith.constant 0 : i32
    %c0_i32_1 = arith.constant 0 : i32
    return %c0_i32, %c0_i32_0 : i32, i32
  }
  func.func @transform_12(%arg0: i32) -> (i32, i32) {
    %c0_i32 = arith.constant 0 : i32
    %c0_i32_0 = arith.constant 0 : i32
    %c0_i32_1 = arith.constant 0 : i32
    return %c0_i32, %c0_i32_0 : i32, i32
  }
  func.func @transform_13(%arg0: i32) -> (i32, i32) {
    %c0_i32 = arith.constant 0 : i32
    %c0_i32_0 = arith.constant 0 : i32
    %c0_i32_1 = arith.constant 0 : i32
    return %c0_i32, %c0_i32_0 : i32, i32
  }
  func.func @transform_14(%arg0: i32) -> (i32, i32) {
    %c0_i32 = arith.constant 0 : i32
    %c0_i32_0 = arith.constant 0 : i32
    %c0_i32_1 = arith.constant 0 : i32
    return %c0_i32, %c0_i32_0 : i32, i32
  }
  func.func @transform_15(%arg0: i32) -> (i32, i32, i32) {
    %c0_i32 = arith.constant 0 : i32
    %c0_i32_0 = arith.constant 0 : i32
    %c0_i32_1 = arith.constant 0 : i32
    %c0_i32_2 = arith.constant 0 : i32
    return %c0_i32, %c0_i32_0, %c0_i32_1 : i32, i32, i32
  }
  func.func @transform_16(%arg0: i32) -> (i32, i32, i32) {
    %c0_i32 = arith.constant 0 : i32
    %c0_i32_0 = arith.constant 0 : i32
    %c0_i32_1 = arith.constant 0 : i32
    %c0_i32_2 = arith.constant 0 : i32
    return %c0_i32, %c0_i32_0, %c0_i32_1 : i32, i32, i32
  }
  func.func @transform_17(%arg0: i32) -> (i32, i32) {
    %c0_i32 = arith.constant 0 : i32
    %c0_i32_0 = arith.constant 0 : i32
    %c0_i32_1 = arith.constant 0 : i32
    return %c0_i32, %c0_i32_0 : i32, i32
  }
  func.func @transform_18(%arg0: i32) -> (i32, i32) {
    %c0_i32 = arith.constant 0 : i32
    %c0_i32_0 = arith.constant 0 : i32
    %c0_i32_1 = arith.constant 0 : i32
    return %c0_i32, %c0_i32_0 : i32, i32
  }
  func.func @transform_19(%arg0: i32) -> (i32, i32) {
    %c0_i32 = arith.constant 0 : i32
    %c0_i32_0 = arith.constant 0 : i32
    %c0_i32_1 = arith.constant 0 : i32
    return %c0_i32, %c0_i32_0 : i32, i32
  }
  func.func @transform_20(%arg0: i32) -> (i32, i32) {
    %c0_i32 = arith.constant 0 : i32
    %c0_i32_0 = arith.constant 0 : i32
    %c0_i32_1 = arith.constant 0 : i32
    return %c0_i32, %c0_i32_0 : i32, i32
  }
  func.func @transform_21(%arg0: i32) -> (i32, i32, i32) {
    %c0_i32 = arith.constant 0 : i32
    %c0_i32_0 = arith.constant 0 : i32
    %c0_i32_1 = arith.constant 0 : i32
    %c0_i32_2 = arith.constant 0 : i32
    return %c0_i32, %c0_i32_0, %c0_i32_1 : i32, i32, i32
  }
  func.func @transform_22(%arg0: i32) -> (i32, i32, i32) {
    %c0_i32 = arith.constant 0 : i32
    %c0_i32_0 = arith.constant 0 : i32
    %c0_i32_1 = arith.constant 0 : i32
    %c0_i32_2 = arith.constant 0 : i32
    return %c0_i32, %c0_i32_0, %c0_i32_1 : i32, i32, i32
  }
  func.func @transform_23(%arg0: i32) -> (i32, i32) {
    %c0_i32 = arith.constant 0 : i32
    %c0_i32_0 = arith.constant 0 : i32
    %c0_i32_1 = arith.constant 0 : i32
    return %c0_i32, %c0_i32_0 : i32, i32
  }
  func.func @transform_24(%arg0: i32) -> (i32, i32) {
    %c0_i32 = arith.constant 0 : i32
    %c0_i32_0 = arith.constant 0 : i32
    %c0_i32_1 = arith.constant 0 : i32
    return %c0_i32, %c0_i32_0 : i32, i32
  }
  func.func @transform_25(%arg0: i32) -> (i32, i32) {
    %c0_i32 = arith.constant 0 : i32
    %c0_i32_0 = arith.constant 0 : i32
    return %arg0, %c0_i32 : i32, i32
  }
}

</mosaic_0001>

<bundles_post_ra>
// kernel: tpu_custom_call.1
= control target key start
LH: loop header
LB: loop body
LE: loop exit
PB: predicated region body
PF: predicated region fallthrough
CT: control target
= control target key end

     0   :  { %s10745_s0 = inlined_call_operand.hbm [shape: f32[256,128], index: 0, kind: input, shape index: {}]   ;;  %s10746_s1 = inlined_call_operand.hbm [shape: bf16[128,128], index: 1, kind: input, shape index: {}]   ;;  %s10747_s2 = inlined_call_operand.hbm [shape: f32[1,128], index: 2, kind: input, shape index: {}]   ;;  %s10748_s3 = inlined_call_operand.hbm [shape: bf16[11,128,128], index: 3, kind: input, shape index: {}]   ;;  %s10749_s4 = inlined_call_operand.hbm [shape: f32[11,1,128], index: 4, kind: input, shape index: {}]   ;;  %s10750_s5 = inlined_call_operand.hbm [shape: bf16[128,128], index: 5, kind: input, shape index: {}]   ;;  %s10751_s6 = inlined_call_operand.hbm [shape: f32[1,128], index: 6, kind: input, shape index: {}]   ;;  %s10752_s7 = inlined_call_operand.hbm [shape: bf16[256,128], index: 7, kind: input, shape index: {}]   ;;  %s10753_s8 = inlined_call_operand.hbm [shape: f32[1,128], index: 8, kind: input, shape index: {}]   ;;  %s10754_s9 = inlined_call_operand.hbm [shape: bf16[1,128,128], index: 9, kind: input, shape index: {}]   ;;  %s10755_s10 = inlined_call_operand.hbm [shape: f32[1,1,128], index: 10, kind: input, shape index: {}]   ;;  %s10756_s11 = inlined_call_operand.hbm [shape: bf16[128,256], index: 11, kind: input, shape index: {}]   ;;  %s10757_s12 = inlined_call_operand.hbm [shape: f32[1,256], index: 12, kind: input, shape index: {}]   ;;  %s10758_s13 = inlined_call_operand.hbm [shape: bf16[256,128], index: 13, kind: input, shape index: {}]   ;;  %s10759_s14 = inlined_call_operand.hbm [shape: f32[1,128], index: 14, kind: input, shape index: {}]   ;;  %s10760_s15 = inlined_call_operand.hbm [shape: bf16[1,128,128], index: 15, kind: input, shape index: {}]   ;;  %s10761_s16 = inlined_call_operand.hbm [shape: f32[1,1,128], index: 16, kind: input, shape index: {}]   ;;  %s10762_s17 = inlined_call_operand.vmem [shape: bf16[128,128], index: 17, kind: input, shape index: {}]   ;;  %s10763_s18 = inlined_call_operand.vmem [shape: f32[1,128], index: 18, kind: input, shape index: {}]   ;;  %s10764_s19 = inlined_call_operand.hbm [shape: bf16[256,128], index: 19, kind: input, shape index: {}]   ;;  %s10765_s20 = inlined_call_operand.vmem [shape: f32[1,128], index: 20, kind: input, shape index: {}]   ;;  %s10766_s21 = inlined_call_operand.hbm [shape: bf16[1,128,128], index: 21, kind: input, shape index: {}]   ;;  %s10767_s22 = inlined_call_operand.vmem [shape: f32[1,1,128], index: 22, kind: input, shape index: {}]   ;;  %s10768_s23 = inlined_call_operand.hbm [shape: bf16[128,128], index: 23, kind: input, shape index: {}]   ;;  %s10769_s24 = inlined_call_operand.vmem [shape: f32[1,128], index: 24, kind: input, shape index: {}]   ;;  %s10770_s25 = inlined_call_operand.hbm [shape: f32[256,256], index: 25, kind: output, shape index: {}]  }
   0x1   :  { %10843 = sst [smem:[#allocation75_spill]] %s10745_s0 }
   0x2   :  { %10844 = sst [smem:[#allocation76_spill]] %s10746_s1 }
   0x3   :  { %10845 = sst [smem:[#allocation77_spill]] %s10747_s2 }
   0x4   :  { %10846 = sst [smem:[#allocation78_spill]] %s10748_s3 }
   0x5   :  { %10847 = sst [smem:[#allocation79_spill]] %s10749_s4 }
   0x6   :  { %10848 = sst [smem:[#allocation80_spill]] %s10750_s5 }
   0x7   :  { %10849 = sst [smem:[#allocation81_spill]] %s10751_s6 }
   0x8   :  { %10850 = sst [smem:[#allocation82_spill]] %s10752_s7 }
   0x9   :  { %10851 = sst [smem:[#allocation83_spill]] %s10753_s8 }
   0xa   :  { %10852 = sst [smem:[#allocation84_spill]] %s10754_s9 }
   0xb   :  { %10853 = sst [smem:[#allocation85_spill]] %s10756_s11 }
   0xc   :  { %10854 = sst [smem:[#allocation86_spill]] %s10758_s13 }
   0xd   :  { %10855 = sst [smem:[#allocation87_spill]] %s10760_s15 }
   0xe   :  { %10856 = sst [smem:[#allocation88_spill]] %s10762_s17 }
   0xf   :  { %10857 = sst [smem:[#allocation89_spill]] %s10763_s18 }
  0x10   :  { %10858 = sst [smem:[#allocation90_spill]] %s10764_s19 }
  0x11   :  { %10859 = sst [smem:[#allocation91_spill]] %s10765_s20 }
  0x12   :  { %10860 = sst [smem:[#allocation92_spill]] %s10767_s22 }
  0x13   :  { %10861 = sst [smem:[#allocation93_spill]] %s10769_s24 }
  0x14   :  { %10862 = sst [smem:[#allocation94_spill]] %s10770_s25 }
  0x15   :  { %30 = vsyncpa [#allocation3], 0 }
  0x16   :  { %32 = vsyncpa [#allocation3 + $0x1], 0 }
  0x17   :  { %33 = vsyncpa [#allocation6], 0 }
  0x18   :  { %34 = vsyncpa [#allocation9], 0 }
  0x19   :  { %35 = vsyncpa [#allocation12], 0 }
  0x1a   :  { %36 = vsyncpa [#allocation15], 0 }
  0x1b   :  { %37 = vsyncpa [#allocation18], 0 }
  0x1c   :  { %38 = vsyncpa [#allocation21], 0 }
  0x1d   :  { %39 = vsyncpa [#allocation24], 0 }
  0x1e   :  { %40 = vsyncpa [#allocation27], 0 }
  0x1f   :  { %41 = vsyncpa [#allocation30], 0 }
  0x20   :  { %42 = vsyncpa [#allocation33], 0 }
  0x21   :  { %43 = vsyncpa [#allocation4], 0 }
  0x22   :  { %45 = vsyncpa [#allocation4 + $0x1], 0  ;;  %s9130_s29 = smov 0   ;;  %s9132_s2 = smov 0  }
  0x23   :  { %s9134_s6 = smov 0   ;;  %s9136_s30 = smov 0  }
  0x24 LB: > { %10863 = sst [smem:[#allocation47_spill]] %s8956_s29  ;;  %s8970_s7 = smov [#allocation5]   ;;  %s8968_s30 = sphi %s9136_s30, %s11007_s30   ;;  %s8964_s6 = sphi %s9134_s6, %s11006_s6   ;;  %s8960_s2 = sphi %s9132_s2, %s11005_s2   ;;  %s8956_s29 = sphi %s9130_s29, %s11004_s29  }
  0x25   : > { %10864 = sst [smem:[#allocation48_spill]] %s8960_s2  ;;  %s624_s3 = sshll.u32 %s8970_s7, 4  ;;  %s9156_s3 = int_to_ptr.vmem [resolvable:$true] %s624_s3 }
  0x26   : > { %s9151_s26 = sadd.s32 4294967295, %s8968_s30   ;;  %p6266_p0 = scmp.ge.s32.totalorder %s8968_s30, 1 }
  0x27   : > { %10865 = sst [smem:[#allocation49_spill]] %s9151_s26  ;;  %p10790_p1 = scmp.eq.s32.totalorder %s9151_s26, 0 }
  0x28   : > { %p612_p2 = scmp.lt.s32.totalorder %s8968_s30, 3  ;;  %s8971_s8 = smov [#allocation8]  }
  0x29   : > { %s648_s27 = sshll.u32 %s8971_s8, 4  ;;  %s8972_s28 = smov [#allocation11]   ;;  %s9171_s27 = int_to_ptr.vmem [resolvable:$true] %s648_s27 }
  0x2a   : > { %p9158_p3 = pnand %p6266_p0, %p612_p2  ;;  %s674_s9 = sshll.u32 %s8972_s28, 4  ;;  %s9173_s9 = int_to_ptr.vmem [resolvable:$true] %s674_s9 }
  0x2b   : > { %s10869_s7 = sld [smem:[#allocation76_spill]] }
  0x2c   : > { %s10866_s1 = scalar_select %p9158_p3, 1, 0 }
  0x2d   : > { %p7726_p5 = pneg %p9158_p3 }
  0x2e   : > { %10867 = sst [smem:[#allocation50_spill]] %s10866_s1 }
  0x2f   : > { %p9167_p6 = pnand %p7726_p5, %p10790_p1 }
  0x31   : > { %s8300_s25 = scalar_lea.hbm %s10869_s7, 1024  ;;  %p9183_p8 = pneg %p9167_p6 }
  0x32   : > { %p8301_p7 = scmp.ne.s32.totalorder %s10869_s7, %s8300_s25  ;;  %p8307_p11 = scmp.lt.u32.totalorder %s8300_s25, %s10869_s7 }
  0x34   : > { %p8303_p9 = pnand %p9183_p8, %p8301_p7 }
  0x36   : > { %p8304_p10 = pneg %p8303_p9 }
  0x38   : > { %p8309_p12 = pnand %p8307_p11, %p8304_p10 }
  0x3a   : > { %8312 = shalt.err (!%p8309_p12)
}
  0x3b   : > { %s8313_s22 = scalar_lea.vmem %s9156_s3, 1024  ;;  %p8321_p5 = scmp.lt.s32.totalorder %s9156_s3, %s9156_s3 }
  0x3c   : > { %p8314_p13 = scmp.ne.s32.totalorder %s9156_s3, %s8313_s22  ;;  %p8322_p4 = scmp.lt.s32.totalorder %s8313_s22, %s8313_s22 }
  0x3e   : > { %p8316_p0 = pnand %p8314_p13, %p9183_p8  ;;  %p8323_p7 = por %p8322_p4, %p8321_p5 }
  0x40   : > { %p8317_p2 = pneg %p8316_p0 }
  0x42   : > { %p8324_p9 = pnand %p8323_p7, %p8317_p2 }
  0x44   : > { %8327 = shalt.err (!%p8324_p9)
}
  0x45   : > { %s10792_s24 = smov 64   ;;  %s10794_s20 = smov 4  }
  0x46   : > { %7729 = dma.hbm_to_vmem [thread:$0]  (!%p9167_p6), %s10869_s7, 1024, %s9156_s3, [#allocation6], %s10792_s24, %s10792_s24, %s10794_s20  }
  0x47   : > { %s10871_s18 = sld [smem:[#allocation78_spill]] }
  0x4d   : > { %s8328_s22 = scalar_lea.hbm %s10871_s18, 11264 }
  0x4e   : > { %p8329_p4 = scmp.ne.s32.totalorder %s10871_s18, %s8328_s22  ;;  %p8335_p12 = scmp.lt.u32.totalorder %s8328_s22, %s10871_s18 }
  0x50   : > { %p8331_p10 = pnand %p8329_p4, %p9183_p8 }
  0x52   : > { %p8332_p11 = pneg %p8331_p10 }
  0x54   : > { %p8337_p13 = pnand %p8335_p12, %p8332_p11 }
  0x56   : > { %8340 = shalt.err (!%p8337_p13)
}
  0x57   : > { %s8341_s3 = scalar_lea.vmem %s9171_s27, 11264  ;;  %p8349_p7 = scmp.lt.s32.totalorder %s9171_s27, %s9171_s27 }
  0x58   : > { %p8342_p0 = scmp.ne.s32.totalorder %s9171_s27, %s8341_s3  ;;  %p8350_p9 = scmp.lt.s32.totalorder %s8341_s3, %s8341_s3 }
  0x5a   : > { %p8344_p2 = pnand %p8342_p0, %p9183_p8  ;;  %p8351_p4 = por %p8350_p9, %p8349_p7 }
  0x5c   : > { %p8345_p5 = pneg %p8344_p2 }
  0x5e   : > { %p8352_p10 = pnand %p8351_p4, %p8345_p5 }
  0x60   : > { %8355 = shalt.err (!%p8352_p10)
}
  0x61   : > { %7735 = dma.hbm_to_vmem [thread:$0]  (!%p9167_p6), %s10871_s18, 11264, %s9171_s27, [#allocation9], %s10792_s24, %s10792_s24, %s10794_s20  }
  0x62   : > { %s10872_s25 = sld [smem:[#allocation80_spill]] }
  0x68   : > { %s8356_s5 = scalar_lea.hbm %s10872_s25, 1024 }
  0x69   : > { %p8357_p11 = scmp.ne.s32.totalorder %s10872_s25, %s8356_s5  ;;  %p8363_p0 = scmp.lt.u32.totalorder %s8356_s5, %s10872_s25 }
  0x6b   : > { %p8359_p12 = pnand %p8357_p11, %p9183_p8 }
  0x6d   : > { %p8360_p13 = pneg %p8359_p12 }
  0x6f   : > { %p8365_p2 = pnand %p8363_p0, %p8360_p13 }
  0x71   : > { %8368 = shalt.err (!%p8365_p2)
}
  0x72   : > { %s8369_s27 = scalar_lea.vmem %s9173_s9, 1024  ;;  %p8377_p4 = scmp.lt.s32.totalorder %s9173_s9, %s9173_s9 }
  0x73   : > { %p8370_p5 = scmp.ne.s32.totalorder %s9173_s9, %s8369_s27  ;;  %p8378_p10 = scmp.lt.s32.totalorder %s8369_s27, %s8369_s27 }
  0x75   : > { %p8372_p7 = pnand %p8370_p5, %p9183_p8  ;;  %p8379_p11 = por %p8378_p10, %p8377_p4 }
  0x77   : > { %p8373_p9 = pneg %p8372_p7 }
  0x79   : > { %p8380_p12 = pnand %p8379_p11, %p8373_p9 }
  0x7b   : > { %8383 = shalt.err (!%p8380_p12)
}
  0x7c   : > { %7741 = dma.hbm_to_vmem [thread:$0]  (!%p9167_p6), %s10872_s25, 1024, %s9173_s9, [#allocation12], %s10792_s24, %s10792_s24, %s10794_s20  }
  0x7d   : > { %s8975_s26 = smov [#allocation14]   ;;  %s8976_s5 = smov [#allocation17]  }
  0x7e   : > { %s698_s1 = sshll.u32 %s8975_s26, 4  ;;  %s722_s0 = sshll.u32 %s8976_s5, 4  ;;  %s699_s1 = int_to_ptr.vmem [resolvable:$true] %s698_s1  ;;  %s723_s0 = int_to_ptr.vmem [resolvable:$true] %s722_s0 }
  0x7f   : > { %s10873_s3 = sld [smem:[#allocation82_spill]] }
  0x85   : > { %s8384_s27 = scalar_lea.hbm %s10873_s3, 2048 }
  0x86   : > { %p8385_p13 = scmp.ne.s32.totalorder %s10873_s3, %s8384_s27  ;;  %p8391_p5 = scmp.lt.u32.totalorder %s8384_s27, %s10873_s3 }
  0x88   : > { %p8387_p0 = pnand %p8385_p13, %p9183_p8 }
  0x8a   : > { %p8388_p2 = pneg %p8387_p0 }
  0x8c   : > { %p8393_p7 = pnand %p8391_p5, %p8388_p2 }
  0x8e   : > { %8396 = shalt.err (!%p8393_p7)
}
  0x8f   : > { %s8397_s9 = scalar_lea.vmem %s699_s1, 2048  ;;  %p8405_p11 = scmp.lt.s32.totalorder %s699_s1, %s699_s1 }
  0x90   : > { %p8398_p9 = scmp.ne.s32.totalorder %s699_s1, %s8397_s9  ;;  %p8406_p12 = scmp.lt.s32.totalorder %s8397_s9, %s8397_s9 }
  0x92   : > { %p8400_p4 = pnand %p8398_p9, %p9183_p8  ;;  %p8407_p1 = por %p8406_p12, %p8405_p11 }
  0x94   : > { %p8401_p10 = pneg %p8400_p4 }
  0x96   : > { %p8408_p3 = pnand %p8407_p1, %p8401_p10 }
  0x98   : > { %8411 = shalt.err (!%p8408_p3)
}
  0x99   : > { %7747 = dma.hbm_to_vmem [thread:$0]  (!%p9167_p6), %s10873_s3, 2048, %s699_s1, [#allocation15], %s10792_s24, %s10792_s24, %s10794_s20  }
  0x9a   : > { %s10874_s26 = sld [smem:[#allocation84_spill]] }
  0xa0   : > { %s8412_s5 = scalar_lea.hbm %s10874_s26, 1024 }
  0xa1   : > { %p8413_p1 = scmp.ne.s32.totalorder %s10874_s26, %s8412_s5  ;;  %p8419_p0 = scmp.lt.u32.totalorder %s8412_s5, %s10874_s26 }
  0xa3   : > { %p8415_p3 = pnand %p8413_p1, %p9183_p8 }
  0xa5   : > { %p8416_p13 = pneg %p8415_p3 }
  0xa7   : > { %p8421_p2 = pnand %p8419_p0, %p8416_p13 }
  0xa9   : > { %8424 = shalt.err (!%p8421_p2)
}
  0xaa   : > { %s8425_s9 = scalar_lea.vmem %s723_s0, 1024  ;;  %p8433_p4 = scmp.lt.s32.totalorder %s723_s0, %s723_s0 }
  0xab   : > { %p8426_p5 = scmp.ne.s32.totalorder %s723_s0, %s8425_s9  ;;  %p8434_p10 = scmp.lt.s32.totalorder %s8425_s9, %s8425_s9 }
  0xad   : > { %p8428_p7 = pnand %p8426_p5, %p9183_p8  ;;  %p8435_p11 = por %p8434_p10, %p8433_p4 }
  0xaf   : > { %p8429_p9 = pneg %p8428_p7 }
  0xb1   : > { %p8436_p12 = pnand %p8435_p11, %p8429_p9 }
  0xb3   : > { %8439 = shalt.err (!%p8436_p12)
}
  0xb4   : > { %7753 = dma.hbm_to_vmem [thread:$0]  (!%p9167_p6), %s10874_s26, 1024, %s723_s0, [#allocation18], %s10792_s24, %s10792_s24, %s10794_s20  }
  0xb5   : > { %s8977_s2 = smov [#allocation20]   ;;  %s10875_s11 = sld [smem:[#allocation85_spill]] }
  0xb6   : > { %s746_s7 = sshll.u32 %s8977_s2, 4  ;;  %s747_s7 = int_to_ptr.vmem [resolvable:$true] %s746_s7 }
  0xbb   : > { %s8440_s28 = scalar_lea.hbm %s10875_s11, 2048 }
  0xbc   : > { %p8441_p1 = scmp.ne.s32.totalorder %s10875_s11, %s8440_s28  ;;  %p8447_p0 = scmp.lt.u32.totalorder %s8440_s28, %s10875_s11 }
  0xbe   : > { %p8443_p3 = pnand %p8441_p1, %p9183_p8 }
  0xc0   : > { %p8444_p13 = pneg %p8443_p3 }
  0xc2   : > { %p8449_p2 = pnand %p8447_p0, %p8444_p13 }
  0xc4   : > { %8452 = shalt.err (!%p8449_p2)
}
  0xc5   : > { %s8453_s0 = scalar_lea.vmem %s747_s7, 2048  ;;  %p8461_p4 = scmp.lt.s32.totalorder %s747_s7, %s747_s7 }
  0xc6   : > { %p8454_p5 = scmp.ne.s32.totalorder %s747_s7, %s8453_s0  ;;  %p8462_p10 = scmp.lt.s32.totalorder %s8453_s0, %s8453_s0 }
  0xc8   : > { %p8456_p7 = pnand %p8454_p5, %p9183_p8  ;;  %p8463_p11 = por %p8462_p10, %p8461_p4 }
  0xca   : > { %p8457_p9 = pneg %p8456_p7 }
  0xcc   : > { %p8464_p12 = pnand %p8463_p11, %p8457_p9 }
  0xce   : > { %8467 = shalt.err (!%p8464_p12)
}
  0xcf   : > { %s10796_s1 = smov 128   ;;  %s10797_s18 = smov 8  }
  0xd0   : > { %7759 = dma.hbm_to_vmem [thread:$0]  (!%p9167_p6), %s10875_s11, 2048, %s747_s7, [#allocation21], %s10796_s1, %s10796_s1, %s10797_s18  }
  0xd1   : > { %s8980_s5 = smov [#allocation23]   ;;  %s8981_s22 = smov [#allocation26]  }
  0xd2   : > { %s770_s28 = sshll.u32 %s8980_s5, 4  ;;  %s794_s27 = sshll.u32 %s8981_s22, 4  ;;  %s771_s28 = int_to_ptr.vmem [resolvable:$true] %s770_s28  ;;  %s9322_s27 = int_to_ptr.vmem [resolvable:$true] %s794_s27 }
  0xd3   : > { %s10876_s13 = sld [smem:[#allocation86_spill]] }
  0xd9   : > { %s8468_s0 = scalar_lea.hbm %s10876_s13, 2048 }
  0xda   : > { %p8469_p1 = scmp.ne.s32.totalorder %s10876_s13, %s8468_s0  ;;  %p8475_p0 = scmp.lt.u32.totalorder %s8468_s0, %s10876_s13 }
  0xdc   : > { %p8471_p3 = pnand %p8469_p1, %p9183_p8 }
  0xde   : > { %p8472_p13 = pneg %p8471_p3 }
  0xe0   : > { %p8477_p2 = pnand %p8475_p0, %p8472_p13 }
  0xe2   : > { %8480 = shalt.err (!%p8477_p2)
}
  0xe3   : > { %s8481_s29 = scalar_lea.vmem %s771_s28, 2048  ;;  %p8489_p4 = scmp.lt.s32.totalorder %s771_s28, %s771_s28 }
  0xe4   : > { %p8482_p5 = scmp.ne.s32.totalorder %s771_s28, %s8481_s29  ;;  %p8490_p10 = scmp.lt.s32.totalorder %s8481_s29, %s8481_s29 }
  0xe6   : > { %p8484_p7 = pnand %p8482_p5, %p9183_p8  ;;  %p8491_p11 = por %p8490_p10, %p8489_p4 }
  0xe8   : > { %p8485_p9 = pneg %p8484_p7 }
  0xea   : > { %p8492_p12 = pnand %p8491_p11, %p8485_p9 }
  0xec   : > { %8495 = shalt.err (!%p8492_p12)
}
  0xed   : > { %s10877_s24 = smov 4   ;;  %s10878_s20 = smov 64  }
  0xee   : > { %7765 = dma.hbm_to_vmem [thread:$0]  (!%p9167_p6), %s10876_s13, 2048, %s771_s28, [#allocation24], %s10878_s20, %s10878_s20, %s10877_s24  }
  0xef   : > { %s10879_s15 = sld [smem:[#allocation87_spill]] }
  0xf5   : > { %s8496_s0 = scalar_lea.hbm %s10879_s15, 1024 }
  0xf6   : > { %p8497_p1 = scmp.ne.s32.totalorder %s10879_s15, %s8496_s0  ;;  %p8503_p0 = scmp.lt.u32.totalorder %s8496_s0, %s10879_s15 }
  0xf8   : > { %p8499_p3 = pnand %p8497_p1, %p9183_p8 }
  0xfa   : > { %p8500_p13 = pneg %p8499_p3 }
  0xfc   : > { %p8505_p2 = pnand %p8503_p0, %p8500_p13 }
  0xfe   : > { %8508 = shalt.err (!%p8505_p2)
}
  0xff   : > { %s8509_s28 = scalar_lea.vmem %s9322_s27, 1024  ;;  %p8517_p4 = scmp.lt.s32.totalorder %s9322_s27, %s9322_s27 }
 0x100   : > { %p8510_p5 = scmp.ne.s32.totalorder %s9322_s27, %s8509_s28  ;;  %p8518_p10 = scmp.lt.s32.totalorder %s8509_s28, %s8509_s28 }
 0x102   : > { %p8512_p7 = pnand %p8510_p5, %p9183_p8  ;;  %p8519_p11 = por %p8518_p10, %p8517_p4 }
 0x104   : > { %p8513_p9 = pneg %p8512_p7 }
 0x106   : > { %p8520_p12 = pnand %p8519_p11, %p8513_p9 }
 0x108   : > { %8523 = shalt.err (!%p8520_p12)
}
 0x109   : > { %7771 = dma.hbm_to_vmem [thread:$0]  (!%p9167_p6), %s10879_s15, 1024, %s9322_s27, [#allocation27], %s10878_s20, %s10878_s20, %s10877_s24  }
 0x10a   : > { %s8982_s22 = smov [#allocation29]   ;;  %s8983_s9 = smov [#allocation7]  }
 0x10b   : > { %s824_s17 = sshll.u32 %s8982_s22, 4  ;;  %s638_s0 = sshll.u32 %s8983_s9, 4  ;;  %s825_s17 = int_to_ptr.vmem [resolvable:$true] %s824_s17  ;;  %s9371_s0 = int_to_ptr.vmem [resolvable:$true] %s638_s0 }
 0x10c   : > { %s10880_s19 = sld [smem:[#allocation90_spill]] }
 0x112   : > { %s8524_s29 = scalar_lea.hbm %s10880_s19, 2048 }
 0x113   : > { %p8525_p1 = scmp.ne.s32.totalorder %s10880_s19, %s8524_s29  ;;  %p8531_p0 = scmp.lt.u32.totalorder %s8524_s29, %s10880_s19 }
 0x115   : > { %p8527_p3 = pnand %p8525_p1, %p9183_p8 }
 0x117   : > { %p8528_p13 = pneg %p8527_p3 }
 0x119   : > { %p8533_p2 = pnand %p8531_p0, %p8528_p13 }
 0x11b   : > { %8536 = shalt.err (!%p8533_p2)
}
 0x11c   : > { %s8537_s5 = scalar_lea.vmem %s825_s17, 2048  ;;  %p8545_p4 = scmp.lt.s32.totalorder %s825_s17, %s825_s17 }
 0x11d   : > { %p8538_p5 = scmp.ne.s32.totalorder %s825_s17, %s8537_s5  ;;  %p8546_p10 = scmp.lt.s32.totalorder %s8537_s5, %s8537_s5 }
 0x11f   : > { %p8540_p7 = pnand %p8538_p5, %p9183_p8  ;;  %p8547_p11 = por %p8546_p10, %p8545_p4 }
 0x121   : > { %p8541_p9 = pneg %p8540_p7 }
 0x123   : > { %p8548_p12 = pnand %p8547_p11, %p8541_p9 }
 0x125   : > { %8551 = shalt.err (!%p8548_p12)
}
 0x126   : > { %7777 = dma.hbm_to_vmem [thread:$0]  (!%p9167_p6), %s10880_s19, 2048, %s825_s17, [#allocation30], %s10878_s20, %s10878_s20, %s10877_s24  }
 0x127   : > { %s10881_s7 = sld [smem:[#allocation77_spill]] }
 0x12d   : > { %s8552_s29 = scalar_lea.hbm %s10881_s7, 16 }
 0x12e   : > { %p8553_p1 = scmp.ne.s32.totalorder %s10881_s7, %s8552_s29  ;;  %p8559_p0 = scmp.lt.u32.totalorder %s8552_s29, %s10881_s7 }
 0x130   : > { %p8555_p3 = pnand %p8553_p1, %p9183_p8 }
 0x132   : > { %p8556_p13 = pneg %p8555_p3 }
 0x134   : > { %p8561_p2 = pnand %p8559_p0, %p8556_p13 }
 0x136   : > { %8564 = shalt.err (!%p8561_p2)
}
 0x137   : > { %s8565_s17 = scalar_lea.vmem %s9371_s0, 16  ;;  %s8572_s18 = scalar_lea.vmem %s9371_s0, 32 }
 0x138   : > { %p8566_p5 = scmp.ne.s32.totalorder %s9371_s0, %s8565_s17  ;;  %p8573_p4 = scmp.lt.s32.totalorder %s9371_s0, %s9371_s0 }
 0x139   : > { %p8574_p10 = scmp.lt.s32.totalorder %s8572_s18, %s8565_s17 }
 0x13a   : > { %p8568_p7 = pnand %p8566_p5, %p9183_p8 }
 0x13b   : > { %p8575_p11 = por %p8574_p10, %p8573_p4 }
 0x13c   : > { %p8569_p9 = pneg %p8568_p7 }
 0x13e   : > { %p8576_p12 = pnand %p8575_p11, %p8569_p9 }
 0x140   : > { %8579 = shalt.err (!%p8576_p12)
}
 0x141   : > { %7732 = dma.hbm_to_vmem [thread:$0]  (!%p9167_p6), %s10881_s7, 16, %s9371_s0, [#allocation6]  }
 0x142   : > { %s8984_s2 = smov [#allocation10]   ;;  %s10882_s27 = sld [smem:[#allocation79_spill]] }
 0x143   : > { %s661_s29 = sshll.u32 %s8984_s2, 4  ;;  %s662_s29 = int_to_ptr.vmem [resolvable:$true] %s661_s29 }
 0x148   : > { %s8580_s5 = scalar_lea.hbm %s10882_s27, 176 }
 0x149   : > { %p8581_p1 = scmp.ne.s32.totalorder %s10882_s27, %s8580_s5  ;;  %p8587_p0 = scmp.lt.u32.totalorder %s8580_s5, %s10882_s27 }
 0x14b   : > { %p8583_p3 = pnand %p8581_p1, %p9183_p8 }
 0x14d   : > { %p8584_p13 = pneg %p8583_p3 }
 0x14f   : > { %p8589_p2 = pnand %p8587_p0, %p8584_p13 }
 0x151   : > { %8592 = shalt.err (!%p8589_p2)
}
 0x152   : > { %s8593_s0 = scalar_lea.vmem %s662_s29, 176  ;;  %s8600_s22 = scalar_lea.vmem %s662_s29, 192 }
 0x153   : > { %p8594_p5 = scmp.ne.s32.totalorder %s662_s29, %s8593_s0  ;;  %p8601_p4 = scmp.lt.s32.totalorder %s662_s29, %s662_s29 }
 0x154   : > { %p8602_p10 = scmp.lt.s32.totalorder %s8600_s22, %s8593_s0 }
 0x155   : > { %p8596_p7 = pnand %p8594_p5, %p9183_p8 }
 0x156   : > { %p8603_p11 = por %p8602_p10, %p8601_p4 }
 0x157   : > { %p8597_p9 = pneg %p8596_p7 }
 0x159   : > { %p8604_p12 = pnand %p8603_p11, %p8597_p9 }
 0x15b   : > { %8607 = shalt.err (!%p8604_p12)
}
 0x15c   : > { %s8985_s3 = smov 16   ;;  %s8986_s9 = smov 1  }
 0x15d   : > { %7738 = dma.hbm_to_vmem [thread:$0]  (!%p9167_p6), %s10882_s27, 176, %s662_s29, [#allocation9], %s8985_s3, %s8985_s3, %s8986_s9  }
 0x15e   : > { %s8987_s28 = smov [#allocation13]   ;;  %s8988_s5 = smov [#allocation16]  }
 0x15f   : > { %s688_s1 = sshll.u32 %s8987_s28, 4  ;;  %s712_s17 = sshll.u32 %s8988_s5, 4  ;;  %s689_s1 = int_to_ptr.vmem [resolvable:$true] %s688_s1  ;;  %s713_s17 = int_to_ptr.vmem [resolvable:$true] %s712_s17 }
 0x160   : > { %s10883_s0 = sld [smem:[#allocation81_spill]] }
 0x166   : > { %s8608_s22 = scalar_lea.hbm %s10883_s0, 16 }
 0x167   : > { %p8609_p1 = scmp.ne.s32.totalorder %s10883_s0, %s8608_s22  ;;  %p8615_p0 = scmp.lt.u32.totalorder %s8608_s22, %s10883_s0 }
 0x169   : > { %p8611_p3 = pnand %p8609_p1, %p9183_p8 }
 0x16b   : > { %p8612_p13 = pneg %p8611_p3 }
 0x16d   : > { %p8617_p2 = pnand %p8615_p0, %p8612_p13 }
 0x16f   : > { %8620 = shalt.err (!%p8617_p2)
}
 0x170   : > { %s8621_s29 = scalar_lea.vmem %s689_s1, 16  ;;  %s8628_s7 = scalar_lea.vmem %s689_s1, 32 }
 0x171   : > { %p8622_p5 = scmp.ne.s32.totalorder %s689_s1, %s8621_s29  ;;  %p8629_p4 = scmp.lt.s32.totalorder %s689_s1, %s689_s1 }
 0x172   : > { %p8630_p10 = scmp.lt.s32.totalorder %s8628_s7, %s8621_s29 }
 0x173   : > { %p8624_p7 = pnand %p8622_p5, %p9183_p8 }
 0x174   : > { %p8631_p11 = por %p8630_p10, %p8629_p4 }
 0x175   : > { %p8625_p9 = pneg %p8624_p7 }
 0x177   : > { %p8632_p12 = pnand %p8631_p11, %p8625_p9 }
 0x179   : > { %8635 = shalt.err (!%p8632_p12)
}
 0x17a   : > { %7744 = dma.hbm_to_vmem [thread:$0]  (!%p9167_p6), %s10883_s0, 16, %s689_s1, [#allocation12]  }
 0x17b   : > { %s10884_s3 = sld [smem:[#allocation83_spill]] }
 0x181   : > { %s8636_s9 = scalar_lea.hbm %s10884_s3, 16 }
 0x182   : > { %p8637_p1 = scmp.ne.s32.totalorder %s10884_s3, %s8636_s9  ;;  %p8643_p0 = scmp.lt.u32.totalorder %s8636_s9, %s10884_s3 }
 0x184   : > { %p8639_p3 = pnand %p8637_p1, %p9183_p8 }
 0x186   : > { %p8640_p13 = pneg %p8639_p3 }
 0x188   : > { %p8645_p2 = pnand %p8643_p0, %p8640_p13 }
 0x18a   : > { %8648 = shalt.err (!%p8645_p2)
}
 0x18b   : > { %s8649_s18 = scalar_lea.vmem %s713_s17, 16  ;;  %s8656_s1 = scalar_lea.vmem %s713_s17, 32 }
 0x18c   : > { %p8650_p5 = scmp.ne.s32.totalorder %s713_s17, %s8649_s18  ;;  %p8657_p4 = scmp.lt.s32.totalorder %s713_s17, %s713_s17 }
 0x18d   : > { %p8658_p10 = scmp.lt.s32.totalorder %s8656_s1, %s8649_s18 }
 0x18e   : > { %p8652_p7 = pnand %p8650_p5, %p9183_p8 }
 0x18f   : > { %p8659_p11 = por %p8658_p10, %p8657_p4 }
 0x190   : > { %p8653_p9 = pneg %p8652_p7 }
 0x192   : > { %p8660_p12 = pnand %p8659_p11, %p8653_p9 }
 0x194   : > { %8663 = shalt.err (!%p8660_p12)
}
 0x195   : > { %7750 = dma.hbm_to_vmem [thread:$0]  (!%p9167_p6), %s10884_s3, 16, %s713_s17, [#allocation15]  }
 0x196   : > { %s8989_s7 = smov [#allocation19]   ;;  %s8990_s15 = smov [#allocation22]  }
 0x197   : > { %s736_s13 = sshll.u32 %s8989_s7, 4  ;;  %s760_s19 = sshll.u32 %s8990_s15, 4  ;;  %s737_s13 = int_to_ptr.vmem [resolvable:$true] %s736_s13  ;;  %s761_s19 = int_to_ptr.vmem [resolvable:$true] %s760_s19 }
 0x198   : > { %s8664_s11 = scalar_lea.hbm %s10755_s10, 16 }
 0x199   : > { %p8665_p1 = scmp.ne.s32.totalorder %s10755_s10, %s8664_s11  ;;  %p8671_p0 = scmp.lt.u32.totalorder %s8664_s11, %s10755_s10 }
 0x19b   : > { %p8667_p3 = pnand %p8665_p1, %p9183_p8 }
 0x19d   : > { %p8668_p13 = pneg %p8667_p3 }
 0x19f   : > { %p8673_p2 = pnand %p8671_p0, %p8668_p13 }
 0x1a1   : > { %8676 = shalt.err (!%p8673_p2)
}
 0x1a2   : > { %s8677_s17 = scalar_lea.vmem %s737_s13, 16  ;;  %s8684_s1 = scalar_lea.vmem %s737_s13, 32 }
 0x1a3   : > { %p8678_p5 = scmp.ne.s32.totalorder %s737_s13, %s8677_s17  ;;  %p8685_p4 = scmp.lt.s32.totalorder %s737_s13, %s737_s13 }
 0x1a4   : > { %p8686_p10 = scmp.lt.s32.totalorder %s8684_s1, %s8677_s17 }
 0x1a5   : > { %p8680_p7 = pnand %p8678_p5, %p9183_p8 }
 0x1a6   : > { %p8687_p11 = por %p8686_p10, %p8685_p4 }
 0x1a7   : > { %p8681_p9 = pneg %p8680_p7 }
 0x1a9   : > { %p8688_p12 = pnand %p8687_p11, %p8681_p9 }
 0x1ab   : > { %8691 = shalt.err (!%p8688_p12)
}
 0x1ac   : > { %7756 = dma.hbm_to_vmem [thread:$0]  (!%p9167_p6), %s10755_s10, 16, %s737_s13, [#allocation18]  }
 0x1ad   : > { %s8692_s25 = scalar_lea.hbm %s10757_s12, 32 }
 0x1ae   : > { %p8693_p1 = scmp.ne.s32.totalorder %s10757_s12, %s8692_s25  ;;  %p8699_p0 = scmp.lt.u32.totalorder %s8692_s25, %s10757_s12 }
 0x1b0   : > { %p8695_p3 = pnand %p8693_p1, %p9183_p8 }
 0x1b2   : > { %p8696_p13 = pneg %p8695_p3 }
 0x1b4   : > { %p8701_p2 = pnand %p8699_p0, %p8696_p13 }
 0x1b6   : > { %8704 = shalt.err (!%p8701_p2)
}
 0x1b7   : > { %s8705_s5 = scalar_lea.vmem %s761_s19, 32  ;;  %p8713_p4 = scmp.lt.s32.totalorder %s761_s19, %s761_s19 }
 0x1b8   : > { %p8706_p5 = scmp.ne.s32.totalorder %s761_s19, %s8705_s5  ;;  %p8714_p10 = scmp.lt.s32.totalorder %s8705_s5, %s8705_s5 }
 0x1ba   : > { %p8708_p7 = pnand %p8706_p5, %p9183_p8  ;;  %p8715_p11 = por %p8714_p10, %p8713_p4 }
 0x1bc   : > { %p8709_p9 = pneg %p8708_p7 }
 0x1be   : > { %p8716_p12 = pnand %p8715_p11, %p8709_p9 }
 0x1c0   : > { %8719 = shalt.err (!%p8716_p12)
}
 0x1c1   : > { %7762 = dma.hbm_to_vmem [thread:$0]  (!%p9167_p6), %s10757_s12, 32, %s761_s19, [#allocation21]  }
 0x1c2   : > { %s8991_s17 = smov [#allocation25]   ;;  %s8992_s22 = smov [#allocation28]  }
 0x1c3   : > { %s784_s1 = sshll.u32 %s8991_s17, 4  ;;  %s808_s29 = sshll.u32 %s8992_s22, 4  ;;  %s785_s1 = int_to_ptr.vmem [resolvable:$true] %s784_s1  ;;  %s809_s29 = int_to_ptr.vmem [resolvable:$true] %s808_s29 }
 0x1c4   : > { %s8720_s25 = scalar_lea.hbm %s10759_s14, 16 }
 0x1c5   : > { %p8721_p1 = scmp.ne.s32.totalorder %s10759_s14, %s8720_s25  ;;  %p8727_p0 = scmp.lt.u32.totalorder %s8720_s25, %s10759_s14 }
 0x1c7   : > { %p8723_p3 = pnand %p8721_p1, %p9183_p8 }
 0x1c9   : > { %p8724_p13 = pneg %p8723_p3 }
 0x1cb   : > { %p8729_p2 = pnand %p8727_p0, %p8724_p13 }
 0x1cd   : > { %8732 = shalt.err (!%p8729_p2)
}
 0x1ce   : > { %s8733_s19 = scalar_lea.vmem %s785_s1, 16  ;;  %s8740_s5 = scalar_lea.vmem %s785_s1, 32 }
 0x1cf   : > { %p8734_p5 = scmp.ne.s32.totalorder %s785_s1, %s8733_s19  ;;  %p8741_p4 = scmp.lt.s32.totalorder %s785_s1, %s785_s1 }
 0x1d0   : > { %p8742_p10 = scmp.lt.s32.totalorder %s8740_s5, %s8733_s19 }
 0x1d1   : > { %p8736_p7 = pnand %p8734_p5, %p9183_p8 }
 0x1d2   : > { %p8743_p11 = por %p8742_p10, %p8741_p4 }
 0x1d3   : > { %p8737_p9 = pneg %p8736_p7 }
 0x1d5   : > { %p8744_p12 = pnand %p8743_p11, %p8737_p9 }
 0x1d7   : > { %8747 = shalt.err (!%p8744_p12)
}
 0x1d8   : > { %7768 = dma.hbm_to_vmem [thread:$0]  (!%p9167_p6), %s10759_s14, 16, %s785_s1, [#allocation24]  }
 0x1d9   : > { %s8748_s7 = scalar_lea.hbm %s10761_s16, 16 }
 0x1da   : > { %p8749_p1 = scmp.ne.s32.totalorder %s10761_s16, %s8748_s7  ;;  %p8755_p0 = scmp.lt.u32.totalorder %s8748_s7, %s10761_s16 }
 0x1dc   : > { %p8751_p3 = pnand %p8749_p1, %p9183_p8 }
 0x1de   : > { %p8752_p13 = pneg %p8751_p3 }
 0x1e0   : > { %p8757_p2 = pnand %p8755_p0, %p8752_p13 }
 0x1e2   : > { %8760 = shalt.err (!%p8757_p2)
}
 0x1e3   : > { %s8761_s2 = scalar_lea.vmem %s809_s29, 16  ;;  %s8768_s1 = scalar_lea.vmem %s809_s29, 32 }
 0x1e4   : > { %p8762_p5 = scmp.ne.s32.totalorder %s809_s29, %s8761_s2  ;;  %p8769_p4 = scmp.lt.s32.totalorder %s809_s29, %s809_s29 }
 0x1e5   : > { %p8770_p10 = scmp.lt.s32.totalorder %s8768_s1, %s8761_s2 }
 0x1e6   : > { %p8764_p7 = pnand %p8762_p5, %p9183_p8 }
 0x1e7   : > { %p8771_p11 = por %p8770_p10, %p8769_p4 }
 0x1e8   : > { %p8765_p9 = pneg %p8764_p7 }
 0x1ea   : > { %p8772_p12 = pnand %p8771_p11, %p8765_p9 }
 0x1ec   : > { %8775 = shalt.err (!%p8772_p12)
}
 0x1ed   : > { %7774 = dma.hbm_to_vmem [thread:$0]  (!%p9167_p6), %s10761_s16, 16, %s809_s29, [#allocation27]  }
 0x1ee   : > { %s8993_s5 = smov [#allocation31]   ;;  %s8994_s18 = smov [#allocation32]  }
 0x1ef   : > { %s840_s13 = sshll.u32 %s8993_s5, 4  ;;  %s856_s17 = sshll.u32 %s8994_s18, 4  ;;  %s841_s13 = int_to_ptr.vmem [resolvable:$true] %s840_s13  ;;  %s857_s17 = int_to_ptr.vmem [resolvable:$true] %s856_s17 }
 0x1f0   : > { %s8776_s15 = scalar_lea.hbm %s10766_s21, 1024 }
 0x1f1   : > { %p8777_p1 = scmp.ne.s32.totalorder %s10766_s21, %s8776_s15  ;;  %p8783_p0 = scmp.lt.u32.totalorder %s8776_s15, %s10766_s21 }
 0x1f3   : > { %p8779_p3 = pnand %p8777_p1, %p9183_p8 }
 0x1f5   : > { %p8780_p13 = pneg %p8779_p3 }
 0x1f7   : > { %p8785_p2 = pnand %p8783_p0, %p8780_p13 }
 0x1f9   : > { %8788 = shalt.err (!%p8785_p2)
}
 0x1fa   : > { %s8789_s29 = scalar_lea.vmem %s841_s13, 1024  ;;  %p8797_p4 = scmp.lt.s32.totalorder %s841_s13, %s841_s13 }
 0x1fb   : > { %p8790_p5 = scmp.ne.s32.totalorder %s841_s13, %s8789_s29  ;;  %p8798_p10 = scmp.lt.s32.totalorder %s8789_s29, %s8789_s29 }
 0x1fd   : > { %p8792_p7 = pnand %p8790_p5, %p9183_p8  ;;  %p8799_p11 = por %p8798_p10, %p8797_p4 }
 0x1ff   : > { %p8793_p9 = pneg %p8792_p7 }
 0x201   : > { %p8800_p12 = pnand %p8799_p11, %p8793_p9 }
 0x203   : > { %8803 = shalt.err (!%p8800_p12)
}
 0x204   : > { %7780 = dma.hbm_to_vmem [thread:$0]  (!%p9167_p6), %s10766_s21, 1024, %s841_s13, [#allocation30], %s10878_s20, %s10878_s20, %s10877_s24  }
 0x205   : > { %s8804_s18 = scalar_lea.hbm %s10768_s23, 1024 }
 0x206   : > { %p8805_p1 = scmp.ne.s32.totalorder %s10768_s23, %s8804_s18  ;;  %p8811_p0 = scmp.lt.u32.totalorder %s8804_s18, %s10768_s23 }
 0x208   : > { %p8807_p3 = pnand %p8805_p1, %p9183_p8 }
 0x20a   : > { %p8808_p13 = pneg %p8807_p3 }
 0x20c   : > { %p8813_p2 = pnand %p8811_p0, %p8808_p13 }
 0x20e   : > { %8816 = shalt.err (!%p8813_p2)
}
 0x20f   : > { %s8817_s9 = scalar_lea.vmem %s857_s17, 1024  ;;  %p8825_p4 = scmp.lt.s32.totalorder %s857_s17, %s857_s17 }
 0x210   : > { %p8818_p5 = scmp.ne.s32.totalorder %s857_s17, %s8817_s9  ;;  %p8826_p10 = scmp.lt.s32.totalorder %s8817_s9, %s8817_s9 }
 0x212   : > { %p8820_p7 = pnand %p8818_p5, %p9183_p8  ;;  %p8827_p11 = por %p8826_p10, %p8825_p4 }
 0x214   : > { %p8821_p9 = pneg %p8820_p7 }
 0x216   : > { %p8828_p12 = pnand %p8827_p11, %p8821_p9 }
 0x218   : > { %8831 = shalt.err (!%p8828_p12)
}
 0x219   : > { %s10885_s8 = sld [smem:[#allocation48_spill]]  ;;  %s10886_s2 = sld [smem:[#allocation47_spill]] }
 0x21a   : > { %s10887_s29 = sld [smem:[#allocation49_spill]]  ;;  %s6265_s4 = sadd.s32 4294967294, %s8968_s30  }
 0x21b   : > { %7783 = dma.hbm_to_vmem [thread:$0]  (!%p9167_p6), %s10768_s23, 1024, %s857_s17, [#allocation33], %s10878_s20, %s10878_s20, %s10877_s24  }
 0x21c   : > { %s9588_s1 = sadd.s32 1, %s8968_s30   ;;  %s58_s28 = sadd.s32 1, %s8964_s6 }
 0x21d   : > { %s55_s19 = ssub.s32 %s8968_s30, %s9588_s1  ;;  %p66_p3 = scmp.eq.s32.totalorder %s8968_s30, 0 }
 0x21e   : > { %p56_p1 = scmp.eq.s32.totalorder %s55_s19, 0  ;;  %p605_p9 = scmp.eq.s32.totalorder %s6265_s4, 1 }
 0x21f   : > { %p65_p8 = scmp.ne.s32.totalorder %s8964_s6, %s10885_s8  ;;  %p71_p13 = scmp.ne.s32.totalorder %s10885_s8, %s10886_s2 }
 0x220   : > { %p599_p0 = scmp.eq.s32.totalorder %s10887_s29, 1  ;;  %p10888_p5 = scmp.eq.s32.totalorder %s10887_s29, 0 }
 0x221   : > { %s9600_s5 = scalar_select %p56_p1, %s8964_s6, %s58_s28  }
 0x222   : > { %p67_p2 = por %p66_p3, %p65_p8  ;;  %p9604_p7 = por %p10888_p5, %p71_p13 }
 0x223   : > { %p9608_p6 = por %p599_p0, %p65_p8  ;;  %p7811_p4 = scmp.lt.s32.totalorder %s8968_s30, 2 }
 0x224   : > { %s873_s20 = sand.u32 1, %s8964_s6   ;;  %p9614_p10 = por %p605_p9, %p71_p13 }
 0x225   : > { %s10890_s24 = scalar_select %p9608_p6, 1, 0 }
 0x226   : > { %s10891_s17 = scalar_select %p9614_p10, 1, 0 }
 0x227   : > { %s6287_s22 = sshll.u32 %s873_s20, 7  ;;  %s6587_s7 = sshll.u32 %s8968_s30, 11 }
 0x228   : > { %s10892_s9 = sld [smem:[#allocation75_spill]]  ;;  %s877_s11 = scalar_lea.vmem [#allocation2], %s6287_s22 }
 0x229   : > { %s884_s8 = sshll.u32 %s877_s11, 4  ;;  %p9624_p11 = pnand %p7811_p4, %p67_p2  ;;  %s9628_s8 = int_to_ptr.vmem [resolvable:$true] %s884_s8 }
 0x22a   : > { %s9630_s29 = scalar_lea.sflag [#allocation3], %s873_s20 }
 0x22b   : > { %p8834_p8 = pneg %p9624_p11 }
 0x22e   : > { %s9622_s13 = scalar_lea.hbm %s10892_s9, %s6587_s7  ;;  %s8837_s22 = scalar_lea.hbm %s10892_s9, 4096 }
 0x22f   : > { %s8832_s4 = scalar_lea.hbm %s9622_s13, 2048  ;;  %p8838_p13 = scmp.lt.u32.totalorder %s9622_s13, %s10892_s9 }
 0x230   : > { %p8833_p12 = scmp.ne.s32.totalorder %s9622_s13, %s8832_s4  ;;  %p8839_p0 = scmp.lt.u32.totalorder %s8837_s22, %s8832_s4 }
 0x231   : > { %p8841_p5 = scmp.lt.u32.totalorder %s8832_s4, %s9622_s13 }
 0x232   : > { %p8835_p1 = pnand %p8834_p8, %p8833_p12  ;;  %p8840_p2 = por %p8839_p0, %p8838_p13 }
 0x234   : > { %p8836_p3 = pneg %p8835_p1  ;;  %p8842_p9 = por %p8841_p5, %p8840_p2 }
 0x236   : > { %p8843_p4 = pnand %p8842_p9, %p8836_p3 }
 0x238   : > { %8846 = shalt.err (!%p8843_p4)
}
 0x239   : > { %s8847_s20 = scalar_lea.vmem %s9628_s8, 2048  ;;  %s8995_s25 = smov [#allocation2]  }
 0x23a   : > { %p8848_p12 = scmp.ne.s32.totalorder %s9628_s8, %s8847_s20  ;;  %s8852_s11 = sshll.u32 %s8995_s25, 4  ;;  %s8853_s11 = int_to_ptr.vmem [resolvable:$false] %s8852_s11 }
 0x23b   : > { %s8854_s28 = scalar_lea.vmem %s8853_s11, 4096  ;;  %p8855_p6 = scmp.lt.s32.totalorder %s9628_s8, %s8853_s11 }
 0x23c   : > { %p8850_p1 = pnand %p8848_p12, %p8834_p8  ;;  %p8856_p13 = scmp.lt.s32.totalorder %s8854_s28, %s8847_s20 }
 0x23e   : > { %p8851_p10 = pneg %p8850_p1  ;;  %p8857_p0 = por %p8856_p13, %p8855_p6 }
 0x240   : > { %p8858_p2 = pnand %p8857_p0, %p8851_p10 }
 0x242   : > { %8861 = shalt.err (!%p8858_p2)
}
 0x243   : > { %s10894_s4 = smov 8   ;;  %s10895_s19 = smov 128  }
 0x244   : > { %7787 = dma.hbm_to_vmem [thread:$0]  (!%p9624_p11), %s9622_s13, 2048, %s9628_s8, %s9630_s29, %s10895_s19, %s10895_s19, %s10894_s4  }
 0x245   : > { %s10896_s22 = sld [smem:[#allocation50_spill]] }
 0x24b   : > { %p10897_p8 = scmp.ne.s32.totalorder %s10896_s22, 0 }
 0x24d   : > { %896 = sbr.rel (%p10897_p8) target bundleno = 6009 (0x1779), region = 120 }
 0x254   : > { %s10898_s7 = sld [smem:[#allocation48_spill]] }
 0x25a   : > { %s9664_s15 = sand.u32 1, %s10898_s7  }
 0x25b   : > { %s6291_s20 = sshll.u32 %s9664_s15, 7  ;;  %s899_s25 = scalar_lea.sflag [#allocation3], %s9664_s15 }
 0x25c   : > { %s9668_s11 = scalar_lea.vmem [#allocation2], %s6291_s20 }
 0x25d   : > { %8907 = dma.done.wait (%p9604_p7), %s899_s25, 2048  }
 0x25e   : > { %8909 = vsyncadd (%p9604_p7), %s899_s25, 4294965248  ;;  %s10899_s2 = sld [smem:[#allocation49_spill]] }
 0x264   : > { %p10900_p6 = scmp.eq.s32.totalorder %s10899_s2, 0 }
 0x266   : > { %8911 = dma.done.wait (%p10900_p6), [#allocation6], 1040   ;;  %p10901_p10 = pmov %p10900_p6 }
 0x267   : > { %p10902_p11 = pmov %p10900_p6 }
 0x268   : > { %8913 = vsyncadd (%p10901_p10), [#allocation6], 4294966256 }
 0x269   : > { %8915 = dma.done.wait (%p10902_p11), [#allocation9], 11440   ;;  %p10903_p3 = pmov %p10900_p6 }
 0x26b   : > { %8917 = vsyncadd (%p10903_p3), [#allocation9], 4294955856  ;;  %p10904_p5 = pmov %p10903_p3 }
 0x26c   : > { %p10905_p9 = pmov %p10903_p3 }
 0x26d   : > { %8919 = dma.done.wait (%p10904_p5), [#allocation12], 1040  }
 0x26e   : > { %8921 = vsyncadd (%p10905_p9), [#allocation12], 4294966256  ;;  %p10906_p7 = pmov %p10903_p3 }
 0x26f   : > { %p10907_p4 = pmov %p10903_p3 }
 0x270   : > { %8923 = dma.done.wait (%p10906_p7), [#allocation15], 2064  }
 0x271   : > { %8925 = vsyncadd (%p10907_p4), [#allocation15], 4294965232  ;;  %p10908_p12 = pmov %p10903_p3 }
 0x272   : > { %p10909_p1 = pmov %p10903_p3 }
 0x273   : > { %8927 = dma.done.wait (%p10908_p12), [#allocation18], 1040  }
 0x274   : > { %8929 = vsyncadd (%p10909_p1), [#allocation18], 4294966256  ;;  %p10910_p13 = pmov %p10909_p1 }
 0x275   : > { %p10911_p0 = pmov %p10909_p1 }
 0x276   : > { %8931 = dma.done.wait (%p10910_p13), [#allocation21], 2080  }
 0x277   : > { %8933 = vsyncadd (%p10911_p0), [#allocation21], 4294965216  ;;  %p10912_p2 = pmov %p10911_p0 }
 0x278   : > { %p10913_p8 = pmov %p10911_p0 }
 0x279   : > { %8935 = dma.done.wait (%p10912_p2), [#allocation24], 2064  }
 0x27a   : > { %8937 = vsyncadd (%p10913_p8), [#allocation24], 4294965232  ;;  %p10914_p6 = pmov %p10911_p0 }
 0x27b   : > { %p10915_p10 = pmov %p10911_p0 }
 0x27c   : > { %8939 = dma.done.wait (%p10914_p6), [#allocation27], 1040  }
 0x27d   : > { %8941 = vsyncadd (%p10915_p10), [#allocation27], 4294966256  ;;  %p10916_p11 = pmov %p10911_p0 }
 0x27e   : > { %p10917_p3 = pmov %p10911_p0 }
 0x27f   : > { %8943 = dma.done.wait (%p10916_p11), [#allocation30], 3072  }
 0x280   : > { %8945 = vsyncadd (%p10917_p3), [#allocation30], 4294964224  ;;  %p10918_p5 = pmov %p10911_p0 }
 0x281   : > { %p10919_p9 = pmov %p10911_p0 }
 0x282   : > { %8947 = dma.done.wait (%p10918_p5), [#allocation33], 1024  }
 0x283   : > { %8949 = vsyncadd (%p10919_p9), [#allocation33], 4294966272  ;;  %v7892_v0 = vld [vmem:[#allocation5] sm:$0xff]   ;;  %v7893_v1 = vld [vmem:[#allocation5 + $0x8] sm:$0xff]   ;;  %s6311_s18 = sshll.u32 %s9664_s15, 8  ;;  %s10944_s28 = sld [smem:[#allocation88_spill]] }
 0x284   : > { %7070 = vmatprep.subr.bf16.mxu0 %v7892_v0  ;;  %v7894_v2 = vld [vmem:[#allocation5 + $0x10] sm:$0xff]   ;;  %v7895_v3 = vld [vmem:[#allocation5 + $0x18] sm:$0xff]   ;;  %v1048_v4 = vld [vmem:[%s9668_s11] sm:$0xff]  ;;  %s10207_s13 = scalar_lea.vmem [#allocation34], %s6311_s18  ;;  %s10955_s29 = sld [smem:[#allocation91_spill]] }
 0x285   : > { %7071 = vmatpush3.bf16.msra.mxu0 %v7892_v0  ;;  %v1049_v5 = vld [vmem:[%s9668_s11 + $0x8] sm:$0xff]  ;;  %v7896_v7 = vld [vmem:[#allocation5 + $0x20] sm:$0xff]   ;;  %v7902_v11 = vld [vmem:[#allocation8 + $0x10] sm:$0xff]   ;;  %s10956_s22 = sld [smem:[#allocation92_spill]]  ;;  %s10957_s25 = sld [smem:[#allocation93_spill]] }
 0x286   : > { %7072 = vmatprep.subr.bf16.mxu0 %v7893_v1  ;;  %v9716_v6 = vpack.c.bf16 %v1049_v5, %v1048_v4  ;;  %v7900_v8 = vld [vmem:[#allocation8] sm:$0xff]   ;;  %v7901_v10 = vld [vmem:[#allocation8 + $0x8] sm:$0xff]   ;;  %v7903_v13 = vld [vmem:[#allocation8 + $0x18] sm:$0xff]   ;;  %s6011_s18 = sshll.u32 %s10207_s13, 4  ;;  %p11000_p4 = scmp.ne.s32.totalorder %s10890_s24, 0  ;;  %s10698_s18 = int_to_ptr.vmem [resolvable:$true] %s6011_s18 }
 0x287   : > { %v7897_v9 = vld [vmem:[#allocation5 + $0x28] sm:$0xff]   ;;  %7102 = vmatprep.subr.bf16.mxu1 %v7900_v8  ;;  %v7898_v12 = vld [vmem:[#allocation5 + $0x30] sm:$0xff]   ;;  %v7899_v14 = vld [vmem:[#allocation5 + $0x38] sm:$0xff]   ;;  %s8862_s7 = scalar_lea.vmem %s10698_s18, 4096  ;;  %s8997_s20 = smov [#allocation34]  }
 0x288   : > { %7086 = vmatprep.mubr.bf16.mxu0 %v9716_v6  ;;  %7103 = vmatpush3.bf16.msra.mxu1 %v7900_v8  ;;  %v7904_v15 = vld [vmem:[#allocation8 + $0x20] sm:$0xff]   ;;  %v1050_v16 = vld [vmem:[%s9668_s11 + $0x10] sm:$0xff]  ;;  %v1051_v17 = vld [vmem:[%s9668_s11 + $0x18] sm:$0xff]  ;;  %p8863_p7 = scmp.ne.s32.totalorder %s10698_s18, %s8862_s7 }
 0x289   : > { %7073 = vmatpush3.bf16.msra.mxu0 %v7893_v1  ;;  %7104 = vmatprep.subr.bf16.mxu1 %v7901_v10  ;;  %v1052_v18 = vld [vmem:[%s9668_s11 + $0x20] sm:$0xff]  ;;  %v1053_v19 = vld [vmem:[%s9668_s11 + $0x28] sm:$0xff]  ;;  %v9723_v21 = vpack.c.bf16 %v1051_v17, %v1050_v16  ;;  %v1054_v23 = vld [vmem:[%s9668_s11 + $0x30] sm:$0xff] }
 0x28a   : > { %7074 = vmatprep.subr.bf16.mxu0 %v7894_v2  ;;  %v7905_v20 = vld [vmem:[#allocation8 + $0x28] sm:$0xff]   ;;  %v9725_v22 = vpack.c.bf16 %v1053_v19, %v1052_v18  ;;  %v1055_v24 = vld [vmem:[%s9668_s11 + $0x38] sm:$0xff]  ;;  %v1056_v25 = vld [vmem:[%s9668_s11 + $0x40] sm:$0xff]  ;;  %p8864_p12 = pnand %p8863_p7, %p11000_p4 }
 0x28b   : > { %v1057_v26 = vld [vmem:[%s9668_s11 + $0x48] sm:$0xff]  ;;  %v9733_v27 = vpack.c.bf16 %v1055_v24, %v1054_v23  ;;  %v1058_v29 = vld [vmem:[%s9668_s11 + $0x50] sm:$0xff]  ;;  %v1059_v30 = vld [vmem:[%s9668_s11 + $0x58] sm:$0xff] }
 0x28c   : > { %7105 = vmatpush3.bf16.msra.mxu1 %v7901_v10  ;;  %v9735_v28 = vpack.c.bf16 %v1057_v26, %v1056_v25  ;;  %v1060_v31 = vld [vmem:[%s9668_s11 + $0x60] sm:$0xff]  ;;  %v1061_v32 = vld [vmem:[%s9668_s11 + $0x68] sm:$0xff]  ;;  %v9743_v33 = vpack.c.bf16 %v1059_v30, %v1058_v29  ;;  %v1062_v35 = vld [vmem:[%s9668_s11 + $0x70] sm:$0xff]  ;;  %p8865_p1 = pneg %p8864_p12 }
 0x28d   : > { %7075 = vmatpush3.bf16.msra.mxu0 %v7894_v2  ;;  %7106 = vmatprep.subr.bf16.mxu1 %v7902_v11  ;;  %v9745_v34 = vpack.c.bf16 %v1061_v32, %v1060_v31  ;;  %v1063_v36 = vld [vmem:[%s9668_s11 + $0x78] sm:$0xff]  ;;  %v7908_v40 = vld [vmem:[#allocation8 + $0x40] sm:$0xff]   ;;  %v7909_v41 = vld [vmem:[#allocation8 + $0x48] sm:$0xff]  }
 0x28e   : > { %7076 = vmatprep.subr.bf16.mxu0 %v7895_v3  ;;  %v9751_v37 = vpack.c.bf16 %v1063_v36, %v1062_v35  ;;  %v7906_v38 = vld [vmem:[#allocation8 + $0x30] sm:$0xff]   ;;  %v7907_v39 = vld [vmem:[#allocation8 + $0x38] sm:$0xff]   ;;  %v7912_v44 = vld [vmem:[#allocation8 + $0x60] sm:$0xff]  }
 0x28f   : > { %v7910_v42 = vld [vmem:[#allocation8 + $0x50] sm:$0xff]   ;;  %v7911_v43 = vld [vmem:[#allocation8 + $0x58] sm:$0xff]   ;;  %v7913_v45 = vld [vmem:[#allocation8 + $0x68] sm:$0xff]  }
 0x290   : > { %7107 = vmatpush3.bf16.msra.mxu1 %v7902_v11  ;;  %v6312_v46 = vld [vmem:[#allocation7] ss:$0 sm:$0xff] }
 0x291   : > { %7077 = vmatpush3.bf16.msra.mxu0 %v7895_v3  ;;  %7108 = vmatprep.subr.bf16.mxu1 %v7903_v13 }
 0x292   : > { %7078 = vmatprep.subr.bf16.mxu0 %v7896_v7 }
 0x294   : > { %7109 = vmatpush3.bf16.msra.mxu1 %v7903_v13 }
 0x295   : > { %7079 = vmatpush3.bf16.msra.mxu0 %v7896_v7  ;;  %7110 = vmatprep.subr.bf16.mxu1 %v7904_v15 }
 0x296   : > { %7080 = vmatprep.subr.bf16.mxu0 %v7897_v9 }
 0x298   : > { %7111 = vmatpush3.bf16.msra.mxu1 %v7904_v15 }
 0x299   : > { %7081 = vmatpush3.bf16.msra.mxu0 %v7897_v9  ;;  %7112 = vmatprep.subr.bf16.mxu1 %v7905_v20 }
 0x29a   : > { %7082 = vmatprep.subr.bf16.mxu0 %v7898_v12 }
 0x29c   : > { %7113 = vmatpush3.bf16.msra.mxu1 %v7905_v20 }
 0x29d   : > { %7083 = vmatpush3.bf16.msra.mxu0 %v7898_v12  ;;  %7114 = vmatprep.subr.bf16.mxu1 %v7906_v38 }
 0x29e   : > { %7084 = vmatprep.subr.bf16.mxu0 %v7899_v14 }
 0x2a0   : > { %7115 = vmatpush3.bf16.msra.mxu1 %v7906_v38 }
 0x2a1   : > { %7085 = vmatpush3.bf16.msra.mxu0 %v7899_v14  ;;  %7116 = vmatprep.subr.bf16.mxu1 %v7907_v39 }
 0x2a2   : > { %7134 = vmatprep.subr.bf16.mxu0 %v7908_v40 }
 0x2a4   : > { %7087 = vmatmul.mubr.bf16.vlgmr.msra.gmra.mrb[0].mxu0 %v9723_v21  ;;  %7117 = vmatpush3.bf16.msra.mxu1 %v7907_v39 }
 0x2a5   : > { %7090 = vmatprep.mubr.bf16.mxu0 %v9725_v22  ;;  %7135 = vmatpush3.bf16.msra.mxu0 %v7908_v40 }
 0x2a6   : > { %7136 = vmatprep.subr.bf16.mxu0 %v7909_v41 }
 0x2a9   : > { %7137 = vmatpush3.bf16.msra.mxu0 %v7909_v41 }
 0x2aa   : > { %7138 = vmatprep.subr.bf16.mxu0 %v7910_v42 }
 0x2ac   : > { %7091 = vmatmul.mubr.bf16.gmra.mrb[4].mxu0 %v9733_v27 }
 0x2ad   : > { %7094 = vmatprep.mubr.bf16.mxu0 %v9735_v28  ;;  %7139 = vmatpush3.bf16.msra.mxu0 %v7910_v42 }
 0x2ae   : > { %7140 = vmatprep.subr.bf16.mxu0 %v7911_v43 }
 0x2b1   : > { %7141 = vmatpush3.bf16.msra.mxu0 %v7911_v43 }
 0x2b2   : > { %7142 = vmatprep.subr.bf16.mxu0 %v7912_v44 }
 0x2b4   : > { %7095 = vmatmul.mubr.bf16.gmra.mrb[8].mxu0 %v9743_v33 }
 0x2b5   : > { %7098 = vmatprep.mubr.bf16.mxu0 %v9745_v34  ;;  %7143 = vmatpush3.bf16.msra.mxu0 %v7912_v44 }
 0x2b6   : > { %7144 = vmatprep.subr.bf16.mxu0 %v7913_v45 }
 0x2b9   : > { %7145 = vmatpush3.bf16.msra.mxu0 %v7913_v45 }
 0x2bc   : > { %7099 = vmatmul.mubr.bf16.gmra.mrb[12].mxu0 %v9751_v37 }
 0x377   : > { %v7088_v47 = vpop.f32.mrb[0].mxu0 }
 0x378   : > { %v1188_v48 = vadd.f32 %v7088_v47, %v6312_v46  ;;  %v1179_v49 = vpop.f32.mrb[1].mxu0 }
 0x379   : > { %v1180_v50 = vadd.f32 %v6312_v46, %v1179_v49  ;;  %v7089_v51 = vpop.f32.mrb[2].mxu0  ;;  %v7915_v49 = vld [vmem:[#allocation8 + $0x78] sm:$0xff]  }
 0x37a   : > { %v1191_v52 = vadd.f32 %v7089_v51, %v6312_v46  ;;  %v1182_v53 = vpop.f32.mrb[3].mxu0  ;;  %v1244_v55 = vmax.f32 %v1188_v48, 0.0  ;;  %v7914_v48 = vld [vmem:[#allocation8 + $0x70] sm:$0xff]   ;;  %v7917_v51 = vld [vmem:[#allocation8 + $0x88] sm:$0xff]  }
 0x37b   : > { %v1183_v54 = vadd.f32 %v6312_v46, %v1182_v53  ;;  %v1242_v57 = vmax.f32 %v1180_v50, 0.0  ;;  %7146 = vmatprep.subr.bf16.mxu0 %v7914_v48  ;;  %v7916_v50 = vld [vmem:[#allocation8 + $0x80] sm:$0xff]  }
 0x37c   : > { %v1245_v56 = vmax.f32 %v1191_v52, 0.0  ;;  %7147 = vmatpush3.bf16.msra.mxu0 %v7914_v48  ;;  %7166 = vmatprep.subr.bf16.mxu1 %v7916_v50  ;;  %v7918_v52 = vld [vmem:[#allocation8 + $0x90] sm:$0xff]   ;;  %v7920_v53 = vld [vmem:[#allocation8 + $0xa0] sm:$0xff]  }
 0x37d   : > { %v1243_v58 = vmax.f32 %v1183_v54, 0.0  ;;  %7148 = vmatprep.subr.bf16.mxu0 %v7915_v49  ;;  %v7921_v54 = vld [vmem:[#allocation8 + $0xa8] sm:$0xff]  }
 0x37e   : > { %v1275_v59 = vpack.c.bf16 %v1245_v56, %v1244_v55  ;;  %v6321_v55 = vld [vmem:[#allocation10] ss:$0 sm:$0xff] }
 0x37f   : > { %v7092_v60 = vpop.f32.mrb[4].mxu0  ;;  %v1274_v61 = vpack.c.bf16 %v1243_v58, %v1242_v57 }
 0x380   : > { %v1204_v62 = vadd.f32 %v7092_v60, %v6312_v46  ;;  %v1195_v63 = vpop.f32.mrb[5].mxu0  ;;  %7149 = vmatpush3.bf16.msra.mxu0 %v7915_v49 }
 0x381   : > { %v1196_v0 = vadd.f32 %v6312_v46, %v1195_v63  ;;  %v7093_v1 = vpop.f32.mrb[6].mxu0  ;;  %7118 = vmatprep.mubr.bf16.mxu1 %v1274_v61 }
 0x382   : > { %v1248_v2 = vmax.f32 %v1204_v62, 0.0  ;;  %v1207_v3 = vadd.f32 %v7093_v1, %v6312_v46  ;;  %v1198_v4 = vpop.f32.mrb[7].mxu0  ;;  %7119 = vmatmul.mubr.bf16.vlgmr.msra.gmra.mrb[0].mxu1 %v1275_v59 }
 0x383   : > { %v1246_v5 = vmax.f32 %v1196_v0, 0.0  ;;  %v1199_v7 = vadd.f32 %v6312_v46, %v1198_v4  ;;  %7167 = vmatpush3.bf16.msra.mxu1 %v7916_v50 }
 0x384   : > { %v1249_v8 = vmax.f32 %v1207_v3, 0.0  ;;  %7168 = vmatprep.subr.bf16.mxu1 %v7917_v51 }
 0x385   : > { %v1247_v9 = vmax.f32 %v1199_v7, 0.0 }
 0x386   : > { %v1277_v10 = vpack.c.bf16 %v1249_v8, %v1248_v2 }
 0x387   : > { %v1276_v11 = vpack.c.bf16 %v1247_v9, %v1246_v5  ;;  %v7096_v12 = vpop.f32.mrb[8].mxu0  ;;  %7169 = vmatpush3.bf16.msra.mxu1 %v7917_v51 }
 0x388   : > { %v1220_v13 = vadd.f32 %v7096_v12, %v6312_v46  ;;  %v1211_v14 = vpop.f32.mrb[9].mxu0  ;;  %7170 = vmatprep.subr.bf16.mxu1 %v7918_v52 }
 0x389   : > { %v1212_v15 = vadd.f32 %v6312_v46, %v1211_v14  ;;  %v7097_v16 = vpop.f32.mrb[10].mxu0  ;;  %7122 = vmatprep.mubr.bf16.mxu1 %v1276_v11 }
 0x38a   : > { %v1252_v17 = vmax.f32 %v1220_v13, 0.0  ;;  %v1223_v18 = vadd.f32 %v7097_v16, %v6312_v46  ;;  %v1214_v19 = vpop.f32.mrb[11].mxu0  ;;  %7123 = vmatmul.mubr.bf16.gmra.mrb[4].mxu1 %v1277_v10 }
 0x38b   : > { %v1250_v20 = vmax.f32 %v1212_v15, 0.0  ;;  %v1215_v23 = vadd.f32 %v6312_v46, %v1214_v19  ;;  %7171 = vmatpush3.bf16.msra.mxu1 %v7918_v52 }
 0x38c   : > { %v1253_v24 = vmax.f32 %v1223_v18, 0.0 }
 0x38d   : > { %v1251_v25 = vmax.f32 %v1215_v23, 0.0 }
 0x38e   : > { %v1279_v26 = vpack.c.bf16 %v1253_v24, %v1252_v17 }
 0x38f   : > { %v1278_v29 = vpack.c.bf16 %v1251_v25, %v1250_v20  ;;  %v7100_v30 = vpop.f32.mrb[12].mxu0 }
 0x390   : > { %v1236_v31 = vadd.f32 %v7100_v30, %v6312_v46  ;;  %v1227_v32 = vpop.f32.mrb[13].mxu0 }
 0x391   : > { %v1228_v35 = vadd.f32 %v6312_v46, %v1227_v32  ;;  %v7101_v36 = vpop.f32.mrb[14].mxu0  ;;  %7126 = vmatprep.mubr.bf16.mxu1 %v1278_v29 }
 0x392   : > { %v1256_v38 = vmax.f32 %v1236_v31, 0.0  ;;  %v1239_v39 = vadd.f32 %v7101_v36, %v6312_v46  ;;  %v1230_v40 = vpop.f32.mrb[15].mxu0  ;;  %7127 = vmatmul.mubr.bf16.gmra.mrb[8].mxu1 %v1279_v26 }
 0x393   : > { %v1254_v41 = vmax.f32 %v1228_v35, 0.0  ;;  %v1231_v42 = vadd.f32 %v6312_v46, %v1230_v40  ;;  %v7919_v46 = vld [vmem:[#allocation8 + $0x98] sm:$0xff]  }
 0x394   : > { %v1257_v43 = vmax.f32 %v1239_v39, 0.0  ;;  %7172 = vmatprep.subr.bf16.mxu1 %v7919_v46 }
 0x395   : > { %v1255_v44 = vmax.f32 %v1231_v42, 0.0  ;;  %7173 = vmatpush3.bf16.msra.mxu1 %v7919_v46 }
 0x396   : > { %v1281_v45 = vpack.c.bf16 %v1257_v43, %v1256_v38  ;;  %7174 = vmatprep.subr.bf16.mxu1 %v7920_v53 }
 0x397   : > { %v1280_v47 = vpack.c.bf16 %v1255_v44, %v1254_v41 }
 0x399   : > { %7130 = vmatprep.mubr.bf16.mxu1 %v1280_v47  ;;  %7175 = vmatpush3.bf16.msra.mxu1 %v7920_v53 }
 0x39a   : > { %7131 = vmatmul.mubr.bf16.gmra.mrb[12].mxu1 %v1281_v45  ;;  %7176 = vmatprep.subr.bf16.mxu1 %v7921_v54 }
 0x39d   : > { %7177 = vmatpush3.bf16.msra.mxu1 %v7921_v54 }
 0x455   : > { %v7120_v56 = vpop.f32.mrb[0].mxu1 }
 0x456   : > { %v1380_v57 = vadd.f32 %v7120_v56, %v6321_v55  ;;  %v1371_v58 = vpop.f32.mrb[1].mxu1 }
 0x457   : > { %v1372_v59 = vadd.f32 %v6321_v55, %v1371_v58  ;;  %v7121_v60 = vpop.f32.mrb[2].mxu1  ;;  %v7923_v58 = vld [vmem:[#allocation8 + $0xb8] sm:$0xff]  }
 0x458   : > { %v1383_v61 = vadd.f32 %v7121_v60, %v6321_v55  ;;  %v1374_v62 = vpop.f32.mrb[3].mxu1  ;;  %v1436_v0 = vmax.f32 %v1380_v57, 0.0  ;;  %v7922_v57 = vld [vmem:[#allocation8 + $0xb0] sm:$0xff]   ;;  %v7925_v60 = vld [vmem:[#allocation8 + $0xc8] sm:$0xff]  }
 0x459   : > { %v1375_v63 = vadd.f32 %v6321_v55, %v1374_v62  ;;  %v1434_v2 = vmax.f32 %v1372_v59, 0.0  ;;  %7178 = vmatprep.subr.bf16.mxu1 %v7922_v57  ;;  %v7924_v59 = vld [vmem:[#allocation8 + $0xc0] sm:$0xff]  }
 0x45a   : > { %v1437_v1 = vmax.f32 %v1383_v61, 0.0  ;;  %7179 = vmatpush3.bf16.msra.mxu1 %v7922_v57  ;;  %7198 = vmatprep.subr.bf16.mxu0 %v7924_v59  ;;  %v7926_v61 = vld [vmem:[#allocation8 + $0xd0] sm:$0xff]   ;;  %v7928_v62 = vld [vmem:[#allocation8 + $0xe0] sm:$0xff]  }
 0x45b   : > { %v1435_v3 = vmax.f32 %v1375_v63, 0.0  ;;  %7180 = vmatprep.subr.bf16.mxu1 %v7923_v58  ;;  %v7929_v63 = vld [vmem:[#allocation8 + $0xe8] sm:$0xff]  }
 0x45c   : > { %v1468_v4 = vpack.c.bf16 %v1437_v1, %v1436_v0  ;;  %v6330_v0 = vld [vmem:[#allocation10 + $0x1] ss:$0 sm:$0xff] }
 0x45d   : > { %v1467_v5 = vpack.c.bf16 %v1435_v3, %v1434_v2  ;;  %v7124_v7 = vpop.f32.mrb[4].mxu1 }
 0x45e   : > { %v1396_v8 = vadd.f32 %v7124_v7, %v6321_v55  ;;  %v1387_v9 = vpop.f32.mrb[5].mxu1  ;;  %7181 = vmatpush3.bf16.msra.mxu1 %v7923_v58 }
 0x45f   : > { %v1388_v10 = vadd.f32 %v6321_v55, %v1387_v9  ;;  %v7125_v11 = vpop.f32.mrb[6].mxu1  ;;  %7150 = vmatprep.mubr.bf16.mxu0 %v1467_v5 }
 0x460   : > { %v1440_v12 = vmax.f32 %v1396_v8, 0.0  ;;  %v1399_v13 = vadd.f32 %v7125_v11, %v6321_v55  ;;  %v1390_v14 = vpop.f32.mrb[7].mxu1  ;;  %7151 = vmatmul.mubr.bf16.vlgmr.msra.gmra.mrb[16].mxu0 %v1468_v4 }
 0x461   : > { %v1438_v15 = vmax.f32 %v1388_v10, 0.0  ;;  %v1391_v16 = vadd.f32 %v6321_v55, %v1390_v14  ;;  %7199 = vmatpush3.bf16.msra.mxu0 %v7924_v59 }
 0x462   : > { %v1441_v17 = vmax.f32 %v1399_v13, 0.0  ;;  %7200 = vmatprep.subr.bf16.mxu0 %v7925_v60 }
 0x463   : > { %v1439_v18 = vmax.f32 %v1391_v16, 0.0 }
 0x464   : > { %v1470_v19 = vpack.c.bf16 %v1441_v17, %v1440_v12 }
 0x465   : > { %v1469_v20 = vpack.c.bf16 %v1439_v18, %v1438_v15  ;;  %v7128_v23 = vpop.f32.mrb[8].mxu1  ;;  %7201 = vmatpush3.bf16.msra.mxu0 %v7925_v60 }
 0x466   : > { %v1412_v24 = vadd.f32 %v7128_v23, %v6321_v55  ;;  %v1403_v25 = vpop.f32.mrb[9].mxu1  ;;  %7202 = vmatprep.subr.bf16.mxu0 %v7926_v61 }
 0x467   : > { %v1404_v26 = vadd.f32 %v6321_v55, %v1403_v25  ;;  %v7129_v29 = vpop.f32.mrb[10].mxu1  ;;  %7154 = vmatprep.mubr.bf16.mxu0 %v1469_v20 }
 0x468   : > { %v1444_v30 = vmax.f32 %v1412_v24, 0.0  ;;  %v1415_v31 = vadd.f32 %v7129_v29, %v6321_v55  ;;  %v1406_v32 = vpop.f32.mrb[11].mxu1  ;;  %7155 = vmatmul.mubr.bf16.gmra.mrb[20].mxu0 %v1470_v19 }
 0x469   : > { %v1442_v35 = vmax.f32 %v1404_v26, 0.0  ;;  %v1407_v36 = vadd.f32 %v6321_v55, %v1406_v32  ;;  %7203 = vmatpush3.bf16.msra.mxu0 %v7926_v61 }
 0x46a   : > { %v1445_v38 = vmax.f32 %v1415_v31, 0.0 }
 0x46b   : > { %v1443_v39 = vmax.f32 %v1407_v36, 0.0 }
 0x46c   : > { %v1472_v40 = vpack.c.bf16 %v1445_v38, %v1444_v30 }
 0x46d   : > { %v1471_v41 = vpack.c.bf16 %v1443_v39, %v1442_v35  ;;  %v7132_v42 = vpop.f32.mrb[12].mxu1 }
 0x46e   : > { %v1428_v43 = vadd.f32 %v7132_v42, %v6321_v55  ;;  %v1419_v44 = vpop.f32.mrb[13].mxu1 }
 0x46f   : > { %v1420_v45 = vadd.f32 %v6321_v55, %v1419_v44  ;;  %v7133_v47 = vpop.f32.mrb[14].mxu1  ;;  %7158 = vmatprep.mubr.bf16.mxu0 %v1471_v41 }
 0x470   : > { %v1448_v48 = vmax.f32 %v1428_v43, 0.0  ;;  %v1431_v49 = vadd.f32 %v7133_v47, %v6321_v55  ;;  %v1422_v50 = vpop.f32.mrb[15].mxu1  ;;  %7159 = vmatmul.mubr.bf16.gmra.mrb[24].mxu0 %v1472_v40 }
 0x471   : > { %v1446_v51 = vmax.f32 %v1420_v45, 0.0  ;;  %v1423_v52 = vadd.f32 %v6321_v55, %v1422_v50  ;;  %v7927_v55 = vld [vmem:[#allocation8 + $0xd8] sm:$0xff]  }
 0x472   : > { %v1449_v46 = vmax.f32 %v1431_v49, 0.0  ;;  %7204 = vmatprep.subr.bf16.mxu0 %v7927_v55 }
 0x473   : > { %v1447_v53 = vmax.f32 %v1423_v52, 0.0  ;;  %7205 = vmatpush3.bf16.msra.mxu0 %v7927_v55 }
 0x474   : > { %v1474_v54 = vpack.c.bf16 %v1449_v46, %v1448_v48  ;;  %7206 = vmatprep.subr.bf16.mxu0 %v7928_v62 }
 0x475   : > { %v1473_v56 = vpack.c.bf16 %v1447_v53, %v1446_v51 }
 0x477   : > { %7162 = vmatprep.mubr.bf16.mxu0 %v1473_v56  ;;  %7207 = vmatpush3.bf16.msra.mxu0 %v7928_v62 }
 0x478   : > { %7163 = vmatmul.mubr.bf16.gmra.mrb[28].mxu0 %v1474_v54  ;;  %7208 = vmatprep.subr.bf16.mxu0 %v7929_v63 }
 0x47b   : > { %7209 = vmatpush3.bf16.msra.mxu0 %v7929_v63 }
 0x533   : > { %v7152_v1 = vpop.f32.mrb[16].mxu0 }
 0x534   : > { %v1574_v2 = vadd.f32 %v7152_v1, %v6330_v0  ;;  %v1565_v3 = vpop.f32.mrb[17].mxu0 }
 0x535   : > { %v1566_v4 = vadd.f32 %v6330_v0, %v1565_v3  ;;  %v7153_v5 = vpop.f32.mrb[18].mxu0  ;;  %v7931_v3 = vld [vmem:[#allocation8 + $0xf8] sm:$0xff]  }
 0x536   : > { %v1577_v7 = vadd.f32 %v7153_v5, %v6330_v0  ;;  %v1568_v8 = vpop.f32.mrb[19].mxu0  ;;  %v1630_v10 = vmax.f32 %v1574_v2, 0.0  ;;  %v7930_v2 = vld [vmem:[#allocation8 + $0xf0] sm:$0xff]   ;;  %v7933_v5 = vld [vmem:[#allocation8 + $0x108] sm:$0xff]  }
 0x537   : > { %v1569_v9 = vadd.f32 %v6330_v0, %v1568_v8  ;;  %v1628_v12 = vmax.f32 %v1566_v4, 0.0  ;;  %7210 = vmatprep.subr.bf16.mxu0 %v7930_v2  ;;  %v7932_v4 = vld [vmem:[#allocation8 + $0x100] sm:$0xff]  }
 0x538   : > { %v1631_v11 = vmax.f32 %v1577_v7, 0.0  ;;  %7211 = vmatpush3.bf16.msra.mxu0 %v7930_v2  ;;  %7230 = vmatprep.subr.bf16.mxu1 %v7932_v4  ;;  %v7934_v7 = vld [vmem:[#allocation8 + $0x110] sm:$0xff]   ;;  %v7936_v8 = vld [vmem:[#allocation8 + $0x120] sm:$0xff]  }
 0x539   : > { %v1629_v13 = vmax.f32 %v1569_v9, 0.0  ;;  %7212 = vmatprep.subr.bf16.mxu0 %v7931_v3  ;;  %v7937_v9 = vld [vmem:[#allocation8 + $0x128] sm:$0xff]  }
 0x53a   : > { %v1662_v14 = vpack.c.bf16 %v1631_v11, %v1630_v10  ;;  %v6339_v10 = vld [vmem:[#allocation10 + $0x2] ss:$0 sm:$0xff] }
 0x53b   : > { %v1661_v15 = vpack.c.bf16 %v1629_v13, %v1628_v12  ;;  %v7156_v16 = vpop.f32.mrb[20].mxu0 }
 0x53c   : > { %v1590_v17 = vadd.f32 %v7156_v16, %v6330_v0  ;;  %v1581_v18 = vpop.f32.mrb[21].mxu0  ;;  %7213 = vmatpush3.bf16.msra.mxu0 %v7931_v3 }
 0x53d   : > { %v1582_v19 = vadd.f32 %v6330_v0, %v1581_v18  ;;  %v7157_v20 = vpop.f32.mrb[22].mxu0  ;;  %7182 = vmatprep.mubr.bf16.mxu1 %v1661_v15 }
 0x53e   : > { %v1634_v23 = vmax.f32 %v1590_v17, 0.0  ;;  %v1593_v24 = vadd.f32 %v7157_v20, %v6330_v0  ;;  %v1584_v25 = vpop.f32.mrb[23].mxu0  ;;  %7183 = vmatmul.mubr.bf16.vlgmr.msra.gmra.mrb[16].mxu1 %v1662_v14 }
 0x53f   : > { %v1632_v26 = vmax.f32 %v1582_v19, 0.0  ;;  %v1585_v29 = vadd.f32 %v6330_v0, %v1584_v25  ;;  %7231 = vmatpush3.bf16.msra.mxu1 %v7932_v4 }
 0x540   : > { %v1635_v30 = vmax.f32 %v1593_v24, 0.0  ;;  %7232 = vmatprep.subr.bf16.mxu1 %v7933_v5 }
 0x541   : > { %v1633_v31 = vmax.f32 %v1585_v29, 0.0 }
 0x542   : > { %v1664_v32 = vpack.c.bf16 %v1635_v30, %v1634_v23 }
 0x543   : > { %v1663_v35 = vpack.c.bf16 %v1633_v31, %v1632_v26  ;;  %v7160_v36 = vpop.f32.mrb[24].mxu0  ;;  %7233 = vmatpush3.bf16.msra.mxu1 %v7933_v5 }
 0x544   : > { %v1606_v38 = vadd.f32 %v7160_v36, %v6330_v0  ;;  %v1597_v39 = vpop.f32.mrb[25].mxu0  ;;  %7234 = vmatprep.subr.bf16.mxu1 %v7934_v7 }
 0x545   : > { %v1598_v40 = vadd.f32 %v6330_v0, %v1597_v39  ;;  %v7161_v41 = vpop.f32.mrb[26].mxu0  ;;  %7186 = vmatprep.mubr.bf16.mxu1 %v1663_v35 }
 0x546   : > { %v1638_v42 = vmax.f32 %v1606_v38, 0.0  ;;  %v1609_v43 = vadd.f32 %v7161_v41, %v6330_v0  ;;  %v1600_v44 = vpop.f32.mrb[27].mxu0  ;;  %7187 = vmatmul.mubr.bf16.gmra.mrb[20].mxu1 %v1664_v32 }
 0x547   : > { %v1636_v45 = vmax.f32 %v1598_v40, 0.0  ;;  %v1601_v47 = vadd.f32 %v6330_v0, %v1600_v44  ;;  %7235 = vmatpush3.bf16.msra.mxu1 %v7934_v7 }
 0x548   : > { %v1639_v48 = vmax.f32 %v1609_v43, 0.0 }
 0x549   : > { %v1637_v49 = vmax.f32 %v1601_v47, 0.0 }
 0x54a   : > { %v1666_v50 = vpack.c.bf16 %v1639_v48, %v1638_v42 }
 0x54b   : > { %v1665_v51 = vpack.c.bf16 %v1637_v49, %v1636_v45  ;;  %v7164_v52 = vpop.f32.mrb[28].mxu0 }
 0x54c   : > { %v1622_v46 = vadd.f32 %v7164_v52, %v6330_v0  ;;  %v1613_v53 = vpop.f32.mrb[29].mxu0 }
 0x54d   : > { %v1614_v54 = vadd.f32 %v6330_v0, %v1613_v53  ;;  %v7165_v56 = vpop.f32.mrb[30].mxu0  ;;  %7190 = vmatprep.mubr.bf16.mxu1 %v1665_v51 }
 0x54e   : > { %v1642_v57 = vmax.f32 %v1622_v46, 0.0  ;;  %v1625_v58 = vadd.f32 %v7165_v56, %v6330_v0  ;;  %v1616_v59 = vpop.f32.mrb[31].mxu0  ;;  %7191 = vmatmul.mubr.bf16.gmra.mrb[24].mxu1 %v1666_v50 }
 0x54f   : > { %v1640_v60 = vmax.f32 %v1614_v54, 0.0  ;;  %v1617_v61 = vadd.f32 %v6330_v0, %v1616_v59  ;;  %v7935_v0 = vld [vmem:[#allocation8 + $0x118] sm:$0xff]  }
 0x550   : > { %v1643_v55 = vmax.f32 %v1625_v58, 0.0  ;;  %7236 = vmatprep.subr.bf16.mxu1 %v7935_v0 }
 0x551   : > { %v1641_v62 = vmax.f32 %v1617_v61, 0.0  ;;  %7237 = vmatpush3.bf16.msra.mxu1 %v7935_v0 }
 0x552   : > { %v1668_v63 = vpack.c.bf16 %v1643_v55, %v1642_v57  ;;  %7238 = vmatprep.subr.bf16.mxu1 %v7936_v8 }
 0x553   : > { %v1667_v1 = vpack.c.bf16 %v1641_v62, %v1640_v60 }
 0x555   : > { %7194 = vmatprep.mubr.bf16.mxu1 %v1667_v1  ;;  %7239 = vmatpush3.bf16.msra.mxu1 %v7936_v8 }
 0x556   : > { %7195 = vmatmul.mubr.bf16.gmra.mrb[28].mxu1 %v1668_v63  ;;  %7240 = vmatprep.subr.bf16.mxu1 %v7937_v9 }
 0x559   : > { %7241 = vmatpush3.bf16.msra.mxu1 %v7937_v9 }
 0x611   : > { %v7184_v11 = vpop.f32.mrb[16].mxu1 }
 0x612   : > { %v1768_v12 = vadd.f32 %v7184_v11, %v6339_v10  ;;  %v1759_v13 = vpop.f32.mrb[17].mxu1 }
 0x613   : > { %v1760_v14 = vadd.f32 %v6339_v10, %v1759_v13  ;;  %v7185_v15 = vpop.f32.mrb[18].mxu1  ;;  %v7939_v13 = vld [vmem:[#allocation8 + $0x138] sm:$0xff]  }
 0x614   : > { %v1771_v16 = vadd.f32 %v7185_v15, %v6339_v10  ;;  %v1762_v17 = vpop.f32.mrb[19].mxu1  ;;  %v1824_v19 = vmax.f32 %v1768_v12, 0.0  ;;  %v7938_v12 = vld [vmem:[#allocation8 + $0x130] sm:$0xff]   ;;  %v7941_v15 = vld [vmem:[#allocation8 + $0x148] sm:$0xff]  }
 0x615   : > { %v1763_v18 = vadd.f32 %v6339_v10, %v1762_v17  ;;  %v1822_v23 = vmax.f32 %v1760_v14, 0.0  ;;  %7242 = vmatprep.subr.bf16.mxu1 %v7938_v12  ;;  %v7940_v14 = vld [vmem:[#allocation8 + $0x140] sm:$0xff]  }
 0x616   : > { %v1825_v20 = vmax.f32 %v1771_v16, 0.0  ;;  %7243 = vmatpush3.bf16.msra.mxu1 %v7938_v12  ;;  %7262 = vmatprep.subr.bf16.mxu0 %v7940_v14  ;;  %v7942_v16 = vld [vmem:[#allocation8 + $0x150] sm:$0xff]   ;;  %v7944_v17 = vld [vmem:[#allocation8 + $0x160] sm:$0xff]  }
 0x617   : > { %v1823_v24 = vmax.f32 %v1763_v18, 0.0  ;;  %7244 = vmatprep.subr.bf16.mxu1 %v7939_v13  ;;  %v7945_v18 = vld [vmem:[#allocation8 + $0x168] sm:$0xff]  }
 0x618   : > { %v1856_v25 = vpack.c.bf16 %v1825_v20, %v1824_v19  ;;  %v6348_v19 = vld [vmem:[#allocation10 + $0x3] ss:$0 sm:$0xff] }
 0x619   : > { %v1855_v26 = vpack.c.bf16 %v1823_v24, %v1822_v23  ;;  %v7188_v29 = vpop.f32.mrb[20].mxu1 }
 0x61a   : > { %v1784_v30 = vadd.f32 %v7188_v29, %v6339_v10  ;;  %v1775_v31 = vpop.f32.mrb[21].mxu1  ;;  %7245 = vmatpush3.bf16.msra.mxu1 %v7939_v13 }
 0x61b   : > { %v1776_v32 = vadd.f32 %v6339_v10, %v1775_v31  ;;  %v7189_v35 = vpop.f32.mrb[22].mxu1  ;;  %7214 = vmatprep.mubr.bf16.mxu0 %v1855_v26 }
 0x61c   : > { %v1787_v36 = vadd.f32 %v7189_v35, %v6339_v10  ;;  %v1778_v38 = vpop.f32.mrb[23].mxu1  ;;  %7215 = vmatmul.mubr.bf16.vlgmr.msra.gmra.mrb[32].mxu0 %v1856_v25  ;;  %v1828_v40 = vmax.f32 %v1784_v30, 0.0 }
 0x61d   : > { %v1779_v39 = vadd.f32 %v6339_v10, %v1778_v38  ;;  %v1826_v42 = vmax.f32 %v1776_v32, 0.0  ;;  %7263 = vmatpush3.bf16.msra.mxu0 %v7940_v14 }
 0x61e   : > { %v1829_v41 = vmax.f32 %v1787_v36, 0.0  ;;  %7264 = vmatprep.subr.bf16.mxu0 %v7941_v15 }
 0x61f   : > { %v1827_v43 = vmax.f32 %v1779_v39, 0.0 }
 0x620   : > { %v1858_v44 = vpack.c.bf16 %v1829_v41, %v1828_v40 }
 0x621   : > { %v1857_v45 = vpack.c.bf16 %v1827_v43, %v1826_v42  ;;  %v7192_v47 = vpop.f32.mrb[24].mxu1  ;;  %7265 = vmatpush3.bf16.msra.mxu0 %v7941_v15 }
 0x622   : > { %v1800_v48 = vadd.f32 %v7192_v47, %v6339_v10  ;;  %v1791_v49 = vpop.f32.mrb[25].mxu1  ;;  %7266 = vmatprep.subr.bf16.mxu0 %v7942_v16 }
 0x623   : > { %v1792_v50 = vadd.f32 %v6339_v10, %v1791_v49  ;;  %v7193_v51 = vpop.f32.mrb[26].mxu1  ;;  %7218 = vmatprep.mubr.bf16.mxu0 %v1857_v45 }
 0x624   : > { %v1832_v52 = vmax.f32 %v1800_v48, 0.0  ;;  %v1803_v46 = vadd.f32 %v7193_v51, %v6339_v10  ;;  %v1794_v53 = vpop.f32.mrb[27].mxu1  ;;  %7219 = vmatmul.mubr.bf16.gmra.mrb[36].mxu0 %v1858_v44 }
 0x625   : > { %v1830_v54 = vmax.f32 %v1792_v50, 0.0  ;;  %v1795_v56 = vadd.f32 %v6339_v10, %v1794_v53  ;;  %7267 = vmatpush3.bf16.msra.mxu0 %v7942_v16 }
 0x626   : > { %v1833_v57 = vmax.f32 %v1803_v46, 0.0 }
 0x627   : > { %v1831_v58 = vmax.f32 %v1795_v56, 0.0 }
 0x628   : > { %v1860_v59 = vpack.c.bf16 %v1833_v57, %v1832_v52 }
 0x629   : > { %v1859_v60 = vpack.c.bf16 %v1831_v58, %v1830_v54  ;;  %v7196_v61 = vpop.f32.mrb[28].mxu1 }
 0x62a   : > { %v1816_v55 = vadd.f32 %v7196_v61, %v6339_v10  ;;  %v1807_v62 = vpop.f32.mrb[29].mxu1 }
 0x62b   : > { %v1808_v63 = vadd.f32 %v6339_v10, %v1807_v62  ;;  %v7197_v1 = vpop.f32.mrb[30].mxu1  ;;  %7222 = vmatprep.mubr.bf16.mxu0 %v1859_v60 }
 0x62c   : > { %v1836_v2 = vmax.f32 %v1816_v55, 0.0  ;;  %v1819_v3 = vadd.f32 %v7197_v1, %v6339_v10  ;;  %v1810_v4 = vpop.f32.mrb[31].mxu1  ;;  %7223 = vmatmul.mubr.bf16.gmra.mrb[40].mxu0 %v1860_v59 }
 0x62d   : > { %v1834_v5 = vmax.f32 %v1808_v63, 0.0  ;;  %v1811_v7 = vadd.f32 %v6339_v10, %v1810_v4  ;;  %v7943_v10 = vld [vmem:[#allocation8 + $0x158] sm:$0xff]  }
 0x62e   : > { %v1837_v0 = vmax.f32 %v1819_v3, 0.0  ;;  %7268 = vmatprep.subr.bf16.mxu0 %v7943_v10 }
 0x62f   : > { %v1835_v8 = vmax.f32 %v1811_v7, 0.0  ;;  %7269 = vmatpush3.bf16.msra.mxu0 %v7943_v10 }
 0x630   : > { %v1862_v9 = vpack.c.bf16 %v1837_v0, %v1836_v2  ;;  %7270 = vmatprep.subr.bf16.mxu0 %v7944_v17 }
 0x631   : > { %v1861_v11 = vpack.c.bf16 %v1835_v8, %v1834_v5 }
 0x633   : > { %7226 = vmatprep.mubr.bf16.mxu0 %v1861_v11  ;;  %7271 = vmatpush3.bf16.msra.mxu0 %v7944_v17 }
 0x634   : > { %7227 = vmatmul.mubr.bf16.gmra.mrb[44].mxu0 %v1862_v9  ;;  %7272 = vmatprep.subr.bf16.mxu0 %v7945_v18 }
 0x637   : > { %7273 = vmatpush3.bf16.msra.mxu0 %v7945_v18 }
 0x6ef   : > { %v7216_v20 = vpop.f32.mrb[32].mxu0 }
 0x6f0   : > { %v1962_v23 = vadd.f32 %v7216_v20, %v6348_v19  ;;  %v1953_v24 = vpop.f32.mrb[33].mxu0 }
 0x6f1   : > { %v1954_v25 = vadd.f32 %v6348_v19, %v1953_v24  ;;  %v7217_v26 = vpop.f32.mrb[34].mxu0  ;;  %v7947_v24 = vld [vmem:[#allocation8 + $0x178] sm:$0xff]  }
 0x6f2   : > { %v1965_v29 = vadd.f32 %v7217_v26, %v6348_v19  ;;  %v1956_v30 = vpop.f32.mrb[35].mxu0  ;;  %v2018_v32 = vmax.f32 %v1962_v23, 0.0  ;;  %v7946_v23 = vld [vmem:[#allocation8 + $0x170] sm:$0xff]   ;;  %v7949_v26 = vld [vmem:[#allocation8 + $0x188] sm:$0xff]  }
 0x6f3   : > { %v1957_v31 = vadd.f32 %v6348_v19, %v1956_v30  ;;  %v2016_v36 = vmax.f32 %v1954_v25, 0.0  ;;  %7274 = vmatprep.subr.bf16.mxu0 %v7946_v23  ;;  %v7948_v25 = vld [vmem:[#allocation8 + $0x180] sm:$0xff]  }
 0x6f4   : > { %v2019_v35 = vmax.f32 %v1965_v29, 0.0  ;;  %7275 = vmatpush3.bf16.msra.mxu0 %v7946_v23  ;;  %7294 = vmatprep.subr.bf16.mxu1 %v7948_v25  ;;  %v7950_v29 = vld [vmem:[#allocation8 + $0x190] sm:$0xff]   ;;  %v7952_v30 = vld [vmem:[#allocation8 + $0x1a0] sm:$0xff]  }
 0x6f5   : > { %v2017_v38 = vmax.f32 %v1957_v31, 0.0  ;;  %7276 = vmatprep.subr.bf16.mxu0 %v7947_v24  ;;  %v7953_v31 = vld [vmem:[#allocation8 + $0x1a8] sm:$0xff]  }
 0x6f6   : > { %v2050_v39 = vpack.c.bf16 %v2019_v35, %v2018_v32  ;;  %v6357_v32 = vld [vmem:[#allocation10 + $0x4] ss:$0 sm:$0xff] }
 0x6f7   : > { %v2049_v40 = vpack.c.bf16 %v2017_v38, %v2016_v36  ;;  %v7220_v41 = vpop.f32.mrb[36].mxu0 }
 0x6f8   : > { %v1978_v42 = vadd.f32 %v7220_v41, %v6348_v19  ;;  %v1969_v43 = vpop.f32.mrb[37].mxu0  ;;  %7277 = vmatpush3.bf16.msra.mxu0 %v7947_v24 }
 0x6f9   : > { %v1970_v44 = vadd.f32 %v6348_v19, %v1969_v43  ;;  %v7221_v45 = vpop.f32.mrb[38].mxu0  ;;  %7246 = vmatprep.mubr.bf16.mxu1 %v2049_v40 }
 0x6fa   : > { %v1981_v47 = vadd.f32 %v7221_v45, %v6348_v19  ;;  %v1972_v48 = vpop.f32.mrb[39].mxu0  ;;  %7247 = vmatmul.mubr.bf16.vlgmr.msra.gmra.mrb[32].mxu1 %v2050_v39  ;;  %v2022_v50 = vmax.f32 %v1978_v42, 0.0 }
 0x6fb   : > { %v1973_v49 = vadd.f32 %v6348_v19, %v1972_v48  ;;  %v2020_v52 = vmax.f32 %v1970_v44, 0.0  ;;  %7295 = vmatpush3.bf16.msra.mxu1 %v7948_v25 }
 0x6fc   : > { %v2023_v51 = vmax.f32 %v1981_v47, 0.0  ;;  %7296 = vmatprep.subr.bf16.mxu1 %v7949_v26 }
 0x6fd   : > { %v2021_v46 = vmax.f32 %v1973_v49, 0.0 }
 0x6fe   : > { %v2052_v53 = vpack.c.bf16 %v2023_v51, %v2022_v50 }
 0x6ff   : > { %v2051_v54 = vpack.c.bf16 %v2021_v46, %v2020_v52  ;;  %v7224_v56 = vpop.f32.mrb[40].mxu0  ;;  %7297 = vmatpush3.bf16.msra.mxu1 %v7949_v26 }
 0x700   : > { %v1994_v57 = vadd.f32 %v7224_v56, %v6348_v19  ;;  %v1985_v58 = vpop.f32.mrb[41].mxu0  ;;  %7298 = vmatprep.subr.bf16.mxu1 %v7950_v29 }
 0x701   : > { %v1986_v59 = vadd.f32 %v6348_v19, %v1985_v58  ;;  %v7225_v60 = vpop.f32.mrb[42].mxu0  ;;  %7250 = vmatprep.mubr.bf16.mxu1 %v2051_v54 }
 0x702   : > { %v2026_v61 = vmax.f32 %v1994_v57, 0.0  ;;  %v1997_v55 = vadd.f32 %v7225_v60, %v6348_v19  ;;  %v1988_v62 = vpop.f32.mrb[43].mxu0  ;;  %7251 = vmatmul.mubr.bf16.gmra.mrb[36].mxu1 %v2052_v53 }
 0x703   : > { %v2024_v63 = vmax.f32 %v1986_v59, 0.0  ;;  %v1989_v1 = vadd.f32 %v6348_v19, %v1988_v62  ;;  %7299 = vmatpush3.bf16.msra.mxu1 %v7950_v29 }
 0x704   : > { %v2027_v2 = vmax.f32 %v1997_v55, 0.0 }
 0x705   : > { %v2025_v3 = vmax.f32 %v1989_v1, 0.0 }
 0x706   : > { %v2054_v4 = vpack.c.bf16 %v2027_v2, %v2026_v61 }
 0x707   : > { %v2053_v5 = vpack.c.bf16 %v2025_v3, %v2024_v63  ;;  %v7228_v7 = vpop.f32.mrb[44].mxu0 }
 0x708   : > { %v2010_v0 = vadd.f32 %v7228_v7, %v6348_v19  ;;  %v2001_v8 = vpop.f32.mrb[45].mxu0 }
 0x709   : > { %v2002_v9 = vadd.f32 %v6348_v19, %v2001_v8  ;;  %v7229_v11 = vpop.f32.mrb[46].mxu0  ;;  %7254 = vmatprep.mubr.bf16.mxu1 %v2053_v5 }
 0x70a   : > { %v2030_v12 = vmax.f32 %v2010_v0, 0.0  ;;  %v2013_v13 = vadd.f32 %v7229_v11, %v6348_v19  ;;  %v2004_v14 = vpop.f32.mrb[47].mxu0  ;;  %7255 = vmatmul.mubr.bf16.gmra.mrb[40].mxu1 %v2054_v4 }
 0x70b   : > { %v2028_v15 = vmax.f32 %v2002_v9, 0.0  ;;  %v2005_v16 = vadd.f32 %v6348_v19, %v2004_v14  ;;  %v7951_v19 = vld [vmem:[#allocation8 + $0x198] sm:$0xff]  }
 0x70c   : > { %v2031_v10 = vmax.f32 %v2013_v13, 0.0  ;;  %7300 = vmatprep.subr.bf16.mxu1 %v7951_v19 }
 0x70d   : > { %v2029_v17 = vmax.f32 %v2005_v16, 0.0  ;;  %7301 = vmatpush3.bf16.msra.mxu1 %v7951_v19 }
 0x70e   : > { %v2056_v18 = vpack.c.bf16 %v2031_v10, %v2030_v12  ;;  %7302 = vmatprep.subr.bf16.mxu1 %v7952_v30 }
 0x70f   : > { %v2055_v20 = vpack.c.bf16 %v2029_v17, %v2028_v15 }
 0x711   : > { %7258 = vmatprep.mubr.bf16.mxu1 %v2055_v20  ;;  %7303 = vmatpush3.bf16.msra.mxu1 %v7952_v30 }
 0x712   : > { %7259 = vmatmul.mubr.bf16.gmra.mrb[44].mxu1 %v2056_v18  ;;  %7304 = vmatprep.subr.bf16.mxu1 %v7953_v31 }
 0x715   : > { %7305 = vmatpush3.bf16.msra.mxu1 %v7953_v31 }
 0x7cd   : > { %v7248_v35 = vpop.f32.mrb[32].mxu1 }
 0x7ce   : > { %v2156_v36 = vadd.f32 %v7248_v35, %v6357_v32  ;;  %v2147_v38 = vpop.f32.mrb[33].mxu1 }
 0x7cf   : > { %v2148_v39 = vadd.f32 %v6357_v32, %v2147_v38  ;;  %v7249_v40 = vpop.f32.mrb[34].mxu1  ;;  %v7955_v38 = vld [vmem:[#allocation8 + $0x1b8] sm:$0xff]  }
 0x7d0   : > { %v2159_v41 = vadd.f32 %v7249_v40, %v6357_v32  ;;  %v2150_v42 = vpop.f32.mrb[35].mxu1  ;;  %v2212_v44 = vmax.f32 %v2156_v36, 0.0  ;;  %v7954_v36 = vld [vmem:[#allocation8 + $0x1b0] sm:$0xff]   ;;  %v7957_v40 = vld [vmem:[#allocation8 + $0x1c8] sm:$0xff]  }
 0x7d1   : > { %v2151_v43 = vadd.f32 %v6357_v32, %v2150_v42  ;;  %v2210_v47 = vmax.f32 %v2148_v39, 0.0  ;;  %7306 = vmatprep.subr.bf16.mxu1 %v7954_v36  ;;  %v7956_v39 = vld [vmem:[#allocation8 + $0x1c0] sm:$0xff]  }
 0x7d2   : > { %v2213_v45 = vmax.f32 %v2159_v41, 0.0  ;;  %7307 = vmatpush3.bf16.msra.mxu1 %v7954_v36  ;;  %7326 = vmatprep.subr.bf16.mxu0 %v7956_v39  ;;  %v7958_v41 = vld [vmem:[#allocation8 + $0x1d0] sm:$0xff]   ;;  %v7960_v42 = vld [vmem:[#allocation8 + $0x1e0] sm:$0xff]  }
 0x7d3   : > { %v2211_v48 = vmax.f32 %v2151_v43, 0.0  ;;  %7308 = vmatprep.subr.bf16.mxu1 %v7955_v38  ;;  %v7961_v43 = vld [vmem:[#allocation8 + $0x1e8] sm:$0xff]  }
 0x7d4   : > { %v2244_v49 = vpack.c.bf16 %v2213_v45, %v2212_v44  ;;  %v6366_v44 = vld [vmem:[#allocation10 + $0x5] ss:$0 sm:$0xff] }
 0x7d5   : > { %v2243_v50 = vpack.c.bf16 %v2211_v48, %v2210_v47  ;;  %v7252_v51 = vpop.f32.mrb[36].mxu1 }
 0x7d6   : > { %v2172_v52 = vadd.f32 %v7252_v51, %v6357_v32  ;;  %v2163_v46 = vpop.f32.mrb[37].mxu1  ;;  %7309 = vmatpush3.bf16.msra.mxu1 %v7955_v38 }
 0x7d7   : > { %v2164_v53 = vadd.f32 %v6357_v32, %v2163_v46  ;;  %v7253_v54 = vpop.f32.mrb[38].mxu1  ;;  %7278 = vmatprep.mubr.bf16.mxu0 %v2243_v50 }
 0x7d8   : > { %v2175_v56 = vadd.f32 %v7253_v54, %v6357_v32  ;;  %v2166_v57 = vpop.f32.mrb[39].mxu1  ;;  %7279 = vmatmul.mubr.bf16.vlgmr.msra.gmra.mrb[48].mxu0 %v2244_v49  ;;  %v2216_v59 = vmax.f32 %v2172_v52, 0.0 }
 0x7d9   : > { %v2167_v58 = vadd.f32 %v6357_v32, %v2166_v57  ;;  %v2214_v61 = vmax.f32 %v2164_v53, 0.0  ;;  %7327 = vmatpush3.bf16.msra.mxu0 %v7956_v39 }
 0x7da   : > { %v2217_v60 = vmax.f32 %v2175_v56, 0.0  ;;  %7328 = vmatprep.subr.bf16.mxu0 %v7957_v40 }
 0x7db   : > { %v2215_v55 = vmax.f32 %v2167_v58, 0.0 }
 0x7dc   : > { %v2246_v62 = vpack.c.bf16 %v2217_v60, %v2216_v59 }
 0x7dd   : > { %v2245_v63 = vpack.c.bf16 %v2215_v55, %v2214_v61  ;;  %v7256_v1 = vpop.f32.mrb[40].mxu1  ;;  %7329 = vmatpush3.bf16.msra.mxu0 %v7957_v40 }
 0x7de   : > { %v2188_v2 = vadd.f32 %v7256_v1, %v6357_v32  ;;  %v2179_v3 = vpop.f32.mrb[41].mxu1  ;;  %7330 = vmatprep.subr.bf16.mxu0 %v7958_v41 }
 0x7df   : > { %v2180_v4 = vadd.f32 %v6357_v32, %v2179_v3  ;;  %v7257_v5 = vpop.f32.mrb[42].mxu1  ;;  %7282 = vmatprep.mubr.bf16.mxu0 %v2245_v63 }
 0x7e0   : > { %v2191_v7 = vadd.f32 %v7257_v5, %v6357_v32  ;;  %v2182_v0 = vpop.f32.mrb[43].mxu1  ;;  %7283 = vmatmul.mubr.bf16.gmra.mrb[52].mxu0 %v2246_v62  ;;  %v2220_v9 = vmax.f32 %v2188_v2, 0.0 }
 0x7e1   : > { %v2183_v8 = vadd.f32 %v6357_v32, %v2182_v0  ;;  %v2218_v12 = vmax.f32 %v2180_v4, 0.0  ;;  %7331 = vmatpush3.bf16.msra.mxu0 %v7958_v41 }
 0x7e2   : > { %v2221_v11 = vmax.f32 %v2191_v7, 0.0 }
 0x7e3   : > { %v2219_v13 = vmax.f32 %v2183_v8, 0.0 }
 0x7e4   : > { %v2248_v14 = vpack.c.bf16 %v2221_v11, %v2220_v9 }
 0x7e5   : > { %v2247_v15 = vpack.c.bf16 %v2219_v13, %v2218_v12  ;;  %v7260_v16 = vpop.f32.mrb[44].mxu1 }
 0x7e6   : > { %v2204_v10 = vadd.f32 %v7260_v16, %v6357_v32  ;;  %v2195_v17 = vpop.f32.mrb[45].mxu1 }
 0x7e7   : > { %v2196_v18 = vadd.f32 %v6357_v32, %v2195_v17  ;;  %v7261_v20 = vpop.f32.mrb[46].mxu1  ;;  %7286 = vmatprep.mubr.bf16.mxu0 %v2247_v15 }
 0x7e8   : > { %v2224_v23 = vmax.f32 %v2204_v10, 0.0  ;;  %v2207_v24 = vadd.f32 %v7261_v20, %v6357_v32  ;;  %v2198_v25 = vpop.f32.mrb[47].mxu1  ;;  %7287 = vmatmul.mubr.bf16.gmra.mrb[56].mxu0 %v2248_v14 }
 0x7e9   : > { %v2222_v26 = vmax.f32 %v2196_v18, 0.0  ;;  %v2199_v29 = vadd.f32 %v6357_v32, %v2198_v25  ;;  %v7959_v32 = vld [vmem:[#allocation8 + $0x1d8] sm:$0xff]  }
 0x7ea   : > { %v2225_v19 = vmax.f32 %v2207_v24, 0.0  ;;  %7332 = vmatprep.subr.bf16.mxu0 %v7959_v32 }
 0x7eb   : > { %v2223_v30 = vmax.f32 %v2199_v29, 0.0  ;;  %7333 = vmatpush3.bf16.msra.mxu0 %v7959_v32 }
 0x7ec   : > { %v2250_v31 = vpack.c.bf16 %v2225_v19, %v2224_v23  ;;  %7334 = vmatprep.subr.bf16.mxu0 %v7960_v42 }
 0x7ed   : > { %v2249_v35 = vpack.c.bf16 %v2223_v30, %v2222_v26 }
 0x7ef   : > { %7290 = vmatprep.mubr.bf16.mxu0 %v2249_v35  ;;  %7335 = vmatpush3.bf16.msra.mxu0 %v7960_v42 }
 0x7f0   : > { %7291 = vmatmul.mubr.bf16.gmra.mrb[60].mxu0 %v2250_v31  ;;  %7336 = vmatprep.subr.bf16.mxu0 %v7961_v43 }
 0x7f3   : > { %7337 = vmatpush3.bf16.msra.mxu0 %v7961_v43 }
 0x8ab   : > { %v7280_v45 = vpop.f32.mrb[48].mxu0 }
 0x8ac   : > { %v2350_v47 = vadd.f32 %v7280_v45, %v6366_v44  ;;  %v2341_v48 = vpop.f32.mrb[49].mxu0 }
 0x8ad   : > { %v2342_v49 = vadd.f32 %v6366_v44, %v2341_v48  ;;  %v7281_v50 = vpop.f32.mrb[50].mxu0  ;;  %v7963_v48 = vld [vmem:[#allocation8 + $0x1f8] sm:$0xff]  }
 0x8ae   : > { %v2353_v51 = vadd.f32 %v7281_v50, %v6366_v44  ;;  %v2344_v52 = vpop.f32.mrb[51].mxu0  ;;  %v2406_v53 = vmax.f32 %v2350_v47, 0.0  ;;  %v7962_v47 = vld [vmem:[#allocation8 + $0x1f0] sm:$0xff]   ;;  %v7965_v50 = vld [vmem:[#allocation8 + $0x208] sm:$0xff]  }
 0x8af   : > { %v2345_v46 = vadd.f32 %v6366_v44, %v2344_v52  ;;  %v2404_v56 = vmax.f32 %v2342_v49, 0.0  ;;  %7338 = vmatprep.subr.bf16.mxu0 %v7962_v47  ;;  %v7964_v49 = vld [vmem:[#allocation8 + $0x200] sm:$0xff]  }
 0x8b0   : > { %v2407_v54 = vmax.f32 %v2353_v51, 0.0  ;;  %7339 = vmatpush3.bf16.msra.mxu0 %v7962_v47  ;;  %7358 = vmatprep.subr.bf16.mxu1 %v7964_v49  ;;  %v7966_v51 = vld [vmem:[#allocation8 + $0x210] sm:$0xff]   ;;  %v7968_v52 = vld [vmem:[#allocation8 + $0x220] sm:$0xff]  }
 0x8b1   : > { %v2405_v57 = vmax.f32 %v2345_v46, 0.0  ;;  %7340 = vmatprep.subr.bf16.mxu0 %v7963_v48  ;;  %v7969_v46 = vld [vmem:[#allocation8 + $0x228] sm:$0xff]  }
 0x8b2   : > { %v2438_v58 = vpack.c.bf16 %v2407_v54, %v2406_v53  ;;  %v6375_v53 = vld [vmem:[#allocation10 + $0x6] ss:$0 sm:$0xff] }
 0x8b3   : > { %v2437_v59 = vpack.c.bf16 %v2405_v57, %v2404_v56  ;;  %v7284_v60 = vpop.f32.mrb[52].mxu0 }
 0x8b4   : > { %v2366_v61 = vadd.f32 %v7284_v60, %v6366_v44  ;;  %v2357_v55 = vpop.f32.mrb[53].mxu0  ;;  %7341 = vmatpush3.bf16.msra.mxu0 %v7963_v48 }
 0x8b5   : > { %v2358_v62 = vadd.f32 %v6366_v44, %v2357_v55  ;;  %v7285_v63 = vpop.f32.mrb[54].mxu0  ;;  %7310 = vmatprep.mubr.bf16.mxu1 %v2437_v59 }
 0x8b6   : > { %v2369_v1 = vadd.f32 %v7285_v63, %v6366_v44  ;;  %v2360_v2 = vpop.f32.mrb[55].mxu0  ;;  %7311 = vmatmul.mubr.bf16.vlgmr.msra.gmra.mrb[48].mxu1 %v2438_v58  ;;  %v2410_v4 = vmax.f32 %v2366_v61, 0.0 }
 0x8b7   : > { %v2361_v3 = vadd.f32 %v6366_v44, %v2360_v2  ;;  %v2408_v7 = vmax.f32 %v2358_v62, 0.0  ;;  %7359 = vmatpush3.bf16.msra.mxu1 %v7964_v49 }
 0x8b8   : > { %v2411_v5 = vmax.f32 %v2369_v1, 0.0  ;;  %7360 = vmatprep.subr.bf16.mxu1 %v7965_v50 }
 0x8b9   : > { %v2409_v0 = vmax.f32 %v2361_v3, 0.0 }
 0x8ba   : > { %v2440_v8 = vpack.c.bf16 %v2411_v5, %v2410_v4 }
 0x8bb   : > { %v2439_v9 = vpack.c.bf16 %v2409_v0, %v2408_v7  ;;  %v7288_v11 = vpop.f32.mrb[56].mxu0  ;;  %7361 = vmatpush3.bf16.msra.mxu1 %v7965_v50 }
 0x8bc   : > { %v2382_v12 = vadd.f32 %v7288_v11, %v6366_v44  ;;  %v2373_v13 = vpop.f32.mrb[57].mxu0  ;;  %7362 = vmatprep.subr.bf16.mxu1 %v7966_v51 }
 0x8bd   : > { %v2374_v14 = vadd.f32 %v6366_v44, %v2373_v13  ;;  %v7289_v15 = vpop.f32.mrb[58].mxu0  ;;  %7314 = vmatprep.mubr.bf16.mxu1 %v2439_v9 }
 0x8be   : > { %v2385_v16 = vadd.f32 %v7289_v15, %v6366_v44  ;;  %v2376_v10 = vpop.f32.mrb[59].mxu0  ;;  %7315 = vmatmul.mubr.bf16.gmra.mrb[52].mxu1 %v2440_v8  ;;  %v2414_v18 = vmax.f32 %v2382_v12, 0.0 }
 0x8bf   : > { %v2377_v17 = vadd.f32 %v6366_v44, %v2376_v10  ;;  %v2412_v23 = vmax.f32 %v2374_v14, 0.0  ;;  %7363 = vmatpush3.bf16.msra.mxu1 %v7966_v51 }
 0x8c0   : > { %v2415_v20 = vmax.f32 %v2385_v16, 0.0 }
 0x8c1   : > { %v2413_v24 = vmax.f32 %v2377_v17, 0.0 }
 0x8c2   : > { %v2442_v25 = vpack.c.bf16 %v2415_v20, %v2414_v18 }
 0x8c3   : > { %v2441_v26 = vpack.c.bf16 %v2413_v24, %v2412_v23  ;;  %v7292_v29 = vpop.f32.mrb[60].mxu0 }
 0x8c4   : > { %v2398_v19 = vadd.f32 %v7292_v29, %v6366_v44  ;;  %v2389_v30 = vpop.f32.mrb[61].mxu0 }
 0x8c5   : > { %v2390_v31 = vadd.f32 %v6366_v44, %v2389_v30  ;;  %v7293_v35 = vpop.f32.mrb[62].mxu0  ;;  %7318 = vmatprep.mubr.bf16.mxu1 %v2441_v26 }
 0x8c6   : > { %v2418_v36 = vmax.f32 %v2398_v19, 0.0  ;;  %v2401_v38 = vadd.f32 %v7293_v35, %v6366_v44  ;;  %v2392_v39 = vpop.f32.mrb[63].mxu0  ;;  %7319 = vmatmul.mubr.bf16.gmra.mrb[56].mxu1 %v2442_v25 }
 0x8c7   : > { %v2416_v40 = vmax.f32 %v2390_v31, 0.0  ;;  %v2393_v41 = vadd.f32 %v6366_v44, %v2392_v39  ;;  %v7967_v44 = vld [vmem:[#allocation8 + $0x218] sm:$0xff]  }
 0x8c8   : > { %v2419_v32 = vmax.f32 %v2401_v38, 0.0  ;;  %7364 = vmatprep.subr.bf16.mxu1 %v7967_v44 }
 0x8c9   : > { %v2417_v42 = vmax.f32 %v2393_v41, 0.0  ;;  %7365 = vmatpush3.bf16.msra.mxu1 %v7967_v44 }
 0x8ca   : > { %v2444_v43 = vpack.c.bf16 %v2419_v32, %v2418_v36  ;;  %7366 = vmatprep.subr.bf16.mxu1 %v7968_v52 }
 0x8cb   : > { %v2443_v45 = vpack.c.bf16 %v2417_v42, %v2416_v40 }
 0x8cd   : > { %7322 = vmatprep.mubr.bf16.mxu1 %v2443_v45  ;;  %7367 = vmatpush3.bf16.msra.mxu1 %v7968_v52 }
 0x8ce   : > { %7323 = vmatmul.mubr.bf16.gmra.mrb[60].mxu1 %v2444_v43  ;;  %7368 = vmatprep.subr.bf16.mxu1 %v7969_v46 }
 0x8d1   : > { %7369 = vmatpush3.bf16.msra.mxu1 %v7969_v46 }
 0x989   : > { %v7312_v54 = vpop.f32.mrb[48].mxu1 }
 0x98a   : > { %v2544_v56 = vadd.f32 %v7312_v54, %v6375_v53  ;;  %v2535_v57 = vpop.f32.mrb[49].mxu1 }
 0x98b   : > { %v2536_v58 = vadd.f32 %v6375_v53, %v2535_v57  ;;  %v7313_v59 = vpop.f32.mrb[50].mxu1  ;;  %v7971_v57 = vld [vmem:[#allocation8 + $0x238] sm:$0xff]  }
 0x98c   : > { %v2547_v60 = vadd.f32 %v7313_v59, %v6375_v53  ;;  %v2538_v61 = vpop.f32.mrb[51].mxu1  ;;  %v2600_v62 = vmax.f32 %v2544_v56, 0.0  ;;  %v7970_v56 = vld [vmem:[#allocation8 + $0x230] sm:$0xff]   ;;  %v7973_v59 = vld [vmem:[#allocation8 + $0x248] sm:$0xff]  }
 0x98d   : > { %v2539_v55 = vadd.f32 %v6375_v53, %v2538_v61  ;;  %v2598_v1 = vmax.f32 %v2536_v58, 0.0  ;;  %7370 = vmatprep.subr.bf16.mxu1 %v7970_v56  ;;  %v7972_v58 = vld [vmem:[#allocation8 + $0x240] sm:$0xff]  }
 0x98e   : > { %v2601_v63 = vmax.f32 %v2547_v60, 0.0  ;;  %7371 = vmatpush3.bf16.msra.mxu1 %v7970_v56  ;;  %7390 = vmatprep.subr.bf16.mxu0 %v7972_v58  ;;  %v7975_v60 = vld [vmem:[#allocation8 + $0x258] sm:$0xff]   ;;  %v7976_v61 = vld [vmem:[#allocation8 + $0x260] sm:$0xff]  }
 0x98f   : > { %v2599_v2 = vmax.f32 %v2539_v55, 0.0  ;;  %7372 = vmatprep.subr.bf16.mxu1 %v7971_v57  ;;  %v7977_v55 = vld [vmem:[#allocation8 + $0x268] sm:$0xff]  }
 0x990   : > { %v2632_v3 = vpack.c.bf16 %v2601_v63, %v2600_v62  ;;  %v6384_v62 = vld [vmem:[#allocation10 + $0x7] ss:$0 sm:$0xff] }
 0x991   : > { %v2631_v4 = vpack.c.bf16 %v2599_v2, %v2598_v1  ;;  %v7316_v5 = vpop.f32.mrb[52].mxu1 }
 0x992   : > { %v2560_v7 = vadd.f32 %v7316_v5, %v6375_v53  ;;  %v2551_v0 = vpop.f32.mrb[53].mxu1  ;;  %7373 = vmatpush3.bf16.msra.mxu1 %v7971_v57 }
 0x993   : > { %v2552_v8 = vadd.f32 %v6375_v53, %v2551_v0  ;;  %v7317_v9 = vpop.f32.mrb[54].mxu1  ;;  %7342 = vmatprep.mubr.bf16.mxu0 %v2631_v4 }
 0x994   : > { %v2563_v11 = vadd.f32 %v7317_v9, %v6375_v53  ;;  %v2554_v12 = vpop.f32.mrb[55].mxu1  ;;  %7343 = vmatmul.mubr.bf16.vlgmr.msra.gmra.mrb[64].mxu0 %v2632_v3  ;;  %v2604_v14 = vmax.f32 %v2560_v7, 0.0 }
 0x995   : > { %v2555_v13 = vadd.f32 %v6375_v53, %v2554_v12  ;;  %v2602_v16 = vmax.f32 %v2552_v8, 0.0  ;;  %7391 = vmatpush3.bf16.msra.mxu0 %v7972_v58 }
 0x996   : > { %v2605_v15 = vmax.f32 %v2563_v11, 0.0  ;;  %7392 = vmatprep.subr.bf16.mxu0 %v7973_v59 }
 0x997   : > { %v2603_v10 = vmax.f32 %v2555_v13, 0.0 }
 0x998   : > { %v2634_v17 = vpack.c.bf16 %v2605_v15, %v2604_v14 }
 0x999   : > { %v2633_v18 = vpack.c.bf16 %v2603_v10, %v2602_v16  ;;  %v7320_v20 = vpop.f32.mrb[56].mxu1  ;;  %7393 = vmatpush3.bf16.msra.mxu0 %v7973_v59 }
 0x99a   : > { %v2576_v23 = vadd.f32 %v7320_v20, %v6375_v53  ;;  %v2567_v24 = vpop.f32.mrb[57].mxu1 }
 0x99b   : > { %v2568_v25 = vadd.f32 %v6375_v53, %v2567_v24  ;;  %v7321_v26 = vpop.f32.mrb[58].mxu1  ;;  %7346 = vmatprep.mubr.bf16.mxu0 %v2633_v18 }
 0x99c   : > { %v2579_v29 = vadd.f32 %v7321_v26, %v6375_v53  ;;  %v2570_v19 = vpop.f32.mrb[59].mxu1  ;;  %7347 = vmatmul.mubr.bf16.gmra.mrb[68].mxu0 %v2634_v17  ;;  %v2608_v31 = vmax.f32 %v2576_v23, 0.0 }
 0x99d   : > { %v2571_v30 = vadd.f32 %v6375_v53, %v2570_v19  ;;  %v2606_v36 = vmax.f32 %v2568_v25, 0.0 }
 0x99e   : > { %v2609_v35 = vmax.f32 %v2579_v29, 0.0 }
 0x99f   : > { %v2607_v38 = vmax.f32 %v2571_v30, 0.0 }
 0x9a0   : > { %v2636_v39 = vpack.c.bf16 %v2609_v35, %v2608_v31 }
 0x9a1   : > { %v2635_v40 = vpack.c.bf16 %v2607_v38, %v2606_v36  ;;  %v7324_v41 = vpop.f32.mrb[60].mxu1 }
 0x9a2   : > { %v2592_v32 = vadd.f32 %v7324_v41, %v6375_v53  ;;  %v2583_v42 = vpop.f32.mrb[61].mxu1 }
 0x9a3   : > { %v2584_v43 = vadd.f32 %v6375_v53, %v2583_v42  ;;  %v7325_v45 = vpop.f32.mrb[62].mxu1  ;;  %7350 = vmatprep.mubr.bf16.mxu0 %v2635_v40 }
 0x9a4   : > { %v2595_v47 = vadd.f32 %v7325_v45, %v6375_v53  ;;  %v2586_v48 = vpop.f32.mrb[63].mxu1  ;;  %7351 = vmatmul.mubr.bf16.gmra.mrb[72].mxu0 %v2636_v39  ;;  %v2612_v50 = vmax.f32 %v2592_v32, 0.0 }
 0x9a5   : > { %v2587_v49 = vadd.f32 %v6375_v53, %v2586_v48  ;;  %v2610_v44 = vmax.f32 %v2584_v43, 0.0  ;;  %v7974_v53 = vld [vmem:[#allocation8 + $0x250] sm:$0xff]  }
 0x9a6   : > { %v2613_v51 = vmax.f32 %v2595_v47, 0.0  ;;  %7394 = vmatprep.subr.bf16.mxu0 %v7974_v53 }
 0x9a7   : > { %v2611_v52 = vmax.f32 %v2587_v49, 0.0  ;;  %7395 = vmatpush3.bf16.msra.mxu0 %v7974_v53 }
 0x9a8   : > { %v2638_v46 = vpack.c.bf16 %v2613_v51, %v2612_v50  ;;  %7396 = vmatprep.subr.bf16.mxu0 %v7975_v60 }
 0x9a9   : > { %v2637_v54 = vpack.c.bf16 %v2611_v52, %v2610_v44 }
 0x9ab   : > { %7354 = vmatprep.mubr.bf16.mxu0 %v2637_v54  ;;  %7397 = vmatpush3.bf16.msra.mxu0 %v7975_v60 }
 0x9ac   : > { %7355 = vmatmul.mubr.bf16.gmra.mrb[76].mxu0 %v2638_v46  ;;  %7398 = vmatprep.subr.bf16.mxu0 %v7976_v61 }
 0x9af   : > { %7399 = vmatpush3.bf16.msra.mxu0 %v7976_v61 }
 0x9b0   : > { %7400 = vmatprep.subr.bf16.mxu0 %v7977_v55 }
 0x9b3   : > { %7401 = vmatpush3.bf16.msra.mxu0 %v7977_v55 }
 0xa67   : > { %v7344_v63 = vpop.f32.mrb[64].mxu0 }
 0xa68   : > { %v2738_v1 = vadd.f32 %v7344_v63, %v6384_v62  ;;  %v2729_v2 = vpop.f32.mrb[65].mxu0 }
 0xa69   : > { %v2730_v3 = vadd.f32 %v6384_v62, %v2729_v2  ;;  %v7345_v4 = vpop.f32.mrb[66].mxu0  ;;  %v7979_v2 = vld [vmem:[#allocation8 + $0x278] sm:$0xff]  }
 0xa6a   : > { %v2741_v5 = vadd.f32 %v7345_v4, %v6384_v62  ;;  %v2732_v7 = vpop.f32.mrb[67].mxu0  ;;  %v2794_v8 = vmax.f32 %v2738_v1, 0.0  ;;  %v7978_v1 = vld [vmem:[#allocation8 + $0x270] sm:$0xff]   ;;  %v7981_v4 = vld [vmem:[#allocation8 + $0x288] sm:$0xff]  }
 0xa6b   : > { %v2733_v0 = vadd.f32 %v6384_v62, %v2732_v7  ;;  %v2792_v11 = vmax.f32 %v2730_v3, 0.0  ;;  %7402 = vmatprep.subr.bf16.mxu0 %v7978_v1  ;;  %v7980_v3 = vld [vmem:[#allocation8 + $0x280] sm:$0xff]  }
 0xa6c   : > { %v2795_v9 = vmax.f32 %v2741_v5, 0.0  ;;  %7403 = vmatpush3.bf16.msra.mxu0 %v7978_v1  ;;  %7422 = vmatprep.subr.bf16.mxu1 %v7980_v3  ;;  %v7983_v5 = vld [vmem:[#allocation8 + $0x298] sm:$0xff]   ;;  %v7984_v7 = vld [vmem:[#allocation8 + $0x2a0] sm:$0xff]  }
 0xa6d   : > { %v2793_v12 = vmax.f32 %v2733_v0, 0.0  ;;  %7404 = vmatprep.subr.bf16.mxu0 %v7979_v2  ;;  %v7985_v0 = vld [vmem:[#allocation8 + $0x2a8] sm:$0xff]  }
 0xa6e   : > { %v2826_v13 = vpack.c.bf16 %v2795_v9, %v2794_v8  ;;  %v6393_v8 = vld [vmem:[#allocation10 + $0x8] ss:$0 sm:$0xff] }
 0xa6f   : > { %v2825_v14 = vpack.c.bf16 %v2793_v12, %v2792_v11  ;;  %v7348_v15 = vpop.f32.mrb[68].mxu0 }
 0xa70   : > { %v2754_v16 = vadd.f32 %v7348_v15, %v6384_v62  ;;  %v2745_v10 = vpop.f32.mrb[69].mxu0  ;;  %7405 = vmatpush3.bf16.msra.mxu0 %v7979_v2 }
 0xa71   : > { %v2746_v17 = vadd.f32 %v6384_v62, %v2745_v10  ;;  %v7349_v18 = vpop.f32.mrb[70].mxu0  ;;  %7374 = vmatprep.mubr.bf16.mxu1 %v2825_v14 }
 0xa72   : > { %v2757_v20 = vadd.f32 %v7349_v18, %v6384_v62  ;;  %v2748_v23 = vpop.f32.mrb[71].mxu0  ;;  %7375 = vmatmul.mubr.bf16.vlgmr.msra.gmra.mrb[64].mxu1 %v2826_v13  ;;  %v2798_v25 = vmax.f32 %v2754_v16, 0.0 }
 0xa73   : > { %v2749_v24 = vadd.f32 %v6384_v62, %v2748_v23  ;;  %v2796_v29 = vmax.f32 %v2746_v17, 0.0  ;;  %7423 = vmatpush3.bf16.msra.mxu1 %v7980_v3 }
 0xa74   : > { %v2799_v26 = vmax.f32 %v2757_v20, 0.0  ;;  %7424 = vmatprep.subr.bf16.mxu1 %v7981_v4 }
 0xa75   : > { %v2797_v19 = vmax.f32 %v2749_v24, 0.0 }
 0xa76   : > { %v2828_v30 = vpack.c.bf16 %v2799_v26, %v2798_v25 }
 0xa77   : > { %v2827_v31 = vpack.c.bf16 %v2797_v19, %v2796_v29  ;;  %v7352_v35 = vpop.f32.mrb[72].mxu0  ;;  %7425 = vmatpush3.bf16.msra.mxu1 %v7981_v4 }
 0xa78   : > { %v2770_v36 = vadd.f32 %v7352_v35, %v6384_v62  ;;  %v2761_v38 = vpop.f32.mrb[73].mxu0 }
 0xa79   : > { %v2762_v39 = vadd.f32 %v6384_v62, %v2761_v38  ;;  %v7353_v40 = vpop.f32.mrb[74].mxu0  ;;  %7378 = vmatprep.mubr.bf16.mxu1 %v2827_v31 }
 0xa7a   : > { %v2773_v41 = vadd.f32 %v7353_v40, %v6384_v62  ;;  %v2764_v32 = vpop.f32.mrb[75].mxu0  ;;  %7379 = vmatmul.mubr.bf16.gmra.mrb[68].mxu1 %v2828_v30  ;;  %v2802_v43 = vmax.f32 %v2770_v36, 0.0 }
 0xa7b   : > { %v2765_v42 = vadd.f32 %v6384_v62, %v2764_v32  ;;  %v2800_v47 = vmax.f32 %v2762_v39, 0.0 }
 0xa7c   : > { %v2803_v45 = vmax.f32 %v2773_v41, 0.0 }
 0xa7d   : > { %v2801_v48 = vmax.f32 %v2765_v42, 0.0 }
 0xa7e   : > { %v2830_v49 = vpack.c.bf16 %v2803_v45, %v2802_v43 }
 0xa7f   : > { %v2829_v50 = vpack.c.bf16 %v2801_v48, %v2800_v47  ;;  %v7356_v51 = vpop.f32.mrb[76].mxu0 }
 0xa80   : > { %v2786_v44 = vadd.f32 %v7356_v51, %v6384_v62  ;;  %v2777_v52 = vpop.f32.mrb[77].mxu0 }
 0xa81   : > { %v2778_v46 = vadd.f32 %v6384_v62, %v2777_v52  ;;  %v7357_v54 = vpop.f32.mrb[78].mxu0  ;;  %7382 = vmatprep.mubr.bf16.mxu1 %v2829_v50 }
 0xa82   : > { %v2789_v56 = vadd.f32 %v7357_v54, %v6384_v62  ;;  %v2780_v57 = vpop.f32.mrb[79].mxu0  ;;  %7383 = vmatmul.mubr.bf16.gmra.mrb[72].mxu1 %v2830_v49  ;;  %v2806_v59 = vmax.f32 %v2786_v44, 0.0 }
 0xa83   : > { %v2781_v58 = vadd.f32 %v6384_v62, %v2780_v57  ;;  %v2804_v60 = vmax.f32 %v2778_v46, 0.0  ;;  %v7982_v62 = vld [vmem:[#allocation8 + $0x290] sm:$0xff]  }
 0xa84   : > { %v2807_v53 = vmax.f32 %v2789_v56, 0.0  ;;  %7426 = vmatprep.subr.bf16.mxu1 %v7982_v62 }
 0xa85   : > { %v2805_v61 = vmax.f32 %v2781_v58, 0.0  ;;  %7427 = vmatpush3.bf16.msra.mxu1 %v7982_v62 }
 0xa86   : > { %v2832_v55 = vpack.c.bf16 %v2807_v53, %v2806_v59  ;;  %7428 = vmatprep.subr.bf16.mxu1 %v7983_v5 }
 0xa87   : > { %v2831_v63 = vpack.c.bf16 %v2805_v61, %v2804_v60 }
 0xa89   : > { %7386 = vmatprep.mubr.bf16.mxu1 %v2831_v63  ;;  %7429 = vmatpush3.bf16.msra.mxu1 %v7983_v5 }
 0xa8a   : > { %7387 = vmatmul.mubr.bf16.gmra.mrb[76].mxu1 %v2832_v55  ;;  %7430 = vmatprep.subr.bf16.mxu1 %v7984_v7 }
 0xa8d   : > { %7431 = vmatpush3.bf16.msra.mxu1 %v7984_v7 }
 0xa8e   : > { %7432 = vmatprep.subr.bf16.mxu1 %v7985_v0 }
 0xa91   : > { %7433 = vmatpush3.bf16.msra.mxu1 %v7985_v0 }
 0xb45   : > { %v7376_v9 = vpop.f32.mrb[64].mxu1 }
 0xb46   : > { %v2932_v11 = vadd.f32 %v7376_v9, %v6393_v8  ;;  %v2923_v12 = vpop.f32.mrb[65].mxu1 }
 0xb47   : > { %v2924_v13 = vadd.f32 %v6393_v8, %v2923_v12  ;;  %v7377_v14 = vpop.f32.mrb[66].mxu1  ;;  %v7987_v12 = vld [vmem:[#allocation8 + $0x2b8] sm:$0xff]  }
 0xb48   : > { %v2935_v15 = vadd.f32 %v7377_v14, %v6393_v8  ;;  %v2926_v16 = vpop.f32.mrb[67].mxu1  ;;  %v2988_v17 = vmax.f32 %v2932_v11, 0.0  ;;  %v7986_v11 = vld [vmem:[#allocation8 + $0x2b0] sm:$0xff]  }
 0xb49   : > { %v2927_v10 = vadd.f32 %v6393_v8, %v2926_v16  ;;  %v2986_v20 = vmax.f32 %v2924_v13, 0.0  ;;  %7434 = vmatprep.subr.bf16.mxu1 %v7986_v11  ;;  %v7988_v13 = vld [vmem:[#allocation11] sm:$0xff]   ;;  %v7989_v14 = vld [vmem:[#allocation11 + $0x8] sm:$0xff]  }
 0xb4a   : > { %v2989_v18 = vmax.f32 %v2935_v15, 0.0  ;;  %7435 = vmatpush3.bf16.msra.mxu1 %v7986_v11  ;;  %7454 = vmatprep.subr.bf16.mxu0 %v7988_v13  ;;  %v7991_v15 = vld [vmem:[#allocation11 + $0x18] sm:$0xff]   ;;  %v7992_v16 = vld [vmem:[#allocation11 + $0x20] sm:$0xff]  }
 0xb4b   : > { %v2987_v23 = vmax.f32 %v2927_v10, 0.0  ;;  %7436 = vmatprep.subr.bf16.mxu1 %v7987_v12  ;;  %v7993_v10 = vld [vmem:[#allocation11 + $0x28] sm:$0xff]  }
 0xb4c   : > { %v3020_v24 = vpack.c.bf16 %v2989_v18, %v2988_v17  ;;  %v6402_v17 = vld [vmem:[#allocation10 + $0x9] ss:$0 sm:$0xff] }
 0xb4d   : > { %v3019_v25 = vpack.c.bf16 %v2987_v23, %v2986_v20  ;;  %v7380_v26 = vpop.f32.mrb[68].mxu1 }
 0xb4e   : > { %v2948_v29 = vadd.f32 %v7380_v26, %v6393_v8  ;;  %v2939_v19 = vpop.f32.mrb[69].mxu1  ;;  %7437 = vmatpush3.bf16.msra.mxu1 %v7987_v12 }
 0xb4f   : > { %v2940_v30 = vadd.f32 %v6393_v8, %v2939_v19  ;;  %v7381_v31 = vpop.f32.mrb[70].mxu1  ;;  %7406 = vmatprep.mubr.bf16.mxu0 %v3019_v25 }
 0xb50   : > { %v2951_v35 = vadd.f32 %v7381_v31, %v6393_v8  ;;  %v2942_v36 = vpop.f32.mrb[71].mxu1  ;;  %7407 = vmatmul.mubr.bf16.vlgmr.msra.gmra.mrb[80].mxu0 %v3020_v24  ;;  %v2992_v39 = vmax.f32 %v2948_v29, 0.0 }
 0xb51   : > { %v2943_v38 = vadd.f32 %v6393_v8, %v2942_v36  ;;  %v2990_v41 = vmax.f32 %v2940_v30, 0.0  ;;  %7455 = vmatpush3.bf16.msra.mxu0 %v7988_v13 }
 0xb52   : > { %v2993_v40 = vmax.f32 %v2951_v35, 0.0  ;;  %7456 = vmatprep.subr.bf16.mxu0 %v7989_v14 }
 0xb53   : > { %v2991_v32 = vmax.f32 %v2943_v38, 0.0 }
 0xb54   : > { %v3022_v42 = vpack.c.bf16 %v2993_v40, %v2992_v39 }
 0xb55   : > { %v3021_v43 = vpack.c.bf16 %v2991_v32, %v2990_v41  ;;  %v7384_v45 = vpop.f32.mrb[72].mxu1  ;;  %7457 = vmatpush3.bf16.msra.mxu0 %v7989_v14 }
 0xb56   : > { %v2964_v47 = vadd.f32 %v7384_v45, %v6393_v8  ;;  %v2955_v48 = vpop.f32.mrb[73].mxu1 }
 0xb57   : > { %v2956_v49 = vadd.f32 %v6393_v8, %v2955_v48  ;;  %v7385_v50 = vpop.f32.mrb[74].mxu1  ;;  %7410 = vmatprep.mubr.bf16.mxu0 %v3021_v43 }
 0xb58   : > { %v2967_v51 = vadd.f32 %v7385_v50, %v6393_v8  ;;  %v2958_v44 = vpop.f32.mrb[75].mxu1  ;;  %7411 = vmatmul.mubr.bf16.gmra.mrb[84].mxu0 %v3022_v42  ;;  %v2996_v46 = vmax.f32 %v2964_v47, 0.0 }
 0xb59   : > { %v2959_v52 = vadd.f32 %v6393_v8, %v2958_v44  ;;  %v2994_v56 = vmax.f32 %v2956_v49, 0.0 }
 0xb5a   : > { %v2997_v54 = vmax.f32 %v2967_v51, 0.0 }
 0xb5b   : > { %v2995_v57 = vmax.f32 %v2959_v52, 0.0 }
 0xb5c   : > { %v3024_v58 = vpack.c.bf16 %v2997_v54, %v2996_v46 }
 0xb5d   : > { %v3023_v59 = vpack.c.bf16 %v2995_v57, %v2994_v56  ;;  %v7388_v53 = vpop.f32.mrb[76].mxu1 }
 0xb5e   : > { %v2980_v60 = vadd.f32 %v7388_v53, %v6393_v8  ;;  %v2971_v61 = vpop.f32.mrb[77].mxu1 }
 0xb5f   : > { %v2972_v55 = vadd.f32 %v6393_v8, %v2971_v61  ;;  %v7389_v63 = vpop.f32.mrb[78].mxu1  ;;  %7414 = vmatprep.mubr.bf16.mxu0 %v3023_v59 }
 0xb60   : > { %v2983_v1 = vadd.f32 %v7389_v63, %v6393_v8  ;;  %v2974_v2 = vpop.f32.mrb[79].mxu1  ;;  %7415 = vmatmul.mubr.bf16.gmra.mrb[88].mxu0 %v3024_v58  ;;  %v3000_v4 = vmax.f32 %v2980_v60, 0.0 }
 0xb61   : > { %v2975_v3 = vadd.f32 %v6393_v8, %v2974_v2  ;;  %v2998_v5 = vmax.f32 %v2972_v55, 0.0  ;;  %v7990_v8 = vld [vmem:[#allocation11 + $0x10] sm:$0xff]  }
 0xb62   : > { %v3001_v62 = vmax.f32 %v2983_v1, 0.0  ;;  %7458 = vmatprep.subr.bf16.mxu0 %v7990_v8 }
 0xb63   : > { %v2999_v7 = vmax.f32 %v2975_v3, 0.0  ;;  %7459 = vmatpush3.bf16.msra.mxu0 %v7990_v8 }
 0xb64   : > { %v3026_v0 = vpack.c.bf16 %v3001_v62, %v3000_v4  ;;  %7460 = vmatprep.subr.bf16.mxu0 %v7991_v15 }
 0xb65   : > { %v3025_v9 = vpack.c.bf16 %v2999_v7, %v2998_v5 }
 0xb67   : > { %7418 = vmatprep.mubr.bf16.mxu0 %v3025_v9  ;;  %7461 = vmatpush3.bf16.msra.mxu0 %v7991_v15 }
 0xb68   : > { %7419 = vmatmul.mubr.bf16.gmra.mrb[92].mxu0 %v3026_v0  ;;  %7462 = vmatprep.subr.bf16.mxu0 %v7992_v16 }
 0xb6b   : > { %7463 = vmatpush3.bf16.msra.mxu0 %v7992_v16 }
 0xb6c   : > { %7464 = vmatprep.subr.bf16.mxu0 %v7993_v10 }
 0xb6f   : > { %7465 = vmatpush3.bf16.msra.mxu0 %v7993_v10 }
 0xc23   : > { %v7408_v18 = vpop.f32.mrb[80].mxu0 }
 0xc24   : > { %v3126_v20 = vadd.f32 %v7408_v18, %v6402_v17  ;;  %v3117_v23 = vpop.f32.mrb[81].mxu0 }
 0xc25   : > { %v3118_v24 = vadd.f32 %v6402_v17, %v3117_v23  ;;  %v7409_v25 = vpop.f32.mrb[82].mxu0  ;;  %v7995_v23 = vld [vmem:[#allocation11 + $0x38] sm:$0xff]  }
 0xc26   : > { %v3129_v26 = vadd.f32 %v7409_v25, %v6402_v17  ;;  %v3120_v29 = vpop.f32.mrb[83].mxu0  ;;  %v3182_v30 = vmax.f32 %v3126_v20, 0.0  ;;  %v7994_v20 = vld [vmem:[#allocation11 + $0x30] sm:$0xff]  }
 0xc27   : > { %v3121_v19 = vadd.f32 %v6402_v17, %v3120_v29  ;;  %v3180_v35 = vmax.f32 %v3118_v24, 0.0  ;;  %7466 = vmatprep.subr.bf16.mxu0 %v7994_v20  ;;  %v6411_v24 = vld [vmem:[#allocation10 + $0xa] ss:$0 sm:$0xff] }
 0xc28   : > { %v3183_v31 = vmax.f32 %v3129_v26, 0.0  ;;  %7467 = vmatpush3.bf16.msra.mxu0 %v7994_v20 }
 0xc29   : > { %v3181_v36 = vmax.f32 %v3121_v19, 0.0  ;;  %7468 = vmatprep.subr.bf16.mxu0 %v7995_v23 }
 0xc2a   : > { %v3214_v38 = vpack.c.bf16 %v3183_v31, %v3182_v30 }
 0xc2b   : > { %v3213_v39 = vpack.c.bf16 %v3181_v36, %v3180_v35  ;;  %v7412_v40 = vpop.f32.mrb[84].mxu0 }
 0xc2c   : > { %v3142_v41 = vadd.f32 %v7412_v40, %v6402_v17  ;;  %v3133_v32 = vpop.f32.mrb[85].mxu0  ;;  %7469 = vmatpush3.bf16.msra.mxu0 %v7995_v23 }
 0xc2d   : > { %v3134_v42 = vadd.f32 %v6402_v17, %v3133_v32  ;;  %v7413_v43 = vpop.f32.mrb[86].mxu0  ;;  %7438 = vmatprep.mubr.bf16.mxu1 %v3213_v39 }
 0xc2e   : > { %v3145_v45 = vadd.f32 %v7413_v43, %v6402_v17  ;;  %v3136_v47 = vpop.f32.mrb[87].mxu0  ;;  %7439 = vmatmul.mubr.bf16.vlgmr.msra.gmra.mrb[80].mxu1 %v3214_v38  ;;  %v3186_v49 = vmax.f32 %v3142_v41, 0.0 }
 0xc2f   : > { %v3137_v48 = vadd.f32 %v6402_v17, %v3136_v47  ;;  %v3184_v51 = vmax.f32 %v3134_v42, 0.0 }
 0xc30   : > { %v3187_v50 = vmax.f32 %v3145_v45, 0.0 }
 0xc31   : > { %v3185_v44 = vmax.f32 %v3137_v48, 0.0 }
 0xc32   : > { %v3216_v52 = vpack.c.bf16 %v3187_v50, %v3186_v49 }
 0xc33   : > { %v3215_v46 = vpack.c.bf16 %v3185_v44, %v3184_v51  ;;  %v7416_v54 = vpop.f32.mrb[88].mxu0 }
 0xc34   : > { %v3158_v56 = vadd.f32 %v7416_v54, %v6402_v17  ;;  %v3149_v57 = vpop.f32.mrb[89].mxu0 }
 0xc35   : > { %v3150_v58 = vadd.f32 %v6402_v17, %v3149_v57  ;;  %v7417_v59 = vpop.f32.mrb[90].mxu0  ;;  %7442 = vmatprep.mubr.bf16.mxu1 %v3215_v46 }
 0xc36   : > { %v3161_v53 = vadd.f32 %v7417_v59, %v6402_v17  ;;  %v3152_v60 = vpop.f32.mrb[91].mxu0  ;;  %7443 = vmatmul.mubr.bf16.gmra.mrb[84].mxu1 %v3216_v52  ;;  %v3190_v55 = vmax.f32 %v3158_v56, 0.0 }
 0xc37   : > { %v3153_v61 = vadd.f32 %v6402_v17, %v3152_v60  ;;  %v3188_v1 = vmax.f32 %v3150_v58, 0.0 }
 0xc38   : > { %v3191_v63 = vmax.f32 %v3161_v53, 0.0 }
 0xc39   : > { %v3189_v2 = vmax.f32 %v3153_v61, 0.0 }
 0xc3a   : > { %v3218_v3 = vpack.c.bf16 %v3191_v63, %v3190_v55 }
 0xc3b   : > { %v3217_v4 = vpack.c.bf16 %v3189_v2, %v3188_v1  ;;  %v7420_v62 = vpop.f32.mrb[92].mxu0 }
 0xc3c   : > { %v3174_v5 = vadd.f32 %v7420_v62, %v6402_v17  ;;  %v3165_v7 = vpop.f32.mrb[93].mxu0 }
 0xc3d   : > { %v3166_v0 = vadd.f32 %v6402_v17, %v3165_v7  ;;  %v7421_v9 = vpop.f32.mrb[94].mxu0  ;;  %7446 = vmatprep.mubr.bf16.mxu1 %v3217_v4 }
 0xc3e   : > { %v3177_v11 = vadd.f32 %v7421_v9, %v6402_v17  ;;  %v3168_v12 = vpop.f32.mrb[95].mxu0  ;;  %7447 = vmatmul.mubr.bf16.gmra.mrb[88].mxu1 %v3218_v3  ;;  %v3194_v14 = vmax.f32 %v3174_v5, 0.0 }
 0xc3f   : > { %v3169_v13 = vadd.f32 %v6402_v17, %v3168_v12  ;;  %v3192_v15 = vmax.f32 %v3166_v0, 0.0 }
 0xc40   : > { %v3195_v8 = vmax.f32 %v3177_v11, 0.0 }
 0xc41   : > { %v3193_v16 = vmax.f32 %v3169_v13, 0.0 }
 0xc42   : > { %v3220_v10 = vpack.c.bf16 %v3195_v8, %v3194_v14 }
 0xc43   : > { %v3219_v18 = vpack.c.bf16 %v3193_v16, %v3192_v15 }
 0xc45   : > { %7450 = vmatprep.mubr.bf16.mxu1 %v3219_v18 }
 0xc46   : > { %7451 = vmatmul.mubr.bf16.gmra.mrb[92].mxu1 %v3220_v10 }
 0xd01   : > { %v7440_v25 = vpop.f32.mrb[80].mxu1 }
 0xd02   : > { %v3311_v26 = vpop.f32.mrb[81].mxu1  ;;  %v9756_v19 = vadd.f32 %v7440_v25, %v6411_v24 }
 0xd03   : > { %v9754_v29 = vadd.f32 %v6411_v24, %v3311_v26  ;;  %v7441_v17 = vpop.f32.mrb[82].mxu1 }
 0xd04   : > { %v9758_v30 = vadd.f32 %v7441_v17, %v6411_v24  ;;  %v3314_v31 = vpop.f32.mrb[83].mxu1  ;;  %v10817_v40 = vmax.f32 %v9756_v19, 0.0  ;;  %v9837_v17 = vld [vmem:[#allocation13] ss:$0 sm:$0xff] }
 0xd05   : > { %v9760_v35 = vadd.f32 %v6411_v24, %v3314_v31  ;;  %v10816_v38 = vmax.f32 %v9754_v29, 0.0 }
 0xd06   : > { %v10815_v36 = vmax.f32 %v9758_v30, 0.0 }
 0xd07   : > { %v10814_v39 = vmax.f32 %v9760_v35, 0.0 }
 0xd08   : > { %v3407_v42 = vpack.c.bf16 %v10815_v36, %v10817_v40  ;;  %v8282_v40 = vld [vmem:[%s9668_s11 + $0x70] sm:$0xff] }
 0xd09   : > { %v3406_v41 = vpack.c.bf16 %v10814_v39, %v10816_v38  ;;  %v7444_v32 = vpop.f32.mrb[84].mxu1  ;;  %v8281_v38 = vld [vmem:[%s9668_s11 + $0x68] sm:$0xff] }
 0xd0a   : > { %v3327_v43 = vpop.f32.mrb[85].mxu1  ;;  %v9776_v48 = vadd.f32 %v7444_v32, %v6411_v24 }
 0xd0b   : > { %v9774_v45 = vadd.f32 %v6411_v24, %v3327_v43  ;;  %v7445_v47 = vpop.f32.mrb[86].mxu1  ;;  %7470 = vmatprep.mubr.bf16.mxu0 %v3406_v41 }
 0xd0c   : > { %v9778_v49 = vadd.f32 %v7445_v47, %v6411_v24  ;;  %v3330_v50 = vpop.f32.mrb[87].mxu1  ;;  %7471 = vmatmul.mubr.bf16.vlgmr.msra.gmra.mrb[96].mxu0 %v3407_v42  ;;  %v10813_v54 = vmax.f32 %v9776_v48, 0.0 }
 0xd0d   : > { %v9780_v51 = vadd.f32 %v6411_v24, %v3330_v50  ;;  %v10812_v52 = vmax.f32 %v9774_v45, 0.0 }
 0xd0e   : > { %v10811_v44 = vmax.f32 %v9778_v49, 0.0 }
 0xd0f   : > { %v10810_v46 = vmax.f32 %v9780_v51, 0.0 }
 0xd10   : > { %v3409_v58 = vpack.c.bf16 %v10811_v44, %v10813_v54 }
 0xd11   : > { %v3408_v56 = vpack.c.bf16 %v10810_v46, %v10812_v52  ;;  %v7448_v57 = vpop.f32.mrb[88].mxu1 }
 0xd12   : > { %v3343_v59 = vpop.f32.mrb[89].mxu1  ;;  %v9796_v61 = vadd.f32 %v7448_v57, %v6411_v24  ;;  %v8268_v57 = vld [vmem:[%s9668_s11 + $0x10] sm:$0xff] }
 0xd13   : > { %v9794_v53 = vadd.f32 %v6411_v24, %v3343_v59  ;;  %v7449_v60 = vpop.f32.mrb[90].mxu1  ;;  %7474 = vmatprep.mubr.bf16.mxu0 %v3408_v56 }
 0xd14   : > { %v9798_v55 = vadd.f32 %v7449_v60, %v6411_v24  ;;  %v3346_v63 = vpop.f32.mrb[91].mxu1  ;;  %7475 = vmatmul.mubr.bf16.gmra.mrb[100].mxu0 %v3409_v58  ;;  %v10809_v62 = vmax.f32 %v9796_v61, 0.0  ;;  %v8269_v60 = vld [vmem:[%s9668_s11] sm:$0xff] }
 0xd15   : > { %10920 = vst [vmem:[#allocation51_spill] sm:$0xff] %v9794_v53  ;;  %v9800_v1 = vadd.f32 %v6411_v24, %v3346_v63  ;;  %v10808_v3 = vmax.f32 %v9794_v53, 0.0 }
 0xd16   : > { %10921 = vst [vmem:[#allocation52_spill] sm:$0xff] %v9798_v55  ;;  %v10807_v2 = vmax.f32 %v9798_v55, 0.0 }
 0xd17   : > { %10922 = vst [vmem:[#allocation53_spill] sm:$0xff] %v9800_v1  ;;  %v10806_v4 = vmax.f32 %v9800_v1, 0.0 }
 0xd18   : > { %v3411_v0 = vpack.c.bf16 %v10807_v2, %v10809_v62  ;;  %v8278_v62 = vld [vmem:[%s9668_s11 + $0x50] sm:$0xff] }
 0xd19   : > { %v3410_v5 = vpack.c.bf16 %v10806_v4, %v10808_v3  ;;  %v7452_v7 = vpop.f32.mrb[92].mxu1  ;;  %v8277_v3 = vld [vmem:[%s9668_s11 + $0x48] sm:$0xff] }
 0xd1a   : > { %v3359_v9 = vpop.f32.mrb[93].mxu1  ;;  %v9816_v13 = vadd.f32 %v7452_v7, %v6411_v24  ;;  %v8270_v7 = vld [vmem:[%s9668_s11 + $0x18] sm:$0xff] }
 0xd1b   : > { %v9814_v11 = vadd.f32 %v6411_v24, %v3359_v9  ;;  %v7453_v12 = vpop.f32.mrb[94].mxu1  ;;  %7478 = vmatprep.mubr.bf16.mxu0 %v3410_v5 }
 0xd1c   : > { %10924 = vst [vmem:[#allocation55_spill] sm:$0xff] %v9816_v13  ;;  %v9818_v14 = vadd.f32 %v7453_v12, %v6411_v24  ;;  %v3362_v8 = vpop.f32.mrb[95].mxu1  ;;  %7479 = vmatmul.mubr.bf16.gmra.mrb[104].mxu0 %v3411_v0  ;;  %v10805_v20 = vmax.f32 %v9816_v13, 0.0  ;;  %v8271_v12 = vld [vmem:[%s9668_s11 + $0x8] sm:$0xff] }
 0xd1d   : > { %10923 = vst [vmem:[#allocation54_spill] sm:$0xff] %v9814_v11  ;;  %v9820_v15 = vadd.f32 %v6411_v24, %v3362_v8  ;;  %v10804_v10 = vmax.f32 %v9814_v11, 0.0  ;;  %v10818_v24 = vlaneseq }
 0xd1e   : > { %10925 = vst [vmem:[#allocation56_spill] sm:$0xff] %v9818_v14  ;;  %v10803_v16 = vmax.f32 %v9818_v14, 0.0 }
 0xd1f   : > { %10926 = vst [vmem:[#allocation57_spill] sm:$0xff] %v9820_v15  ;;  %v10802_v18 = vmax.f32 %v9820_v15, 0.0  ;;  %v9835_v26 = vand.u32 127, %v10818_v24  ;;  %v7998_v24 = vld [vmem:[#allocation14 + $0x48] sm:$0xff]  }
 0xd20   : > { %v3413_v25 = vpack.c.bf16 %v10803_v16, %v10805_v20  ;;  %v8275_v16 = vld [vmem:[%s9668_s11 + $0x38] sm:$0xff] }
 0xd21   : > { %v3412_v23 = vpack.c.bf16 %v10802_v18, %v10804_v10  ;;  %vm3566_vm0 = vcmp.ge.s32.totalorder %v9835_v26, 38  ;;  %vm3567_vm1 = vcmp.lt.s32.totalorder %v9835_v26, 48  ;;  %vm4422_vm3 = vcmp.ge.s32.totalorder %v9835_v26, 48 }
 0xd22   : > { %vm9847_vm2 = vmand %vm3566_vm0, %vm3567_vm1  ;;  %vm4423_vm4 = vcmp.lt.s32.totalorder %v9835_v26, 58  ;;  %vm5241_vm6 = vcmp.ge.s32.totalorder %v9835_v26, 58  ;;  %vm5242_vm7 = vcmp.lt.s32.totalorder %v9835_v26, 86 }
 0xd23   : > { %7482 = vmatprep.mubr.bf16.mxu0 %v3412_v23  ;;  %vm10223_vm5 = vmand %vm4422_vm3, %vm4423_vm4 }
 0xd24   : > { %7483 = vmatmul.mubr.bf16.gmra.mrb[108].mxu0 %v3413_v25  ;;  %vm10437_vm8 = vmand %vm5241_vm6, %vm5242_vm7 }
 0xd25   : > { %vm10446_vm9 = vmpackc.low %vm10437_vm8, %vm10437_vm8 }
 0xddf   : > { %v7472_v31 = vpop.f32.mrb[96].mxu0 }
 0xde0   : > { %v9842_v41 = vadd.f32 %v7472_v31, %v9837_v17  ;;  %v3503_v32 = vpop.f32.mrb[97].mxu0 }
 0xde1   : > { %v9845_v42 = vadd.f32 %v9837_v17, %v3503_v32  ;;  %v7473_v43 = vpop.f32.mrb[98].mxu0 }
 0xde2   : > { %v9852_v50 = vadd.f32 %v7473_v43, %v9837_v17  ;;  %v3506_v56 = vpop.f32.mrb[99].mxu0  ;;  %v3571_v58 = vadd.f32 %v8268_v57, %v9842_v41 }
 0xde3   : > { %v9857_v59 = vadd.f32 %v9837_v17, %v3506_v56  ;;  %v3569_v63 = vadd.f32 %v8269_v60, %v9845_v42 }
 0xde4   : > { %v9863_v5 = vsel %vm9847_vm2, %v3571_v58, -1e+30  ;;  %v3572_v0 = vadd.f32 %v8270_v7, %v9852_v50  ;;  %v8272_v7 = vld [vmem:[%s9668_s11 + $0x20] sm:$0xff] }
 0xde5   : > { %3605 = vmax.xlane.f32.xlu1 %v9863_v5  ;;  %v9870_v9 = vsel %vm9847_vm2, %v3569_v63, -1e+30  ;;  %v3570_v8 = vadd.f32 %v8271_v12, %v9857_v59 }
 0xde6   : > { %3601 = vmax.xlane.f32.xlu0 %v9870_v9  ;;  %v9877_v31 = vsel %vm9847_vm2, %v3572_v0, -1e+30 }
 0xde7   : > { %v7476_v23 = vpop.f32.mrb[100].mxu0  ;;  %v9888_v57 = vsel %vm9847_vm2, %v3570_v8, -1e+30 }
 0xde8   : > { %v3519_v25 = vpop.f32.mrb[101].mxu0  ;;  %v9880_v32 = vadd.f32 %v7476_v23, %v9837_v17  ;;  %v8273_v23 = vld [vmem:[%s9668_s11 + $0x28] sm:$0xff] }
 0xde9   : > { %v9883_v43 = vadd.f32 %v9837_v17, %v3519_v25  ;;  %3607 = vmax.xlane.f32.xlu1 %v9877_v31  ;;  %v7477_v56 = vpop.f32.mrb[102].mxu0  ;;  %v8274_v25 = vld [vmem:[%s9668_s11 + $0x30] sm:$0xff] }
 0xdea   : > { %v3522_v58 = vpop.f32.mrb[103].mxu0  ;;  %3603 = vmax.xlane.f32.xlu0 %v9888_v57  ;;  %v9892_v60 = vadd.f32 %v7477_v56, %v9837_v17  ;;  %v3575_v18 = vadd.f32 %v8274_v25, %v9880_v32 }
 0xdeb   : > { %v9895_v63 = vadd.f32 %v9837_v17, %v3522_v58  ;;  %v3573_v0 = vadd.f32 %v8272_v7, %v9883_v43 }
 0xdec   : > { %v3576_v7 = vadd.f32 %v8275_v16, %v9892_v60  ;;  %v9923_v20 = vsel %vm9847_vm2, %v3575_v18, -1e+30 }
 0xded   : > { %v9901_v12 = vsel %vm9847_vm2, %v3573_v0, -1e+30  ;;  %v3574_v8 = vadd.f32 %v8273_v23, %v9895_v63 }
 0xdee   : > { %3609 = vmax.xlane.f32.xlu0 %v9901_v12 }
 0xdef   : > { %v7480_v56 = vpop.f32.mrb[104].mxu0  ;;  %v9910_v58 = vsel %vm9847_vm2, %v3574_v8, -1e+30 }
 0xdf0   : > { %v3535_v0 = vpop.f32.mrb[105].mxu0  ;;  %3611 = vmax.xlane.f32.xlu1 %v9910_v58  ;;  %v9916_v23 = vadd.f32 %v7480_v56, %v9837_v17  ;;  %v9934_v56 = vsel %vm9847_vm2, %v3576_v7, -1e+30 }
 0xdf1   : > { %v9919_v25 = vadd.f32 %v9837_v17, %v3535_v0  ;;  %v7481_v10 = vpop.f32.mrb[106].mxu0  ;;  %v8276_v0 = vld [vmem:[%s9668_s11 + $0x40] sm:$0xff] }
 0xdf2   : > { %10929 = vst [vmem:[#allocation58_spill] sm:$0xff] %v9916_v23  ;;  %v3538_v8 = vpop.f32.mrb[107].mxu0  ;;  %3613 = vmax.xlane.f32.xlu0 %v9923_v20  ;;  %v9927_v16 = vadd.f32 %v7481_v10, %v9837_v17 }
 0xdf3   : > { %10930 = vst [vmem:[#allocation59_spill] sm:$0xff] %v9919_v25  ;;  %v9930_v4 = vadd.f32 %v9837_v17, %v3538_v8  ;;  %v3577_v2 = vadd.f32 %v8276_v0, %v9919_v25  ;;  %v3579_v8 = vadd.f32 %v8278_v62, %v9916_v23  ;;  %v8279_v0 = vld [vmem:[%s9668_s11 + $0x58] sm:$0xff]  ;;  %v8025_v23 = vld [vmem:[#allocation20 + $0x14] ss:$8 sps:$4 sm:$0xff]  }
 0xdf4   : > { %10931 = vst [vmem:[#allocation60_spill] sm:$0xff] %v9927_v16  ;;  %3615 = vmax.xlane.f32.xlu1 %v9934_v56  ;;  %v3580_v44 = vadd.f32 %v8279_v0, %v9927_v16 }
 0xdf5   : > { %10932 = vst [vmem:[#allocation61_spill] sm:$0xff] %v9930_v4  ;;  %v9941_v18 = vsel %vm9847_vm2, %v3577_v2, -1e+30  ;;  %v3578_v10 = vadd.f32 %v8277_v3, %v9930_v4  ;;  %v9963_v54 = vsel %vm9847_vm2, %v3579_v8, -1e+30 }
 0xdf6   : > { %3617 = vmax.xlane.f32.xlu0 %v9941_v18 }
 0xdf7   : > { %v7484_v7 = vpop.f32.mrb[108].mxu0  ;;  %v9950_v46 = vsel %vm9847_vm2, %v3578_v10, -1e+30 }
 0xdf8   : > { %v3551_v2 = vpop.f32.mrb[109].mxu0  ;;  %3619 = vmax.xlane.f32.xlu1 %v9950_v46  ;;  %v9956_v3 = vadd.f32 %v7484_v7, %v9837_v17  ;;  %v9974_v7 = vsel %vm9847_vm2, %v3580_v44, -1e+30 }
 0xdf9   : > { %v9959_v62 = vadd.f32 %v9837_v17, %v3551_v2  ;;  %v7485_v52 = vpop.f32.mrb[110].mxu0  ;;  %v8280_v2 = vld [vmem:[%s9668_s11 + $0x60] sm:$0xff] }
 0xdfa   : > { %10933 = vst [vmem:[#allocation62_spill] sm:$0xff] %v9956_v3  ;;  %v3554_v10 = vpop.f32.mrb[111].mxu0  ;;  %3621 = vmax.xlane.f32.xlu0 %v9963_v54  ;;  %v9967_v0 = vadd.f32 %v7485_v52, %v9837_v17 }
 0xdfb   : > { %10934 = vst [vmem:[#allocation63_spill] sm:$0xff] %v9959_v62  ;;  %v9970_v39 = vadd.f32 %v9837_v17, %v3554_v10  ;;  %v3581_v36 = vadd.f32 %v8280_v2, %v9959_v62  ;;  %v3583_v17 = vadd.f32 %v8282_v40, %v9956_v3  ;;  %v8283_v10 = vld [vmem:[%s9668_s11 + $0x78] sm:$0xff]  ;;  %v7996_v40 = vld [vmem:[#allocation14 + $0x40] sm:$0xff]  }
 0xdfc   : > { %10935 = vst [vmem:[#allocation64_spill] sm:$0xff] %v9967_v0  ;;  %3623 = vmax.xlane.f32.xlu1 %v9974_v7  ;;  %v3584_v2 = vadd.f32 %v8283_v10, %v9967_v0  ;;  %6798 = vmatprep.subr.bf16.mxu1 %v7996_v40  ;;  %v7999_v10 = vld [vmem:[#allocation14 + $0x8] sm:$0xff]   ;;  %v8001_v0 = vld [vmem:[#allocation14 + $0x10] sm:$0xff]  }
 0xdfd   : > { %10936 = vst [vmem:[#allocation65_spill] sm:$0xff] %v9970_v39  ;;  %v9981_v8 = vsel %vm9847_vm2, %v3581_v36, -1e+30  ;;  %v3582_v52 = vadd.f32 %v8281_v38, %v9970_v39  ;;  %v9997_v36 = vsel %vm9847_vm2, %v3583_v17, -1e+30  ;;  %v8000_v39 = vld [vmem:[#allocation14 + $0x50] sm:$0xff]  }
 0xdfe   : > { %3625 = vmax.xlane.f32.xlu0 %v9981_v8  ;;  %v10002_v38 = vsel %vm9847_vm2, %v3584_v2, -1e+30  ;;  %v8002_v17 = vld [vmem:[#allocation14 + $0x58] sm:$0xff]  }
 0xdff   : > { %v9990_v44 = vsel %vm9847_vm2, %v3582_v52, -1e+30  ;;  %v7997_v52 = vld [vmem:[#allocation14] sm:$0xff]  }
 0xe00   : > { %3627 = vmax.xlane.f32.xlu1 %v9990_v44  ;;  %6799 = vmatpush3.bf16.msra.mxu1 %v7997_v52 }
 0xe01   : > { %6800 = vmatprep.subr.bf16.mxu1 %v7998_v24 }
 0xe02   : > { %3629 = vmax.xlane.f32.xlu0 %v9997_v36 }
 0xe04   : > { %3631 = vmax.xlane.f32.xlu1 %v10002_v38  ;;  %6801 = vmatpush3.bf16.msra.mxu1 %v7999_v10 }
 0xe05   : > { %6802 = vmatprep.subr.bf16.mxu1 %v8000_v39 }
 0xe08   : > { %6803 = vmatpush3.bf16.msra.mxu1 %v8001_v0 }
 0xe09   : > { %6804 = vmatprep.subr.bf16.mxu1 %v8002_v17 }
 0xe72   : > { %v3606_v15 = vpop.xlane.xlu1 %3605 }
 0xe73   : > { %v3635_v47 = vsub.f32 %v9863_v5, %v3606_v15  ;;  %v3602_v2 = vpop.xlane.xlu0 %3601 }
 0xe74   : > { %v3633_v62 = vsub.f32 %v9870_v9, %v3602_v2 }
 0xe75   : > { %v3653_v11 = vmul.f32 1.442695, %v3635_v47 }
 0xe76   : > { %v3649_v14 = vmul.f32 1.442695, %v3633_v62  ;;  %v3608_v3 = vpop.xlane.xlu1 %3607 }
 0xe77   : > { %v3636_v40 = vsub.f32 %v9877_v31, %v3608_v3  ;;  %v3604_v52 = vpop.xlane.xlu0 %3603 }
 0xe78   : > { %8108 = vpow2.f32 %v3649_v14  ;;  %v3634_v24 = vsub.f32 %v9888_v57, %v3604_v52 }
 0xe79   : > { %8110 = vpow2.f32 %v3653_v11  ;;  %v3655_v39 = vmul.f32 1.442695, %v3636_v40 }
 0xe7a   : > { %v3651_v10 = vmul.f32 1.442695, %v3634_v24 }
 0xe7b   : > { %v3610_v0 = vpop.xlane.xlu0 %3609 }
 0xe7c   : > { %8112 = vpow2.f32 %v3651_v10  ;;  %v3637_v17 = vsub.f32 %v9901_v12, %v3610_v0 }
 0xe7d   : > { %v3612_v15 = vpop.xlane.xlu1 %3611  ;;  %8114 = vpow2.f32 %v3655_v39 }
 0xe7e   : > { %v3657_v5 = vmul.f32 1.442695, %v3637_v17  ;;  %v3638_v9 = vsub.f32 %v9910_v58, %v3612_v15 }
 0xe7f   : > { %v3614_v62 = vpop.xlane.xlu0 %3613 }
 0xe80   : > { %8116 = vpow2.f32 %v3657_v5  ;;  %v3659_v47 = vmul.f32 1.442695, %v3638_v9  ;;  %v3639_v31 = vsub.f32 %v9923_v20, %v3614_v62 }
 0xe81   : > { %v3616_v14 = vpop.xlane.xlu1 %3615 }
 0xe82   : > { %v10012_v3 = vpop.eup %8108  ;;  %v3661_v57 = vmul.f32 1.442695, %v3639_v31  ;;  %v3640_v11 = vsub.f32 %v9934_v56, %v3616_v14  ;;  %8118 = vpow2.f32 %v3659_v47 }
 0xe83   : > { %3681 = vadd.xlane.f32.xlu0 %v10012_v3  ;;  %v3618_v12 = vpop.xlane.xlu0 %3617  ;;  %v10017_v40 = vpop.eup %8110 }
 0xe84   : > { %8120 = vpow2.f32 %v3661_v57  ;;  %v3663_v2 = vmul.f32 1.442695, %v3640_v11  ;;  %v3641_v58 = vsub.f32 %v9941_v18, %v3618_v12 }
 0xe85   : > { %v3620_v52 = vpop.xlane.xlu1 %3619 }
 0xe86   : > { %v10019_v24 = vpop.eup %8112  ;;  %v3665_v20 = vmul.f32 1.442695, %v3641_v58  ;;  %v3642_v10 = vsub.f32 %v9950_v46, %v3620_v52  ;;  %8122 = vpow2.f32 %v3663_v2  ;;  %v8003_v58 = vld [vmem:[#allocation14 + $0x18] sm:$0xff]  }
 0xe87   : > { %3685 = vadd.xlane.f32.xlu0 %v10017_v40  ;;  %3683 = vadd.xlane.f32.xlu1 %v10019_v24  ;;  %v3622_v56 = vpop.xlane.xlu0 %3621  ;;  %v10025_v17 = vpop.eup %8114 }
 0xe88   : > { %8124 = vpow2.f32 %v3665_v20  ;;  %v3667_v39 = vmul.f32 1.442695, %v3642_v10  ;;  %v3643_v0 = vsub.f32 %v9963_v54, %v3622_v56  ;;  %v8004_v20 = vld [vmem:[#allocation14 + $0x60] sm:$0xff]   ;;  %6805 = vmatpush3.bf16.msra.mxu1 %v8003_v58  ;;  %v8013_v58 = vld [vmem:[#allocation17 + $0x8] sm:$0xff]  }
 0xe89   : > { %v3624_v18 = vpop.xlane.xlu1 %3623  ;;  %6806 = vmatprep.subr.bf16.mxu1 %v8004_v20  ;;  %v8015_v20 = vld [vmem:[#allocation17 + $0x18] sm:$0xff]  }
 0xe8a   : > { %v10027_v15 = vpop.eup %8116  ;;  %v3669_v5 = vmul.f32 1.442695, %v3643_v0  ;;  %v3644_v9 = vsub.f32 %v9974_v7, %v3624_v18  ;;  %8126 = vpow2.f32 %v3667_v39  ;;  %v8005_v0 = vld [vmem:[#allocation14 + $0x20] sm:$0xff]  }
 0xe8b   : > { %3687 = vadd.xlane.f32.xlu1 %v10025_v17  ;;  %3689 = vadd.xlane.f32.xlu0 %v10027_v15  ;;  %v3626_v46 = vpop.xlane.xlu0 %3625 }
 0xe8c   : > { %8128 = vpow2.f32 %v3669_v5  ;;  %v3671_v62 = vmul.f32 1.442695, %v3644_v9  ;;  %v3645_v47 = vsub.f32 %v9981_v8, %v3626_v46  ;;  %v10033_v31 = vpop.eup %8118  ;;  %v8006_v5 = vld [vmem:[#allocation14 + $0x68] sm:$0xff]   ;;  %6807 = vmatpush3.bf16.msra.mxu1 %v8005_v0 }
 0xe8d   : > { %v3628_v54 = vpop.xlane.xlu1 %3627  ;;  %6808 = vmatprep.subr.bf16.mxu1 %v8006_v5  ;;  %v8007_v9 = vld [vmem:[#allocation14 + $0x28] sm:$0xff]  }
 0xe8e   : > { %v10035_v14 = vpop.eup %8120  ;;  %v3673_v57 = vmul.f32 1.442695, %v3645_v47  ;;  %v3646_v11 = vsub.f32 %v9990_v44, %v3628_v54  ;;  %8130 = vpow2.f32 %v3671_v62  ;;  %v8008_v62 = vld [vmem:[#allocation14 + $0x70] sm:$0xff]  }
 0xe8f   : > { %3691 = vadd.xlane.f32.xlu1 %v10033_v31  ;;  %3693 = vadd.xlane.f32.xlu0 %v10035_v14  ;;  %v3630_v7 = vpop.xlane.xlu0 %3629  ;;  %v8009_v54 = vld [vmem:[#allocation14 + $0x30] sm:$0xff]  }
 0xe90   : > { %8132 = vpow2.f32 %v3673_v57  ;;  %v3675_v12 = vmul.f32 1.442695, %v3646_v11  ;;  %v3647_v2 = vsub.f32 %v9997_v36, %v3630_v7  ;;  %v10041_v8 = vpop.eup %8122  ;;  %6809 = vmatpush3.bf16.msra.mxu1 %v8007_v9  ;;  %v8010_v11 = vld [vmem:[#allocation14 + $0x78] sm:$0xff]  }
 0xe91   : > { %v3632_v52 = vpop.xlane.xlu1 %3631  ;;  %6810 = vmatprep.subr.bf16.mxu1 %v8008_v62  ;;  %v8011_v7 = vld [vmem:[#allocation14 + $0x38] sm:$0xff]  }
 0xe92   : > { %v10043_v10 = vpop.eup %8124  ;;  %v3677_v56 = vmul.f32 1.442695, %v3647_v2  ;;  %v3648_v44 = vsub.f32 %v10002_v38, %v3632_v52  ;;  %8134 = vpow2.f32 %v3675_v12  ;;  %v8012_v2 = vld [vmem:[#allocation17] sm:$0xff]   ;;  %v8014_v52 = vld [vmem:[#allocation17 + $0x10] sm:$0xff]  }
 0xe93   : > { %3695 = vadd.xlane.f32.xlu1 %v10041_v8  ;;  %3697 = vadd.xlane.f32.xlu0 %v10043_v10 }
 0xe94   : > { %8136 = vpow2.f32 %v3677_v56  ;;  %v3679_v39 = vmul.f32 1.442695, %v3648_v44  ;;  %v10048_v36 = vpop.eup %8126  ;;  %6811 = vmatpush3.bf16.msra.mxu1 %v8009_v54  ;;  %7486 = vmatprep.subr.bf16.mxu0 %v8012_v2 }
 0xe95   : > { %6812 = vmatprep.subr.bf16.mxu1 %v8010_v11  ;;  %7487 = vmatpush3.bf16.msra.mxu0 %v8012_v2 }
 0xe96   : > { %v10050_v18 = vpop.eup %8128  ;;  %8138 = vpow2.f32 %v3679_v39  ;;  %7488 = vmatprep.subr.bf16.mxu0 %v8013_v58 }
 0xe97   : > { %3699 = vadd.xlane.f32.xlu1 %v10048_v36  ;;  %3701 = vadd.xlane.f32.xlu0 %v10050_v18 }
 0xe98   : > { %v10054_v38 = vpop.eup %8130  ;;  %6813 = vmatpush3.bf16.msra.mxu1 %v8011_v7 }
 0xe99   : > { %7489 = vmatpush3.bf16.msra.mxu0 %v8013_v58 }
 0xe9a   : > { %v10056_v46 = vpop.eup %8132  ;;  %7490 = vmatprep.subr.bf16.mxu0 %v8014_v52 }
 0xe9b   : > { %3703 = vadd.xlane.f32.xlu1 %v10054_v38  ;;  %3705 = vadd.xlane.f32.xlu0 %v10056_v46 }
 0xe9c   : > { %v10060_v47 = vpop.eup %8134 }
 0xe9d   : > { %7491 = vmatpush3.bf16.msra.mxu0 %v8014_v52 }
 0xe9e   : > { %v10062_v57 = vpop.eup %8136  ;;  %7492 = vmatprep.subr.bf16.mxu0 %v8015_v20 }
 0xe9f   : > { %3707 = vadd.xlane.f32.xlu1 %v10060_v47  ;;  %3709 = vadd.xlane.f32.xlu0 %v10062_v57 }
 0xea0   : > { %v10066_v12 = vpop.eup %8138 }
 0xea1   : > { %7493 = vmatpush3.bf16.msra.mxu0 %v8015_v20 }
 0xea3   : > { %3711 = vadd.xlane.f32.xlu1 %v10066_v12 }
 0xf10   : > { %v3682_v56 = vpop.xlane.xlu0 %3681 }
 0xf11   : > { %8140 = vrcp.f32 %v3682_v56 }
 0xf14   : > { %v3684_v44 = vpop.xlane.xlu1 %3683  ;;  %v3686_v39 = vpop.xlane.xlu0 %3685 }
 0xf15   : > { %8142 = vrcp.f32 %v3684_v44 }
 0xf16   : > { %8144 = vrcp.f32 %v3686_v39 }
 0xf18   : > { %v3688_v0 = vpop.xlane.xlu1 %3687  ;;  %v3690_v5 = vpop.xlane.xlu0 %3689 }
 0xf19   : > { %8146 = vrcp.f32 %v3688_v0 }
 0xf1a   : > { %8148 = vrcp.f32 %v3690_v5 }
 0xf1b   : > { %v8141_v62 = vpop.eup %8140 }
 0xf1c   : > { %v3692_v9 = vpop.xlane.xlu1 %3691  ;;  %v10070_v7 = vmul.f32 %v8141_v62, %v10012_v3  ;;  %v3694_v52 = vpop.xlane.xlu0 %3693 }
 0xf1d   : > { %8150 = vrcp.f32 %v3692_v9 }
 0xf1f   : > { %v8143_v54 = vpop.eup %8142 }
 0xf20   : > { %v3696_v11 = vpop.xlane.xlu1 %3695  ;;  %v10073_v2 = vmul.f32 %v8143_v54, %v10019_v24  ;;  %v8145_v58 = vpop.eup %8144 }
 0xf21   : > { %8152 = vrcp.f32 %v3696_v11  ;;  %v10081_v44 = vmul.f32 %v8145_v58, %v10017_v40  ;;  %v3698_v40 = vpop.xlane.xlu0 %3697 }
 0xf22   : > { %v10077_v20 = vpack.c.bf16 %v10073_v2, %v10070_v7  ;;  %8154 = vrcp.f32 %v3694_v52 }
 0xf23   : > { %v8147_v56 = vpop.eup %8146 }
 0xf24   : > { %3920 = vmatprep.mubr.bf16.mxu1 %v10077_v20  ;;  %v10084_v39 = vmul.f32 %v8147_v56, %v10025_v17  ;;  %v8149_v3 = vpop.eup %8148  ;;  %v3700_v5 = vpop.xlane.xlu1 %3699 }
 0xf25   : > { %3921 = vmatmul.mubr.bf16.vlgmr.msra.gmra.mrb[96].mxu1 %v9716_v6  ;;  %v10096_v62 = vmul.f32 %v8149_v3, %v10027_v15  ;;  %8156 = vrcp.f32 %v3700_v5  ;;  %v3702_v58 = vpop.xlane.xlu0 %3701 }
 0xf26   : > { %v10089_v24 = vpack.c.bf16 %v10084_v39, %v10081_v44  ;;  %8158 = vrcp.f32 %v3698_v40 }
 0xf27   : > { %v8151_v0 = vpop.eup %8150 }
 0xf28   : > { %3928 = vmatprep.mubr.bf16.mxu1 %v10089_v24  ;;  %v10093_v9 = vmul.f32 %v8151_v0, %v10033_v31  ;;  %v3704_v11 = vpop.xlane.xlu1 %3703 }
 0xf29   : > { %8160 = vrcp.f32 %v3704_v11  ;;  %v3706_v0 = vpop.xlane.xlu0 %3705 }
 0xf2a   : > { %v10100_v6 = vpack.c.bf16 %v10093_v9, %v10096_v62  ;;  %8162 = vrcp.f32 %v3702_v58 }
 0xf2b   : > { %v8153_v17 = vpop.eup %8152 }
 0xf2c   : > { %v8155_v54 = vpop.eup %8154  ;;  %v10105_v31 = vmul.f32 %v8153_v17, %v10041_v8  ;;  %v3708_v3 = vpop.xlane.xlu1 %3707 }
 0xf2d   : > { %3929 = vmatmul.mubr.bf16.gmra.mrb[100].mxu1 %v9723_v21  ;;  %v10108_v15 = vmul.f32 %v8155_v54, %v10035_v14  ;;  %8164 = vrcp.f32 %v3708_v3  ;;  %v3710_v54 = vpop.xlane.xlu0 %3709 }
 0xf2e   : > { %3936 = vmatprep.mubr.bf16.mxu1 %v10100_v6  ;;  %8166 = vrcp.f32 %v3706_v0 }
 0xf2f   : > { %v10112_v52 = vpack.c.bf16 %v10105_v31, %v10108_v15  ;;  %v8157_v56 = vpop.eup %8156 }
 0xf30   : > { %v8159_v21 = vpop.eup %8158  ;;  %v10117_v8 = vmul.f32 %v8157_v56, %v10048_v36  ;;  %v3712_v17 = vpop.xlane.xlu1 %3711 }
 0xf31   : > { %v10120_v14 = vmul.f32 %v8159_v21, %v10043_v10  ;;  %8168 = vrcp.f32 %v3712_v17 }
 0xf32   : > { %8170 = vrcp.f32 %v3710_v54 }
 0xf33   : > { %v10124_v5 = vpack.c.bf16 %v10117_v8, %v10120_v14  ;;  %v8161_v40 = vpop.eup %8160 }
 0xf34   : > { %v10129_v36 = vmul.f32 %v8161_v40, %v10054_v38  ;;  %v8022_v40 = vld [vmem:[#allocation20 + $0x4] ss:$8 sps:$4 sm:$0xff]  }
 0xf35   : > { %3937 = vmatmul.mubr.bf16.gmra.mrb[104].mxu1 %v9725_v22  ;;  %v8163_v22 = vpop.eup %8162 }
 0xf36   : > { %3944 = vmatprep.mubr.bf16.mxu1 %v10112_v52  ;;  %v10132_v10 = vmul.f32 %v8163_v22, %v10050_v18  ;;  %v10166_v22 = vld [vmem:[#allocation16] ss:$0 sm:$0xff] }
 0xf37   : > { %v8165_v58 = vpop.eup %8164 }
 0xf38   : > { %v10136_v11 = vpack.c.bf16 %v10129_v36, %v10132_v10  ;;  %v10141_v56 = vmul.f32 %v8165_v58, %v10060_v47  ;;  %v8017_v47 = vld [vmem:[#allocation17 + $0x28] sm:$0xff]  }
 0xf3d   : > { %3945 = vmatmul.mubr.bf16.gmra.mrb[108].mxu1 %v9733_v27  ;;  %v8167_v27 = vpop.eup %8166 }
 0xf3e   : > { %3952 = vmatprep.mubr.bf16.mxu1 %v10124_v5  ;;  %v10144_v38 = vmul.f32 %v8167_v27, %v10056_v46  ;;  %v8169_v21 = vpop.eup %8168 }
 0xf3f   : > { %v8171_v3 = vpop.eup %8170 }
 0xf40   : > { %v10148_v18 = vpack.c.bf16 %v10141_v56, %v10144_v38  ;;  %v10156_v0 = vmul.f32 %v8171_v3, %v10062_v57  ;;  %v8018_v57 = vld [vmem:[#allocation17 + $0x30] sm:$0xff]  }
 0xf45   : > { %3953 = vmatmul.mubr.bf16.gmra.mrb[112].mxu1 %v9735_v28  ;;  %v10153_v28 = vmul.f32 %v8169_v21, %v10066_v12  ;;  %v8019_v12 = vld [vmem:[#allocation17 + $0x38] sm:$0xff]  }
 0xf46   : > { %3960 = vmatprep.mubr.bf16.mxu1 %v10136_v11 }
 0xf47   : > { %v10160_v46 = vpack.c.bf16 %v10153_v28, %v10156_v0 }
 0xf4d   : > { %3961 = vmatmul.mubr.bf16.gmra.mrb[116].mxu1 %v9743_v33  ;;  %v8016_v33 = vld [vmem:[#allocation17 + $0x20] sm:$0xff]  }
 0xf4e   : > { %3968 = vmatprep.mubr.bf16.mxu1 %v10148_v18  ;;  %7494 = vmatprep.subr.bf16.mxu0 %v8016_v33 }
 0xf4f   : > { %7495 = vmatpush3.bf16.msra.mxu0 %v8016_v33 }
 0xf50   : > { %7496 = vmatprep.subr.bf16.mxu0 %v8017_v47 }
 0xf53   : > { %7497 = vmatpush3.bf16.msra.mxu0 %v8017_v47 }
 0xf54   : > { %7498 = vmatprep.subr.bf16.mxu0 %v8018_v57 }
 0xf55   : > { %3969 = vmatmul.mubr.bf16.gmra.mrb[120].mxu1 %v9745_v34 }
 0xf56   : > { %3976 = vmatprep.mubr.bf16.mxu1 %v10160_v46 }
 0xf57   : > { %7499 = vmatpush3.bf16.msra.mxu0 %v8018_v57 }
 0xf58   : > { %7500 = vmatprep.subr.bf16.mxu0 %v8019_v12 }
 0xf5b   : > { %7501 = vmatpush3.bf16.msra.mxu0 %v8019_v12 }
 0xf5c   : > { %4309 = vmatprep.subr.bf16.mxu0 %v8022_v40 }
 0xf5d   : > { %3977 = vmatmul.mubr.bf16.gmra.mrb[124].mxu1 %v9751_v37 }
 0xf5e   : > { %4696 = vmatprep.mubr.bf16.mxu1 %v10077_v20 }
 0xff8   : > { %v6814_v34 = vpop.f32.mrb[96].mxu1 }
 0xff9   : > { %v6815_v37 = vpop.f32.mrb[97].mxu1 }
 0xffa   : > { %v6816_v17 = vadd.f32 %v6815_v37, %v6814_v34  ;;  %v6817_v54 = vpop.f32.mrb[98].mxu1 }
 0xffb   : > { %v6818_v58 = vpop.f32.mrb[99].mxu1 }
 0xffc   : > { %v3923_v27 = vadd.f32 %v6816_v17, %v10166_v22  ;;  %v6819_v21 = vadd.f32 %v6818_v58, %v6817_v54  ;;  %v8020_v58 = vld [vmem:[#allocation20] ss:$8 sps:$4 sm:$0xff]  }
 0xffe   : > { %v3926_v3 = vadd.f32 %v6819_v21, %v10166_v22  ;;  %v3985_v33 = vmax.f32 %v3923_v27, 0.0 }
0x1000   : > { %v3986_v47 = vmax.f32 %v3926_v3, 0.0  ;;  %v6820_v57 = vpop.f32.mrb[100].mxu1 }
0x1001   : > { %v6821_v13 = vpop.f32.mrb[101].mxu1 }
0x1002   : > { %v6822_v4 = vadd.f32 %v6821_v13, %v6820_v57  ;;  %v6823_v12 = vpop.f32.mrb[102].mxu1  ;;  %v4017_v16 = vpack.c.bf16 %v3986_v47, %v3985_v33 }
0x1003   : > { %v6824_v40 = vpop.f32.mrb[103].mxu1 }
0x1004   : > { %v3931_v1 = vadd.f32 %v6822_v4, %v10166_v22  ;;  %v6825_v25 = vadd.f32 %v6824_v40, %v6823_v12  ;;  %7502 = vmatprep.mubr.bf16.mxu0 %v4017_v16  ;;  %v8023_v4 = vld [vmem:[#allocation20 + $0x10] ss:$8 sps:$4 sm:$0xff]  }
0x1006   : > { %v3934_v34 = vadd.f32 %v6825_v25, %v10166_v22  ;;  %v3987_v37 = vmax.f32 %v3931_v1, 0.0  ;;  %v8028_v25 = vld [vmem:[#allocation20 + $0x24] ss:$8 sps:$4 sm:$0xff]  }
0x1008   : > { %v3988_v55 = vmax.f32 %v3934_v34, 0.0  ;;  %v6826_v17 = vpop.f32.mrb[104].mxu1 }
0x1009   : > { %v6827_v54 = vpop.f32.mrb[105].mxu1 }
0x100a   : > { %v4018_v21 = vpack.c.bf16 %v3988_v55, %v3987_v37  ;;  %v6828_v27 = vadd.f32 %v6827_v54, %v6826_v17  ;;  %v6829_v3 = vpop.f32.mrb[106].mxu1  ;;  %v8026_v55 = vld [vmem:[#allocation20 + $0x20] ss:$8 sps:$4 sm:$0xff]   ;;  %v8031_v17 = vld [vmem:[#allocation20 + $0x34] ss:$8 sps:$4 sm:$0xff]  }
0x100b   : > { %v6830_v53 = vpop.f32.mrb[107].mxu1 }
0x100c   : > { %v3939_v13 = vadd.f32 %v6828_v27, %v10166_v22  ;;  %v6831_v33 = vadd.f32 %v6830_v53, %v6829_v3  ;;  %7503 = vmatmul.mubr.bf16.vlgmr.msra.gmra.mrb[112].mxu0 %v4018_v21  ;;  %v8029_v21 = vld [vmem:[#allocation20 + $0x30] ss:$8 sps:$4 sm:$0xff]   ;;  %v8034_v27 = vld [vmem:[#allocation20 + $0x44] ss:$8 sps:$4 sm:$0xff]  }
0x100d   : > { %4310 = vmatpush1.bf16.msra.mxu0 %v8020_v58 }
0x100e   : > { %v3942_v16 = vadd.f32 %v6831_v33, %v10166_v22  ;;  %4311 = vmatprep.subr.bf16.mxu0 %v8025_v23  ;;  %v3989_v1 = vmax.f32 %v3939_v13, 0.0 }
0x1010   : > { %v3990_v47 = vmax.f32 %v3942_v16, 0.0  ;;  %v6832_v57 = vpop.f32.mrb[108].mxu1  ;;  %v8032_v16 = vld [vmem:[#allocation20 + $0x40] ss:$8 sps:$4 sm:$0xff]  }
0x1011   : > { %v6833_v12 = vpop.f32.mrb[109].mxu1  ;;  %4312 = vmatpush1.bf16.msra.mxu0 %v8023_v4 }
0x1012   : > { %v6834_v40 = vadd.f32 %v6833_v12, %v6832_v57  ;;  %v6835_v34 = vpop.f32.mrb[110].mxu1  ;;  %v4019_v37 = vpack.c.bf16 %v3990_v47, %v3989_v1  ;;  %4313 = vmatprep.subr.bf16.mxu0 %v8028_v25  ;;  %v8037_v57 = vld [vmem:[#allocation20 + $0x54] ss:$8 sps:$4 sm:$0xff]  }
0x1013   : > { %v6836_v54 = vpop.f32.mrb[111].mxu1 }
0x1014   : > { %v3947_v53 = vadd.f32 %v6834_v40, %v10166_v22  ;;  %v6837_v58 = vadd.f32 %v6836_v54, %v6835_v34  ;;  %7506 = vmatprep.mubr.bf16.mxu0 %v4019_v37  ;;  %v8035_v34 = vld [vmem:[#allocation20 + $0x50] ss:$8 sps:$4 sm:$0xff]  }
0x1015   : > { %4314 = vmatpush1.bf16.msra.mxu0 %v8026_v55 }
0x1016   : > { %v3950_v23 = vadd.f32 %v6837_v58, %v10166_v22  ;;  %4315 = vmatprep.subr.bf16.mxu0 %v8031_v17  ;;  %v3991_v3 = vmax.f32 %v3947_v53, 0.0 }
0x1018   : > { %v3992_v13 = vmax.f32 %v3950_v23, 0.0  ;;  %v6838_v33 = vpop.f32.mrb[112].mxu1 }
0x1019   : > { %v6839_v4 = vpop.f32.mrb[113].mxu1  ;;  %4316 = vmatpush1.bf16.msra.mxu0 %v8029_v21 }
0x101a   : > { %v6840_v1 = vadd.f32 %v6839_v4, %v6838_v33  ;;  %v6841_v25 = vpop.f32.mrb[114].mxu1  ;;  %v4020_v47 = vpack.c.bf16 %v3992_v13, %v3991_v3  ;;  %4317 = vmatprep.subr.bf16.mxu0 %v8034_v27 }
0x101b   : > { %v6842_v12 = vpop.f32.mrb[115].mxu1 }
0x101c   : > { %v3955_v40 = vadd.f32 %v6840_v1, %v10166_v22  ;;  %v6843_v55 = vadd.f32 %v6842_v12, %v6841_v25  ;;  %7507 = vmatmul.mubr.bf16.gmra.mrb[116].mxu0 %v4020_v47 }
0x101d   : > { %4318 = vmatpush1.bf16.msra.mxu0 %v8032_v16 }
0x101e   : > { %v3958_v37 = vadd.f32 %v6843_v55, %v10166_v22  ;;  %4319 = vmatprep.subr.bf16.mxu0 %v8037_v57  ;;  %v3993_v17 = vmax.f32 %v3955_v40, 0.0 }
0x1020   : > { %v3994_v54 = vmax.f32 %v3958_v37, 0.0  ;;  %v6844_v53 = vpop.f32.mrb[116].mxu1 }
0x1021   : > { %v6845_v58 = vpop.f32.mrb[117].mxu1  ;;  %4320 = vmatpush1.bf16.msra.mxu0 %v8035_v34 }
0x1022   : > { %v6846_v21 = vadd.f32 %v6845_v58, %v6844_v53  ;;  %v6847_v23 = vpop.f32.mrb[118].mxu1  ;;  %v4021_v3 = vpack.c.bf16 %v3994_v54, %v3993_v17 }
0x1023   : > { %v6848_v27 = vpop.f32.mrb[119].mxu1 }
0x1024   : > { %v3963_v13 = vadd.f32 %v6846_v21, %v10166_v22  ;;  %v6849_v33 = vadd.f32 %v6848_v27, %v6847_v23  ;;  %7510 = vmatprep.mubr.bf16.mxu0 %v4021_v3 }
0x1026   : > { %v3966_v4 = vadd.f32 %v6849_v33, %v10166_v22  ;;  %v3995_v16 = vmax.f32 %v3963_v13, 0.0 }
0x1028   : > { %v3996_v1 = vmax.f32 %v3966_v4, 0.0  ;;  %v6850_v25 = vpop.f32.mrb[120].mxu1 }
0x1029   : > { %v6851_v47 = vpop.f32.mrb[121].mxu1 }
0x102a   : > { %v6852_v57 = vadd.f32 %v6851_v47, %v6850_v25  ;;  %v6853_v12 = vpop.f32.mrb[122].mxu1  ;;  %v4022_v40 = vpack.c.bf16 %v3996_v1, %v3995_v16 }
0x102b   : > { %v6854_v55 = vpop.f32.mrb[123].mxu1 }
0x102c   : > { %v3971_v34 = vadd.f32 %v6852_v57, %v10166_v22  ;;  %v6855_v37 = vadd.f32 %v6854_v55, %v6853_v12  ;;  %7511 = vmatmul.mubr.bf16.gmra.mrb[120].mxu0 %v4022_v40  ;;  %v8040_v57 = vld [vmem:[#allocation20 + $0x64] ss:$8 sps:$4 sm:$0xff]   ;;  %v8038_v12 = vld [vmem:[#allocation20 + $0x60] ss:$8 sps:$4 sm:$0xff]   ;;  %v8043_v40 = vld [vmem:[#allocation20 + $0x74] ss:$8 sps:$4 sm:$0xff]  }
0x102d   : > { %4321 = vmatprep.subr.bf16.mxu0 %v8040_v57  ;;  %v8041_v55 = vld [vmem:[#allocation20 + $0x70] ss:$8 sps:$4 sm:$0xff]  }
0x102e   : > { %v3974_v17 = vadd.f32 %v6855_v37, %v10166_v22  ;;  %v3997_v54 = vmax.f32 %v3971_v34, 0.0  ;;  %4322 = vmatpush1.bf16.msra.mxu0 %v8038_v12  ;;  %v8996_v34 = vmov 0   ;;  %v8044_v37 = vld [vmem:[#allocation23 + $0x40] sm:$0xff]  }
0x102f   : > { %4323 = vmatprep.subr.bf16.mxu0 %v8043_v40  ;;  %6878 = vmatprep.subr.bf16.mxu1 %v8044_v37 }
0x1030   : > { %v3998_v53 = vmax.f32 %v3974_v17, 0.0  ;;  %v6856_v58 = vpop.f32.mrb[124].mxu1  ;;  %v8045_v17 = vld [vmem:[#allocation23] sm:$0xff]  }
0x1031   : > { %v6857_v21 = vpop.f32.mrb[125].mxu1  ;;  %6879 = vmatpush3.bf16.msra.mxu1 %v8045_v17 }
0x1032   : > { %v6858_v23 = vadd.f32 %v6857_v21, %v6856_v58  ;;  %v6859_v3 = vpop.f32.mrb[126].mxu1  ;;  %v4023_v27 = vpack.c.bf16 %v3998_v53, %v3997_v54  ;;  %4324 = vmatpush1.bf16.msra.mxu0 %v8041_v55  ;;  %v8046_v54 = vld [vmem:[#allocation23 + $0x48] sm:$0xff]   ;;  %v8048_v53 = vld [vmem:[#allocation23 + $0x50] sm:$0xff]   ;;  %v8050_v21 = vld [vmem:[#allocation23 + $0x58] sm:$0xff]  }
0x1033   : > { %v6860_v13 = vpop.f32.mrb[127].mxu1  ;;  %6880 = vmatprep.subr.bf16.mxu1 %v8046_v54  ;;  %v8049_v58 = vld [vmem:[#allocation23 + $0x10] sm:$0xff]  }
0x1034   : > { %v3979_v33 = vadd.f32 %v6858_v23, %v10166_v22  ;;  %v6861_v4 = vadd.f32 %v6860_v13, %v6859_v3  ;;  %7514 = vmatprep.mubr.bf16.mxu0 %v4023_v27  ;;  %v8051_v23 = vld [vmem:[#allocation23 + $0x18] sm:$0xff]   ;;  %v8052_v3 = vld [vmem:[#allocation23 + $0x60] sm:$0xff]  }
0x1035   : > { %v8053_v27 = vld [vmem:[#allocation23 + $0x20] sm:$0xff]   ;;  %v6446_v13 = vld [vmem:[#allocation19] ss:$0 sm:$0xff] }
0x1036   : > { %v3982_v16 = vadd.f32 %v6861_v4, %v10166_v22  ;;  %v3999_v1 = vmax.f32 %v3979_v33, 0.0  ;;  %v8047_v22 = vld [vmem:[#allocation23 + $0x8] sm:$0xff]  }
0x1037   : > { %6881 = vmatpush3.bf16.msra.mxu1 %v8047_v22 }
0x1038   : > { %v4000_v25 = vmax.f32 %v3982_v16, 0.0  ;;  %6882 = vmatprep.subr.bf16.mxu1 %v8048_v53 }
0x103a   : > { %v4024_v47 = vpack.c.bf16 %v4000_v25, %v3999_v1 }
0x103b   : > { %6883 = vmatpush3.bf16.msra.mxu1 %v8049_v58 }
0x103c   : > { %7515 = vmatmul.mubr.bf16.gmra.mrb[124].mxu0 %v4024_v47  ;;  %6884 = vmatprep.subr.bf16.mxu1 %v8050_v21 }
0x103d   : > { %4341 = vmatprep.mubr.bf16.mxu0 %v8996_v34 }
0x103f   : > { %6885 = vmatpush3.bf16.msra.mxu1 %v8051_v23 }
0x1040   : > { %6886 = vmatprep.subr.bf16.mxu1 %v8052_v3 }
0x1043   : > { %6887 = vmatpush3.bf16.msra.mxu1 %v8053_v27 }
0x10df   : > { %v7504_v33 = vpop.f32.mrb[112].mxu0 }
0x10e0   : > { %v4123_v4 = vadd.f32 %v7504_v33, %v6446_v13  ;;  %v4114_v16 = vpop.f32.mrb[113].mxu0 }
0x10e1   : > { %v4115_v1 = vadd.f32 %v6446_v13, %v4114_v16  ;;  %v7505_v25 = vpop.f32.mrb[114].mxu0 }
0x10e2   : > { %v4126_v47 = vadd.f32 %v7505_v25, %v6446_v13  ;;  %v4117_v57 = vpop.f32.mrb[115].mxu0  ;;  %v4179_v40 = vmax.f32 %v4123_v4, 0.0 }
0x10e3   : > { %v4118_v12 = vadd.f32 %v6446_v13, %v4117_v57  ;;  %v4177_v37 = vmax.f32 %v4115_v1, 0.0 }
0x10e4   : > { %v4180_v55 = vmax.f32 %v4126_v47, 0.0 }
0x10e5   : > { %v4178_v17 = vmax.f32 %v4118_v12, 0.0 }
0x10e6   : > { %v4210_v54 = vpack.c.bf16 %v4180_v55, %v4179_v40 }
0x10e7   : > { %v4209_v22 = vpack.c.bf16 %v4178_v17, %v4177_v37 }
0x10e9   : > { %4342 = vmatmul.mubr.bf16.vlgmr.msra.gmra.mrb[128].mxu0 %v4209_v22 }
0x10ea   : > { %4351 = vmatprep.mubr.bf16.mxu0 %v8996_v34 }
0x10ef   : > { %v7508_v53 = vpop.f32.mrb[116].mxu0 }
0x10f0   : > { %v4139_v58 = vadd.f32 %v7508_v53, %v6446_v13  ;;  %v4130_v21 = vpop.f32.mrb[117].mxu0 }
0x10f1   : > { %v4131_v23 = vadd.f32 %v6446_v13, %v4130_v21  ;;  %v7509_v3 = vpop.f32.mrb[118].mxu0  ;;  %4352 = vmatmul.mubr.bf16.gmra.mrb[132].mxu0 %v4210_v54 }
0x10f2   : > { %v4142_v27 = vadd.f32 %v7509_v3, %v6446_v13  ;;  %v4133_v33 = vpop.f32.mrb[119].mxu0  ;;  %4361 = vmatprep.mubr.bf16.mxu0 %v8996_v34  ;;  %v4183_v4 = vmax.f32 %v4139_v58, 0.0 }
0x10f3   : > { %v4134_v16 = vadd.f32 %v6446_v13, %v4133_v33  ;;  %v4181_v1 = vmax.f32 %v4131_v23, 0.0 }
0x10f4   : > { %v4184_v25 = vmax.f32 %v4142_v27, 0.0 }
0x10f5   : > { %v4182_v47 = vmax.f32 %v4134_v16, 0.0 }
0x10f6   : > { %v4212_v57 = vpack.c.bf16 %v4184_v25, %v4183_v4 }
0x10f7   : > { %v4211_v12 = vpack.c.bf16 %v4182_v47, %v4181_v1 }
0x10f9   : > { %4362 = vmatmul.mubr.bf16.gmra.mrb[136].mxu0 %v4211_v12 }
0x10fa   : > { %4371 = vmatprep.mubr.bf16.mxu0 %v8996_v34 }
0x10ff   : > { %v7512_v40 = vpop.f32.mrb[120].mxu0 }
0x1100   : > { %v4155_v55 = vadd.f32 %v7512_v40, %v6446_v13  ;;  %v4146_v37 = vpop.f32.mrb[121].mxu0 }
0x1101   : > { %v4147_v17 = vadd.f32 %v6446_v13, %v4146_v37  ;;  %v7513_v22 = vpop.f32.mrb[122].mxu0  ;;  %4372 = vmatmul.mubr.bf16.gmra.mrb[140].mxu0 %v4212_v57 }
0x1102   : > { %v4158_v54 = vadd.f32 %v7513_v22, %v6446_v13  ;;  %v4149_v53 = vpop.f32.mrb[123].mxu0  ;;  %4381 = vmatprep.mubr.bf16.mxu0 %v8996_v34  ;;  %v4187_v58 = vmax.f32 %v4155_v55, 0.0 }
0x1103   : > { %v4150_v21 = vadd.f32 %v6446_v13, %v4149_v53  ;;  %v4185_v23 = vmax.f32 %v4147_v17, 0.0 }
0x1104   : > { %v4188_v3 = vmax.f32 %v4158_v54, 0.0 }
0x1105   : > { %v4186_v27 = vmax.f32 %v4150_v21, 0.0 }
0x1106   : > { %v4214_v33 = vpack.c.bf16 %v4188_v3, %v4187_v58  ;;  %v8054_v58 = vld [vmem:[#allocation23 + $0x68] sm:$0xff]  }
0x1107   : > { %v4213_v16 = vpack.c.bf16 %v4186_v27, %v4185_v23  ;;  %v8055_v3 = vld [vmem:[#allocation23 + $0x28] sm:$0xff]   ;;  %6888 = vmatprep.subr.bf16.mxu1 %v8054_v58  ;;  %v8056_v23 = vld [vmem:[#allocation23 + $0x70] sm:$0xff]  }
0x1108   : > { %6889 = vmatpush3.bf16.msra.mxu1 %v8055_v3  ;;  %v8057_v27 = vld [vmem:[#allocation23 + $0x30] sm:$0xff]  }
0x1109   : > { %4382 = vmatmul.mubr.bf16.gmra.mrb[144].mxu0 %v4213_v16  ;;  %6890 = vmatprep.subr.bf16.mxu1 %v8056_v23  ;;  %v8060_v16 = vld [vmem:[#allocation26] sm:$0xff]  }
0x110a   : > { %4391 = vmatprep.mubr.bf16.mxu0 %v8996_v34  ;;  %7518 = vmatprep.subr.bf16.mxu0 %v8060_v16 }
0x110b   : > { %7519 = vmatpush3.bf16.msra.mxu0 %v8060_v16 }
0x110c   : > { %6891 = vmatpush3.bf16.msra.mxu1 %v8057_v27 }
0x110f   : > { %v7516_v4 = vpop.f32.mrb[124].mxu0 }
0x1110   : > { %v4171_v25 = vadd.f32 %v7516_v4, %v6446_v13  ;;  %v4162_v1 = vpop.f32.mrb[125].mxu0  ;;  %v8061_v4 = vld [vmem:[#allocation26 + $0x8] sm:$0xff]  }
0x1111   : > { %v4163_v47 = vadd.f32 %v6446_v13, %v4162_v1  ;;  %v7517_v12 = vpop.f32.mrb[126].mxu0  ;;  %4392 = vmatmul.mubr.bf16.gmra.mrb[148].mxu0 %v4214_v33  ;;  %v8058_v33 = vld [vmem:[#allocation23 + $0x78] sm:$0xff]   ;;  %7520 = vmatprep.subr.bf16.mxu0 %v8061_v4  ;;  %v8064_v1 = vld [vmem:[#allocation26 + $0x20] sm:$0xff]  }
0x1112   : > { %v4174_v57 = vadd.f32 %v7517_v12, %v6446_v13  ;;  %v4165_v40 = vpop.f32.mrb[127].mxu0  ;;  %4401 = vmatprep.mubr.bf16.mxu0 %v8996_v34  ;;  %v4191_v55 = vmax.f32 %v4171_v25, 0.0  ;;  %6892 = vmatprep.subr.bf16.mxu1 %v8058_v33  ;;  %v8062_v25 = vld [vmem:[#allocation26 + $0x10] sm:$0xff]   ;;  %v10937_v12 = vlaneseq }
0x1113   : > { %v4166_v37 = vadd.f32 %v6446_v13, %v4165_v40  ;;  %v4189_v17 = vmax.f32 %v4163_v47, 0.0  ;;  %v8059_v13 = vld [vmem:[#allocation23 + $0x38] sm:$0xff]   ;;  %7521 = vmatpush3.bf16.msra.mxu0 %v8061_v4  ;;  %v8065_v47 = vld [vmem:[#allocation26 + $0x28] sm:$0xff]  }
0x1114   : > { %v4192_v22 = vmax.f32 %v4174_v57, 0.0  ;;  %6893 = vmatpush3.bf16.msra.mxu1 %v8059_v13  ;;  %7522 = vmatprep.subr.bf16.mxu0 %v8062_v25  ;;  %v4220_v57 = vshrl.u32 %v10937_v12, 7 }
0x1115   : > { %v4190_v54 = vmax.f32 %v4166_v37, 0.0  ;;  %v4217_v37 = vld [vmem:[#allocation22] sm:$0x3] }
0x1116   : > { %v4216_v53 = vpack.c.bf16 %v4192_v22, %v4191_v55  ;;  %v4221_v40 = vsub.s32 0, %v4220_v57  ;;  %v4225_v55 = vsub.s32 1, %v4220_v57 }
0x1117   : > { %v4215_v21 = vpack.c.bf16 %v4190_v54, %v4189_v17  ;;  %7523 = vmatpush3.bf16.msra.mxu0 %v8062_v25 }
0x1118   : > { %v10193_v22 = vrot.slane %v4217_v37, %v4221_v40  ;;  %v10195_v17 = vrot.slane %v4217_v37, %v4225_v55 }
0x1119   : > { %4402 = vmatmul.mubr.bf16.gmra.mrb[152].mxu0 %v4215_v21 }
0x111a   : > { %4411 = vmatprep.mubr.bf16.mxu0 %v8996_v34  ;;  %v8063_v34 = vld [vmem:[#allocation26 + $0x18] sm:$0xff]  }
0x111b   : > { %7524 = vmatprep.subr.bf16.mxu0 %v8063_v34 }
0x111c   : > { %7525 = vmatpush3.bf16.msra.mxu0 %v8063_v34 }
0x111d   : > { %7526 = vmatprep.subr.bf16.mxu0 %v8064_v1 }
0x1120   : > { %7527 = vmatpush3.bf16.msra.mxu0 %v8064_v1 }
0x1121   : > { %4412 = vmatmul.mubr.bf16.gmra.mrb[156].mxu0 %v4216_v53  ;;  %7528 = vmatprep.subr.bf16.mxu0 %v8065_v47 }
0x1124   : > { %7529 = vmatpush3.bf16.msra.mxu0 %v8065_v47 }
0x11bc   : > { %v4343_v54 = vpop.f32.mrb[128].mxu0 }
0x11bd   : > { %v10199_v53 = vadd.f32 %v4343_v54, %v10193_v22  ;;  %v4345_v21 = vpop.f32.mrb[129].mxu0 }
0x11be   : > { %v4346_v58 = vadd.f32 %v4345_v21, %v10195_v17  ;;  %v4347_v3 = vpop.f32.mrb[130].mxu0 }
0x11bf   : > { %v10203_v23 = vadd.f32 %v4347_v3, %v10193_v22  ;;  %v4349_v27 = vpop.f32.mrb[131].mxu0 }
0x11c0   : > { %v4441_v33 = vmul.f32 0.5, %v4346_v58  ;;  %v5964_v13 = vadd.f32 %v4346_v58, %v10070_v7  ;;  %v4350_v16 = vadd.f32 %v4349_v27, %v10195_v17  ;;  %v8068_v58 = vld [vmem:[%s10944_s28] sm:$0xff]  }
0x11c1   : > { %7550 = vmatprep.subr.bf16.mxu1 %v8068_v58 }
0x11c2   : > { %v4457_v4 = vmul.f32 1.442695, %v4441_v33  ;;  %5980 = vst [vmem:[%s10207_s13 + $0x8] sm:$0xff] %v5964_v13  ;;  %v4442_v25 = vmul.f32 0.5, %v4350_v16  ;;  %v5965_v34 = vadd.f32 %v4350_v16, %v10073_v2  ;;  %v8284_v13 = vld [vmem:[%s9668_s11] sm:$0xff] }
0x11c3   : > { %v4425_v16 = vsel %vm10223_vm5, %v8284_v13, 0.0 }
0x11c4   : > { %8172 = vpow2.f32 %v4457_v4  ;;  %v4459_v1 = vmul.f32 1.442695, %v4442_v25  ;;  %5981 = vst [vmem:[%s10207_s13 + $0x18] sm:$0xff] %v5965_v34  ;;  %v4353_v47 = vpop.f32.mrb[132].mxu0 }
0x11c5   : > { %v10213_v12 = vadd.f32 %v4353_v47, %v10193_v22  ;;  %v4355_v7 = vpop.f32.mrb[133].mxu0  ;;  %v8285_v47 = vld [vmem:[%s9668_s11 + $0x8] sm:$0xff] }
0x11c6   : > { %8174 = vpow2.f32 %v4459_v1  ;;  %v4356_v57 = vadd.f32 %v4355_v7, %v10195_v17  ;;  %v4357_v40 = vpop.f32.mrb[134].mxu0  ;;  %v4426_v7 = vsel %vm10223_vm5, %v8285_v47, 0.0 }
0x11c7   : > { %v10219_v2 = vadd.f32 %v4357_v40, %v10193_v22  ;;  %v4359_v37 = vpop.f32.mrb[135].mxu0 }
0x11c8   : > { %v4443_v55 = vmul.f32 0.5, %v4356_v57  ;;  %v5966_v54 = vadd.f32 %v4356_v57, %v10081_v44  ;;  %v4360_v21 = vadd.f32 %v4359_v37, %v10195_v17 }
0x11ca   : > { %v4461_v3 = vmul.f32 1.442695, %v4443_v55  ;;  %5982 = vst [vmem:[%s10207_s13 + $0x28] sm:$0xff] %v5966_v54  ;;  %v4444_v27 = vmul.f32 0.5, %v4360_v21  ;;  %v5967_v33 = vadd.f32 %v4360_v21, %v10084_v39 }
0x11cc   : > { %8176 = vpow2.f32 %v4461_v3  ;;  %v4463_v4 = vmul.f32 1.442695, %v4444_v27  ;;  %5983 = vst [vmem:[%s10207_s13 + $0x38] sm:$0xff] %v5967_v33  ;;  %v4363_v44 = vpop.f32.mrb[136].mxu0 }
0x11cd   : > { %v10234_v25 = vadd.f32 %v4363_v44, %v10193_v22  ;;  %v4365_v34 = vpop.f32.mrb[137].mxu0 }
0x11ce   : > { %v8173_v1 = vpop.eup %8172  ;;  %8178 = vpow2.f32 %v4463_v4  ;;  %v4366_v39 = vadd.f32 %v4365_v34, %v10195_v17  ;;  %v4367_v57 = vpop.f32.mrb[138].mxu0 }
0x11cf   : > { %v4489_v40 = vmul.f32 %v8173_v1, %v4425_v16  ;;  %v10241_v37 = vadd.f32 %v4367_v57, %v10193_v22  ;;  %v4369_v55 = vpop.f32.mrb[139].mxu0  ;;  %v8286_v1 = vld [vmem:[%s9668_s11 + $0x10] sm:$0xff] }
0x11d0   : > { %v8175_v54 = vpop.eup %8174  ;;  %v4445_v21 = vmul.f32 0.5, %v4366_v39  ;;  %v5968_v3 = vadd.f32 %v4366_v39, %v10096_v62  ;;  %v4370_v27 = vadd.f32 %v4369_v55, %v10195_v17  ;;  %v4427_v47 = vsel %vm10223_vm5, %v8286_v1, 0.0 }
0x11d1   : > { %v4490_v33 = vmul.f32 %v8175_v54, %v4426_v7  ;;  %v4505_v16 = vadd.f32 %v4489_v40, %v10199_v53 }
0x11d2   : > { %v4465_v13 = vmul.f32 1.442695, %v4445_v21  ;;  %5984 = vst [vmem:[%s10207_s13 + $0x48] sm:$0xff] %v5968_v3  ;;  %v4446_v4 = vmul.f32 0.5, %v4370_v27  ;;  %v5969_v44 = vadd.f32 %v4370_v27, %v10093_v9  ;;  %v8287_v21 = vld [vmem:[%s9668_s11 + $0x18] sm:$0xff] }
0x11d3   : > { %v4506_v34 = vadd.f32 %v4490_v33, %v10203_v23  ;;  %v4428_v9 = vsel %vm10223_vm5, %v8287_v21, 0.0 }
0x11d4   : > { %8180 = vpow2.f32 %v4465_v13  ;;  %v4467_v57 = vmul.f32 1.442695, %v4446_v4  ;;  %5985 = vst [vmem:[%s10207_s13 + $0x58] sm:$0xff] %v5969_v44  ;;  %v4373_v62 = vpop.f32.mrb[140].mxu0 }
0x11d5   : > { %v10254_v7 = vadd.f32 %v4373_v62, %v10193_v22  ;;  %v4375_v39 = vpop.f32.mrb[141].mxu0  ;;  %v4521_v55 = vpack.c.bf16 %v4506_v34, %v4505_v16 }
0x11d6   : > { %v8177_v54 = vpop.eup %8176  ;;  %8182 = vpow2.f32 %v4467_v57  ;;  %v4376_v40 = vadd.f32 %v4375_v39, %v10195_v17  ;;  %v4377_v3 = vpop.f32.mrb[142].mxu0 }
0x11d7   : > { %v10261_v27 = vadd.f32 %v4377_v3, %v10193_v22  ;;  %v4379_v33 = vpop.f32.mrb[143].mxu0  ;;  %4697 = vmatmul.mubr.bf16.vlgmr.msra.gmra.mrb[128].mxu1 %v4521_v55  ;;  %v4491_v13 = vmul.f32 %v8177_v54, %v4427_v47  ;;  %v8288_v55 = vld [vmem:[%s9668_s11 + $0x20] sm:$0xff] }
0x11d8   : > { %v8179_v4 = vpop.eup %8178  ;;  %v4447_v44 = vmul.f32 0.5, %v4376_v40  ;;  %v5970_v16 = vadd.f32 %v4376_v40, %v10108_v15  ;;  %v4380_v34 = vadd.f32 %v4379_v33, %v10195_v17  ;;  %4704 = vmatprep.mubr.bf16.mxu1 %v10089_v24  ;;  %v4429_v54 = vsel %vm10223_vm5, %v8288_v55, 0.0  ;;  %7551 = vmatpush3.bf16.msra.mxu1 %v8068_v58 }
0x11d9   : > { %v4492_v1 = vmul.f32 %v8179_v4, %v4428_v9  ;;  %v4507_v21 = vadd.f32 %v4491_v13, %v10213_v12 }
0x11da   : > { %v4469_v57 = vmul.f32 1.442695, %v4447_v44  ;;  %5986 = vst [vmem:[%s10207_s13 + $0x68] sm:$0xff] %v5970_v16  ;;  %v4448_v62 = vmul.f32 0.5, %v4380_v34  ;;  %v5971_v39 = vadd.f32 %v4380_v34, %v10105_v31  ;;  %v8289_v44 = vld [vmem:[%s9668_s11 + $0x28] sm:$0xff] }
0x11db   : > { %v4508_v47 = vadd.f32 %v4492_v1, %v10219_v2  ;;  %v4430_v31 = vsel %vm10223_vm5, %v8289_v44, 0.0 }
0x11dc   : > { %8184 = vpow2.f32 %v4469_v57  ;;  %v4471_v15 = vmul.f32 1.442695, %v4448_v62  ;;  %5987 = vst [vmem:[%s10207_s13 + $0x78] sm:$0xff] %v5971_v39  ;;  %v4383_v40 = vpop.f32.mrb[144].mxu0 }
0x11dd   : > { %v10275_v9 = vadd.f32 %v4383_v40, %v10193_v22  ;;  %v4385_v3 = vpop.f32.mrb[145].mxu0  ;;  %v4522_v33 = vpack.c.bf16 %v4508_v47, %v4507_v21 }
0x11de   : > { %v8181_v4 = vpop.eup %8180  ;;  %8186 = vpow2.f32 %v4471_v15  ;;  %v4386_v13 = vadd.f32 %v4385_v3, %v10195_v17  ;;  %v4387_v16 = vpop.f32.mrb[146].mxu0 }
0x11df   : > { %v10282_v34 = vadd.f32 %v4387_v16, %v10193_v22  ;;  %v4389_v1 = vpop.f32.mrb[147].mxu0  ;;  %4705 = vmatmul.mubr.bf16.gmra.mrb[132].mxu1 %v4522_v33  ;;  %v4493_v57 = vmul.f32 %v8181_v4, %v4429_v54  ;;  %v8290_v33 = vld [vmem:[%s9668_s11 + $0x30] sm:$0xff] }
0x11e0   : > { %v8183_v62 = vpop.eup %8182  ;;  %v4449_v39 = vmul.f32 0.5, %v4386_v13  ;;  %v5972_v21 = vadd.f32 %v4386_v13, %v10120_v14  ;;  %v4390_v47 = vadd.f32 %v4389_v1, %v10195_v17  ;;  %4712 = vmatprep.mubr.bf16.mxu1 %v10100_v6  ;;  %v4431_v4 = vsel %vm10223_vm5, %v8290_v33, 0.0 }
0x11e1   : > { %v4494_v55 = vmul.f32 %v8183_v62, %v4430_v31  ;;  %v4509_v44 = vadd.f32 %v4493_v57, %v10234_v25 }
0x11e2   : > { %v4473_v15 = vmul.f32 1.442695, %v4449_v39  ;;  %5988 = vst [vmem:[%s10207_s13 + $0x88] sm:$0xff] %v5972_v21  ;;  %v4450_v40 = vmul.f32 0.5, %v4390_v47  ;;  %v5973_v3 = vadd.f32 %v4390_v47, %v10117_v8  ;;  %v8291_v39 = vld [vmem:[%s9668_s11 + $0x38] sm:$0xff] }
0x11e3   : > { %v4510_v54 = vadd.f32 %v4494_v55, %v10241_v37  ;;  %v4432_v8 = vsel %vm10223_vm5, %v8291_v39, 0.0 }
0x11e4   : > { %8188 = vpow2.f32 %v4473_v15  ;;  %v4475_v14 = vmul.f32 1.442695, %v4450_v40  ;;  %5989 = vst [vmem:[%s10207_s13 + $0x98] sm:$0xff] %v5973_v3  ;;  %v4393_v13 = vpop.f32.mrb[148].mxu0 }
0x11e5   : > { %v10296_v31 = vadd.f32 %v4393_v13, %v10193_v22  ;;  %v4395_v16 = vpop.f32.mrb[149].mxu0  ;;  %v4523_v1 = vpack.c.bf16 %v4510_v54, %v4509_v44 }
0x11e6   : > { %v8185_v62 = vpop.eup %8184  ;;  %8190 = vpow2.f32 %v4475_v14  ;;  %v4396_v57 = vadd.f32 %v4395_v16, %v10195_v17  ;;  %v4397_v21 = vpop.f32.mrb[150].mxu0 }
0x11e7   : > { %v10303_v47 = vadd.f32 %v4397_v21, %v10193_v22  ;;  %v4399_v55 = vpop.f32.mrb[151].mxu0  ;;  %4713 = vmatmul.mubr.bf16.gmra.mrb[136].mxu1 %v4523_v1  ;;  %v4495_v15 = vmul.f32 %v8185_v62, %v4431_v4  ;;  %v8292_v1 = vld [vmem:[%s9668_s11 + $0x40] sm:$0xff] }
0x11e8   : > { %v8187_v40 = vpop.eup %8186  ;;  %v4451_v3 = vmul.f32 0.5, %v4396_v57  ;;  %v5974_v44 = vadd.f32 %v4396_v57, %v10132_v10  ;;  %v4400_v54 = vadd.f32 %v4399_v55, %v10195_v17  ;;  %4720 = vmatprep.mubr.bf16.mxu1 %v10112_v52  ;;  %v4433_v62 = vsel %vm10223_vm5, %v8292_v1, 0.0 }
0x11e9   : > { %v4496_v33 = vmul.f32 %v8187_v40, %v4432_v8  ;;  %v4511_v39 = vadd.f32 %v4495_v15, %v10254_v7 }
0x11ea   : > { %v4477_v14 = vmul.f32 1.442695, %v4451_v3  ;;  %5990 = vst [vmem:[%s10207_s13 + $0xa8] sm:$0xff] %v5974_v44  ;;  %v4452_v13 = vmul.f32 0.5, %v4400_v54  ;;  %v5975_v16 = vadd.f32 %v4400_v54, %v10129_v36  ;;  %v8293_v3 = vld [vmem:[%s9668_s11 + $0x48] sm:$0xff] }
0x11eb   : > { %v4512_v4 = vadd.f32 %v4496_v33, %v10261_v27  ;;  %v4434_v36 = vsel %vm10223_vm5, %v8293_v3, 0.0 }
0x11ec   : > { %8192 = vpow2.f32 %v4477_v14  ;;  %v4479_v10 = vmul.f32 1.442695, %v4452_v13  ;;  %5991 = vst [vmem:[%s10207_s13 + $0xb8] sm:$0xff] %v5975_v16  ;;  %v4403_v57 = vpop.f32.mrb[152].mxu0 }
0x11ed   : > { %v10317_v8 = vadd.f32 %v4403_v57, %v10193_v22  ;;  %v4405_v21 = vpop.f32.mrb[153].mxu0  ;;  %v4524_v55 = vpack.c.bf16 %v4512_v4, %v4511_v39 }
0x11ee   : > { %v8189_v40 = vpop.eup %8188  ;;  %8194 = vpow2.f32 %v4479_v10  ;;  %v4406_v15 = vadd.f32 %v4405_v21, %v10195_v17  ;;  %v4407_v44 = vpop.f32.mrb[154].mxu0 }
0x11ef   : > { %10940 = vst [vmem:[#allocation66_spill] sm:$0xff] %v10317_v8  ;;  %v10324_v54 = vadd.f32 %v4407_v44, %v10193_v22  ;;  %v4409_v33 = vpop.f32.mrb[155].mxu0  ;;  %4721 = vmatmul.mubr.bf16.gmra.mrb[140].mxu1 %v4524_v55  ;;  %v4497_v14 = vmul.f32 %v8189_v40, %v4433_v62  ;;  %v8294_v55 = vld [vmem:[%s9668_s11 + $0x50] sm:$0xff] }
0x11f0   : > { %v8191_v13 = vpop.eup %8190  ;;  %v4453_v16 = vmul.f32 0.5, %v4406_v15  ;;  %v5976_v39 = vadd.f32 %v4406_v15, %v10144_v38  ;;  %v4410_v4 = vadd.f32 %v4409_v33, %v10195_v17  ;;  %4728 = vmatprep.mubr.bf16.mxu1 %v10124_v5  ;;  %v4435_v40 = vsel %vm10223_vm5, %v8294_v55, 0.0 }
0x11f1   : > { %10941 = vst [vmem:[#allocation67_spill] sm:$0xff] %v10324_v54  ;;  %v4498_v1 = vmul.f32 %v8191_v13, %v4434_v36  ;;  %v4513_v3 = vadd.f32 %v4497_v14, %v10275_v9 }
0x11f2   : > { %v4481_v10 = vmul.f32 1.442695, %v4453_v16  ;;  %5992 = vst [vmem:[%s10207_s13 + $0xc8] sm:$0xff] %v5976_v39  ;;  %v4454_v57 = vmul.f32 0.5, %v4410_v4  ;;  %v5977_v21 = vadd.f32 %v4410_v4, %v10141_v56  ;;  %v8295_v16 = vld [vmem:[%s9668_s11 + $0x58] sm:$0xff] }
0x11f3   : > { %v4514_v62 = vadd.f32 %v4498_v1, %v10282_v34  ;;  %v4436_v56 = vsel %vm10223_vm5, %v8295_v16, 0.0 }
0x11f4   : > { %8196 = vpow2.f32 %v4481_v10  ;;  %v4483_v38 = vmul.f32 1.442695, %v4454_v57  ;;  %5993 = vst [vmem:[%s10207_s13 + $0xd8] sm:$0xff] %v5977_v21  ;;  %v4413_v15 = vpop.f32.mrb[156].mxu0 }
0x11f5   : > { %v10338_v36 = vadd.f32 %v4413_v15, %v10193_v22  ;;  %v4415_v44 = vpop.f32.mrb[157].mxu0  ;;  %v4525_v33 = vpack.c.bf16 %v4514_v62, %v4513_v3 }
0x11f6   : > { %v8193_v13 = vpop.eup %8192  ;;  %8198 = vpow2.f32 %v4483_v38  ;;  %v4416_v14 = vadd.f32 %v4415_v44, %v10195_v17  ;;  %v4417_v39 = vpop.f32.mrb[158].mxu0 }
0x11f7   : > { %10942 = vst [vmem:[#allocation68_spill] sm:$0xff] %v10338_v36  ;;  %v10345_v4 = vadd.f32 %v4417_v39, %v10193_v22  ;;  %v4419_v1 = vpop.f32.mrb[159].mxu0  ;;  %4729 = vmatmul.mubr.bf16.gmra.mrb[144].mxu1 %v4525_v33  ;;  %v4499_v10 = vmul.f32 %v8193_v13, %v4435_v40  ;;  %v8296_v33 = vld [vmem:[%s9668_s11 + $0x60] sm:$0xff] }
0x11f8   : > { %v8195_v57 = vpop.eup %8194  ;;  %v4455_v21 = vmul.f32 0.5, %v4416_v14  ;;  %v5978_v3 = vadd.f32 %v4416_v14, %v10156_v0  ;;  %v4420_v62 = vadd.f32 %v4419_v1, %v10195_v17  ;;  %4736 = vmatprep.mubr.bf16.mxu1 %v10136_v11  ;;  %v4437_v13 = vsel %vm10223_vm5, %v8296_v33, 0.0 }
0x11f9   : > { %10943 = vst [vmem:[#allocation69_spill] sm:$0xff] %v10345_v4  ;;  %v4500_v55 = vmul.f32 %v8195_v57, %v4436_v56  ;;  %v4515_v44 = vadd.f32 %v4499_v10, %v10296_v31  ;;  %v8297_v56 = vld [vmem:[%s9668_s11 + $0x68] sm:$0xff] }
0x11fa   : > { %v4485_v38 = vmul.f32 1.442695, %v4455_v21  ;;  %5994 = vst [vmem:[%s10207_s13 + $0xe8] sm:$0xff] %v5978_v3  ;;  %v4456_v15 = vmul.f32 0.5, %v4420_v62  ;;  %v5979_v22 = vadd.f32 %v4420_v62, %v10153_v28  ;;  %v4438_v14 = vsel %vm10223_vm5, %v8297_v56, 0.0  ;;  %v8298_v21 = vld [vmem:[%s9668_s11 + $0x70] sm:$0xff] }
0x11fb   : > { %v4516_v40 = vadd.f32 %v4500_v55, %v10303_v47  ;;  %v4439_v3 = vsel %vm10223_vm5, %v8298_v21, 0.0  ;;  %v8069_v56 = vld [vmem:[%s10944_s28 + $0x8] sm:$0xff]   ;;  %v10394_v21 = vld [vmem:[#allocation25] ss:$0 sm:$0xff] }
0x11fc   : > { %8200 = vpow2.f32 %v4485_v38  ;;  %v4487_v0 = vmul.f32 1.442695, %v4456_v15  ;;  %5995 = vst [vmem:[%s10207_s13 + $0xf8] sm:$0xff] %v5979_v22  ;;  %v8299_v38 = vld [vmem:[%s9668_s11 + $0x78] sm:$0xff]  ;;  %7552 = vmatprep.subr.bf16.mxu1 %v8069_v56  ;;  %s10945_s11 = sld [smem:[#allocation89_spill]] }
0x11fd   : > { %v4526_v17 = vpack.c.bf16 %v4516_v40, %v4515_v44  ;;  %v4440_v15 = vsel %vm10223_vm5, %v8299_v38, 0.0  ;;  %7553 = vmatpush3.bf16.msra.mxu1 %v8069_v56 }
0x11fe   : > { %v8197_v16 = vpop.eup %8196  ;;  %8202 = vpow2.f32 %v4487_v0 }
0x11ff   : > { %4737 = vmatmul.mubr.bf16.gmra.mrb[148].mxu1 %v4526_v17  ;;  %v4501_v28 = vmul.f32 %v8197_v16, %v4437_v13  ;;  %v8066_v17 = vld [vmem:[#allocation26 + $0x30] sm:$0xff]   ;;  %v8067_v16 = vld [vmem:[#allocation26 + $0x38] sm:$0xff]  }
0x1200   : > { %v8199_v39 = vpop.eup %8198  ;;  %4744 = vmatprep.mubr.bf16.mxu1 %v10148_v18  ;;  %7530 = vmatprep.subr.bf16.mxu0 %v8066_v17 }
0x1201   : > { %v4502_v1 = vmul.f32 %v8199_v39, %v4438_v14  ;;  %v4517_v10 = vadd.f32 %v4501_v28, %v10317_v8  ;;  %7531 = vmatpush3.bf16.msra.mxu0 %v8066_v17  ;;  %v8070_v14 = vld [vmem:[%s10944_s28 + $0x10] sm:$0xff]   ;;  %v8071_v28 = vld [vmem:[%s10944_s28 + $0x18] sm:$0xff]   ;;  %v8072_v39 = vld [vmem:[%s10944_s28 + $0x20] sm:$0xff]  }
0x1202   : > { %7532 = vmatprep.subr.bf16.mxu0 %v8067_v16  ;;  %7554 = vmatprep.subr.bf16.mxu1 %v8070_v14 }
0x1203   : > { %v4518_v57 = vadd.f32 %v4502_v1, %v10324_v54  ;;  %7555 = vmatpush3.bf16.msra.mxu1 %v8070_v14  ;;  %v8073_v1 = vld [vmem:[%s10944_s28 + $0x28] sm:$0xff]  }
0x1204   : > { %7556 = vmatprep.subr.bf16.mxu1 %v8071_v28 }
0x1205   : > { %v4527_v62 = vpack.c.bf16 %v4518_v57, %v4517_v10  ;;  %7533 = vmatpush3.bf16.msra.mxu0 %v8067_v16  ;;  %v8074_v10 = vld [vmem:[%s10944_s28 + $0x30] sm:$0xff]  }
0x1206   : > { %v8201_v55 = vpop.eup %8200 }
0x1207   : > { %4745 = vmatmul.mubr.bf16.gmra.mrb[152].mxu1 %v4527_v62  ;;  %v4503_v22 = vmul.f32 %v8201_v55, %v4439_v3 }
0x1208   : > { %v8203_v44 = vpop.eup %8202  ;;  %4752 = vmatprep.mubr.bf16.mxu1 %v10160_v46  ;;  %7557 = vmatpush3.bf16.msra.mxu1 %v8071_v28 }
0x1209   : > { %v4504_v40 = vmul.f32 %v8203_v44, %v4440_v15  ;;  %v4519_v33 = vadd.f32 %v4503_v22, %v10338_v36  ;;  %7558 = vmatprep.subr.bf16.mxu1 %v8072_v39 }
0x120b   : > { %v4520_v13 = vadd.f32 %v4504_v40, %v10345_v4 }
0x120c   : > { %7559 = vmatpush3.bf16.msra.mxu1 %v8072_v39 }
0x120d   : > { %v4528_v0 = vpack.c.bf16 %v4520_v13, %v4519_v33  ;;  %7560 = vmatprep.subr.bf16.mxu1 %v8073_v1 }
0x120f   : > { %4753 = vmatmul.mubr.bf16.gmra.mrb[156].mxu1 %v4528_v0 }
0x1210   : > { %7561 = vmatpush3.bf16.msra.mxu1 %v8073_v1 }
0x1211   : > { %7562 = vmatprep.subr.bf16.mxu1 %v8074_v10 }
0x1214   : > { %7563 = vmatpush3.bf16.msra.mxu1 %v8074_v10 }
0x12aa   : > { %v6894_v57 = vpop.f32.mrb[128].mxu1 }
0x12ab   : > { %v6895_v3 = vpop.f32.mrb[129].mxu1 }
0x12ac   : > { %v6896_v62 = vadd.f32 %v6895_v3, %v6894_v57  ;;  %v6897_v55 = vpop.f32.mrb[130].mxu1 }
0x12ad   : > { %v6898_v38 = vpop.f32.mrb[131].mxu1 }
0x12ae   : > { %v4699_v15 = vadd.f32 %v6896_v62, %v10394_v21  ;;  %v6899_v22 = vadd.f32 %v6898_v38, %v6897_v55 }
0x12b0   : > { %v4702_v44 = vadd.f32 %v6899_v22, %v10394_v21  ;;  %v4761_v40 = vmax.f32 %v4699_v15, 0.0 }
0x12b2   : > { %v4762_v33 = vmax.f32 %v4702_v44, 0.0  ;;  %v6900_v13 = vpop.f32.mrb[132].mxu1 }
0x12b3   : > { %v6901_v0 = vpop.f32.mrb[133].mxu1 }
0x12b4   : > { %v6902_v17 = vadd.f32 %v6901_v0, %v6900_v13  ;;  %v6903_v16 = vpop.f32.mrb[134].mxu1  ;;  %v4793_v58 = vpack.c.bf16 %v4762_v33, %v4761_v40 }
0x12b5   : > { %v6904_v56 = vpop.f32.mrb[135].mxu1 }
0x12b6   : > { %v4707_v14 = vadd.f32 %v6902_v17, %v10394_v21  ;;  %v6905_v28 = vadd.f32 %v6904_v56, %v6903_v16  ;;  %7534 = vmatprep.mubr.bf16.mxu0 %v4793_v58 }
0x12b8   : > { %v4710_v39 = vadd.f32 %v6905_v28, %v10394_v21  ;;  %v4763_v1 = vmax.f32 %v4707_v14, 0.0 }
0x12ba   : > { %v4764_v10 = vmax.f32 %v4710_v39, 0.0  ;;  %v6906_v57 = vpop.f32.mrb[136].mxu1 }
0x12bb   : > { %v6907_v3 = vpop.f32.mrb[137].mxu1 }
0x12bc   : > { %v4794_v62 = vpack.c.bf16 %v4764_v10, %v4763_v1  ;;  %v6908_v55 = vadd.f32 %v6907_v3, %v6906_v57  ;;  %v6909_v38 = vpop.f32.mrb[138].mxu1 }
0x12bd   : > { %v6910_v15 = vpop.f32.mrb[139].mxu1 }
0x12be   : > { %v4715_v22 = vadd.f32 %v6908_v55, %v10394_v21  ;;  %v6911_v44 = vadd.f32 %v6910_v15, %v6909_v38  ;;  %7535 = vmatmul.mubr.bf16.vlgmr.msra.gmra.mrb[160].mxu0 %v4794_v62 }
0x12c0   : > { %v4718_v40 = vadd.f32 %v6911_v44, %v10394_v21  ;;  %v4765_v33 = vmax.f32 %v4715_v22, 0.0 }
0x12c2   : > { %v4766_v13 = vmax.f32 %v4718_v40, 0.0  ;;  %v6912_v0 = vpop.f32.mrb[140].mxu1 }
0x12c3   : > { %v6913_v17 = vpop.f32.mrb[141].mxu1 }
0x12c4   : > { %v6914_v16 = vadd.f32 %v6913_v17, %v6912_v0  ;;  %v6915_v58 = vpop.f32.mrb[142].mxu1  ;;  %v4795_v56 = vpack.c.bf16 %v4766_v13, %v4765_v33 }
0x12c5   : > { %v6916_v14 = vpop.f32.mrb[143].mxu1 }
0x12c6   : > { %v4723_v28 = vadd.f32 %v6914_v16, %v10394_v21  ;;  %v6917_v39 = vadd.f32 %v6916_v14, %v6915_v58  ;;  %7538 = vmatprep.mubr.bf16.mxu0 %v4795_v56 }
0x12c8   : > { %v4726_v1 = vadd.f32 %v6917_v39, %v10394_v21  ;;  %v4767_v10 = vmax.f32 %v4723_v28, 0.0 }
0x12ca   : > { %v4768_v57 = vmax.f32 %v4726_v1, 0.0  ;;  %v6918_v3 = vpop.f32.mrb[144].mxu1 }
0x12cb   : > { %v6919_v62 = vpop.f32.mrb[145].mxu1 }
0x12cc   : > { %v6920_v55 = vadd.f32 %v6919_v62, %v6918_v3  ;;  %v6921_v38 = vpop.f32.mrb[146].mxu1  ;;  %v4796_v15 = vpack.c.bf16 %v4768_v57, %v4767_v10 }
0x12cd   : > { %v6922_v22 = vpop.f32.mrb[147].mxu1 }
0x12ce   : > { %v4731_v44 = vadd.f32 %v6920_v55, %v10394_v21  ;;  %v6923_v40 = vadd.f32 %v6922_v22, %v6921_v38  ;;  %7539 = vmatmul.mubr.bf16.gmra.mrb[164].mxu0 %v4796_v15 }
0x12d0   : > { %v4734_v33 = vadd.f32 %v6923_v40, %v10394_v21  ;;  %v4769_v13 = vmax.f32 %v4731_v44, 0.0 }
0x12d2   : > { %v4770_v0 = vmax.f32 %v4734_v33, 0.0  ;;  %v6924_v17 = vpop.f32.mrb[148].mxu1 }
0x12d3   : > { %v6925_v16 = vpop.f32.mrb[149].mxu1 }
0x12d4   : > { %v6926_v58 = vadd.f32 %v6925_v16, %v6924_v17  ;;  %v6927_v56 = vpop.f32.mrb[150].mxu1  ;;  %v4797_v14 = vpack.c.bf16 %v4770_v0, %v4769_v13 }
0x12d5   : > { %v6928_v28 = vpop.f32.mrb[151].mxu1 }
0x12d6   : > { %v4739_v39 = vadd.f32 %v6926_v58, %v10394_v21  ;;  %v6929_v1 = vadd.f32 %v6928_v28, %v6927_v56  ;;  %7542 = vmatprep.mubr.bf16.mxu0 %v4797_v14 }
0x12d8   : > { %v4742_v10 = vadd.f32 %v6929_v1, %v10394_v21  ;;  %v4771_v57 = vmax.f32 %v4739_v39, 0.0 }
0x12da   : > { %v4772_v3 = vmax.f32 %v4742_v10, 0.0  ;;  %v6930_v62 = vpop.f32.mrb[152].mxu1 }
0x12db   : > { %v6931_v55 = vpop.f32.mrb[153].mxu1 }
0x12dc   : > { %v6932_v38 = vadd.f32 %v6931_v55, %v6930_v62  ;;  %v6933_v15 = vpop.f32.mrb[154].mxu1  ;;  %v4798_v22 = vpack.c.bf16 %v4772_v3, %v4771_v57 }
0x12dd   : > { %v6934_v44 = vpop.f32.mrb[155].mxu1 }
0x12de   : > { %v4747_v40 = vadd.f32 %v6932_v38, %v10394_v21  ;;  %v6935_v33 = vadd.f32 %v6934_v44, %v6933_v15  ;;  %7543 = vmatmul.mubr.bf16.gmra.mrb[168].mxu0 %v4798_v22  ;;  %v8075_v38 = vld [vmem:[%s10944_s28 + $0x38] sm:$0xff]  }
0x12df   : > { %7564 = vmatprep.subr.bf16.mxu1 %v8075_v38  ;;  %v6488_v15 = vld [vmem:[#allocation28] ss:$0 sm:$0xff] }
0x12e0   : > { %v4750_v13 = vadd.f32 %v6935_v33, %v10394_v21  ;;  %v4773_v0 = vmax.f32 %v4747_v40, 0.0  ;;  %7565 = vmatpush3.bf16.msra.mxu1 %v8075_v38 }
0x12e2   : > { %v4774_v17 = vmax.f32 %v4750_v13, 0.0  ;;  %v6936_v16 = vpop.f32.mrb[156].mxu1 }
0x12e3   : > { %v6937_v58 = vpop.f32.mrb[157].mxu1 }
0x12e4   : > { %v6938_v56 = vadd.f32 %v6937_v58, %v6936_v16  ;;  %v6939_v14 = vpop.f32.mrb[158].mxu1  ;;  %v4799_v28 = vpack.c.bf16 %v4774_v17, %v4773_v0 }
0x12e5   : > { %v6940_v39 = vpop.f32.mrb[159].mxu1 }
0x12e6   : > { %v4755_v1 = vadd.f32 %v6938_v56, %v10394_v21  ;;  %v6941_v10 = vadd.f32 %v6940_v39, %v6939_v14  ;;  %7546 = vmatprep.mubr.bf16.mxu0 %v4799_v28 }
0x12e8   : > { %v4758_v57 = vadd.f32 %v6941_v10, %v10394_v21  ;;  %v4775_v3 = vmax.f32 %v4755_v1, 0.0 }
0x12ea   : > { %v4776_v62 = vmax.f32 %v4758_v57, 0.0 }
0x12ec   : > { %v4800_v55 = vpack.c.bf16 %v4776_v62, %v4775_v3 }
0x12ee   : > { %7547 = vmatmul.mubr.bf16.gmra.mrb[172].mxu0 %v4800_v55 }
0x12ef   : > { %5435 = vmatprep.mubr.bf16.mxu0 %v10077_v20 }
0x1391   : > { %v7536_v22 = vpop.f32.mrb[160].mxu0 }
0x1392   : > { %v4899_v44 = vadd.f32 %v7536_v22, %v6488_v15  ;;  %v4890_v40 = vpop.f32.mrb[161].mxu0 }
0x1393   : > { %v4891_v33 = vadd.f32 %v6488_v15, %v4890_v40  ;;  %v7537_v13 = vpop.f32.mrb[162].mxu0 }
0x1394   : > { %v4902_v0 = vadd.f32 %v7537_v13, %v6488_v15  ;;  %v4893_v21 = vpop.f32.mrb[163].mxu0  ;;  %v4955_v16 = vmax.f32 %v4899_v44, 0.0 }
0x1395   : > { %v4894_v17 = vadd.f32 %v6488_v15, %v4893_v21  ;;  %v4953_v56 = vmax.f32 %v4891_v33, 0.0 }
0x1396   : > { %v4956_v58 = vmax.f32 %v4902_v0, 0.0 }
0x1397   : > { %v4954_v14 = vmax.f32 %v4894_v17, 0.0 }
0x1398   : > { %v4986_v20 = vpack.c.bf16 %v4956_v58, %v4955_v16 }
0x1399   : > { %v4985_v28 = vpack.c.bf16 %v4954_v14, %v4953_v56 }
0x139b   : > { %7566 = vmatprep.mubr.bf16.mxu1 %v4985_v28 }
0x139c   : > { %7567 = vmatmul.mubr.bf16.vlgmr.msra.gmra.mrb[160].mxu1 %v4986_v20 }
0x13a1   : > { %v7540_v39 = vpop.f32.mrb[164].mxu0 }
0x13a2   : > { %v4915_v1 = vadd.f32 %v7540_v39, %v6488_v15  ;;  %v4906_v10 = vpop.f32.mrb[165].mxu0 }
0x13a3   : > { %v4907_v57 = vadd.f32 %v6488_v15, %v4906_v10  ;;  %v7541_v3 = vpop.f32.mrb[166].mxu0 }
0x13a4   : > { %v4918_v62 = vadd.f32 %v7541_v3, %v6488_v15  ;;  %v4909_v55 = vpop.f32.mrb[167].mxu0  ;;  %v4959_v22 = vmax.f32 %v4915_v1, 0.0 }
0x13a5   : > { %v4910_v38 = vadd.f32 %v6488_v15, %v4909_v55  ;;  %v4957_v13 = vmax.f32 %v4907_v57, 0.0 }
0x13a6   : > { %v4960_v40 = vmax.f32 %v4918_v62, 0.0 }
0x13a7   : > { %v4958_v21 = vmax.f32 %v4910_v38, 0.0 }
0x13a8   : > { %v4988_v44 = vpack.c.bf16 %v4960_v40, %v4959_v22 }
0x13a9   : > { %v4987_v0 = vpack.c.bf16 %v4958_v21, %v4957_v13 }
0x13ab   : > { %7570 = vmatprep.mubr.bf16.mxu1 %v4987_v0 }
0x13ac   : > { %7571 = vmatmul.mubr.bf16.gmra.mrb[164].mxu1 %v4988_v44 }
0x13b1   : > { %v7544_v33 = vpop.f32.mrb[168].mxu0 }
0x13b2   : > { %v4931_v17 = vadd.f32 %v7544_v33, %v6488_v15  ;;  %v4922_v16 = vpop.f32.mrb[169].mxu0 }
0x13b3   : > { %v4923_v58 = vadd.f32 %v6488_v15, %v4922_v16  ;;  %v7545_v56 = vpop.f32.mrb[170].mxu0 }
0x13b4   : > { %v4934_v14 = vadd.f32 %v7545_v56, %v6488_v15  ;;  %v4925_v20 = vpop.f32.mrb[171].mxu0  ;;  %v4963_v39 = vmax.f32 %v4931_v17, 0.0 }
0x13b5   : > { %v4926_v28 = vadd.f32 %v6488_v15, %v4925_v20  ;;  %v4961_v3 = vmax.f32 %v4923_v58, 0.0  ;;  %v8076_v58 = vld [vmem:[#allocation29 + $0x40] sm:$0xff]  }
0x13b6   : > { %v4964_v10 = vmax.f32 %v4934_v14, 0.0  ;;  %6974 = vmatprep.subr.bf16.mxu0 %v8076_v58 }
0x13b7   : > { %v4962_v55 = vmax.f32 %v4926_v28, 0.0  ;;  %v8077_v28 = vld [vmem:[#allocation29] sm:$0xff]  }
0x13b8   : > { %v4990_v1 = vpack.c.bf16 %v4964_v10, %v4963_v39  ;;  %6975 = vmatpush3.bf16.msra.mxu0 %v8077_v28  ;;  %v8078_v39 = vld [vmem:[#allocation29 + $0x48] sm:$0xff]  }
0x13b9   : > { %v4989_v62 = vpack.c.bf16 %v4962_v55, %v4961_v3  ;;  %v8079_v10 = vld [vmem:[#allocation29 + $0x8] sm:$0xff]   ;;  %6976 = vmatprep.subr.bf16.mxu0 %v8078_v39  ;;  %v8080_v3 = vld [vmem:[#allocation29 + $0x50] sm:$0xff]  }
0x13ba   : > { %v8081_v55 = vld [vmem:[#allocation29 + $0x10] sm:$0xff]  }
0x13bb   : > { %7574 = vmatprep.mubr.bf16.mxu1 %v4989_v62  ;;  %v8084_v62 = vld [vmem:[#allocation29 + $0x60] sm:$0xff]  }
0x13bc   : > { %7575 = vmatmul.mubr.bf16.gmra.mrb[168].mxu1 %v4990_v1  ;;  %6977 = vmatpush3.bf16.msra.mxu0 %v8079_v10  ;;  %v8083_v1 = vld [vmem:[#allocation29 + $0x18] sm:$0xff]  }
0x13bd   : > { %6978 = vmatprep.subr.bf16.mxu0 %v8080_v3 }
0x13c0   : > { %6979 = vmatpush3.bf16.msra.mxu0 %v8081_v55 }
0x13c1   : > { %v7548_v57 = vpop.f32.mrb[172].mxu0 }
0x13c2   : > { %v4947_v38 = vadd.f32 %v7548_v57, %v6488_v15  ;;  %v4938_v22 = vpop.f32.mrb[173].mxu0  ;;  %v8085_v57 = vld [vmem:[#allocation29 + $0x20] sm:$0xff]  }
0x13c3   : > { %v4939_v40 = vadd.f32 %v6488_v15, %v4938_v22  ;;  %v7549_v13 = vpop.f32.mrb[174].mxu0  ;;  %v8087_v22 = vld [vmem:[#allocation29 + $0x28] sm:$0xff]  }
0x13c4   : > { %v4950_v21 = vadd.f32 %v7549_v13, %v6488_v15  ;;  %v4941_v44 = vpop.f32.mrb[175].mxu0  ;;  %v4967_v33 = vmax.f32 %v4947_v38, 0.0  ;;  %v8086_v38 = vld [vmem:[#allocation29 + $0x68] sm:$0xff]   ;;  %v8089_v13 = vld [vmem:[#allocation29 + $0x30] sm:$0xff]  }
0x13c5   : > { %v4942_v0 = vadd.f32 %v6488_v15, %v4941_v44  ;;  %v4965_v56 = vmax.f32 %v4939_v40, 0.0  ;;  %v8082_v15 = vld [vmem:[#allocation29 + $0x58] sm:$0xff]   ;;  %v8088_v40 = vld [vmem:[#allocation29 + $0x70] sm:$0xff]  }
0x13c6   : > { %v4968_v16 = vmax.f32 %v4950_v21, 0.0  ;;  %6980 = vmatprep.subr.bf16.mxu0 %v8082_v15  ;;  %v8090_v21 = vld [vmem:[#allocation29 + $0x78] sm:$0xff]  }
0x13c7   : > { %v4966_v20 = vmax.f32 %v4942_v0, 0.0  ;;  %6981 = vmatpush3.bf16.msra.mxu0 %v8083_v1  ;;  %v8091_v44 = vld [vmem:[#allocation29 + $0x38] sm:$0xff]   ;;  %v8092_v0 = vld [vmem:[#allocation31] sm:$0xff]  }
0x13c8   : > { %v4992_v17 = vpack.c.bf16 %v4968_v16, %v4967_v33  ;;  %6982 = vmatprep.subr.bf16.mxu0 %v8084_v62  ;;  %v8093_v33 = vld [vmem:[#allocation31 + $0x8] sm:$0xff]   ;;  %7582 = vmatprep.subr.bf16.mxu1 %v8092_v0  ;;  %v8094_v16 = vld [vmem:[#allocation31 + $0x10] sm:$0xff]  }
0x13c9   : > { %v4991_v14 = vpack.c.bf16 %v4966_v20, %v4965_v56  ;;  %7583 = vmatpush3.bf16.msra.mxu1 %v8092_v0  ;;  %v10419_v56 = vld [vmem:[%s10945_s11] ss:$0 sm:$0xff]  ;;  %s6589_s11 = sshll.u32 %s10899_s2, 12 }
0x13ca   : > { %7584 = vmatprep.subr.bf16.mxu1 %v8093_v33 }
0x13cb   : > { %7578 = vmatprep.mubr.bf16.mxu1 %v4991_v14  ;;  %6983 = vmatpush3.bf16.msra.mxu0 %v8085_v57 }
0x13cc   : > { %7579 = vmatmul.mubr.bf16.gmra.mrb[172].mxu1 %v4992_v17  ;;  %6984 = vmatprep.subr.bf16.mxu0 %v8086_v38 }
0x13cd   : > { %7585 = vmatpush3.bf16.msra.mxu1 %v8093_v33 }
0x13ce   : > { %7586 = vmatprep.subr.bf16.mxu1 %v8094_v16 }
0x13cf   : > { %6985 = vmatpush3.bf16.msra.mxu0 %v8087_v22 }
0x13d0   : > { %6986 = vmatprep.subr.bf16.mxu0 %v8088_v40 }
0x13d1   : > { %7587 = vmatpush3.bf16.msra.mxu1 %v8094_v16 }
0x13d3   : > { %6987 = vmatpush3.bf16.msra.mxu0 %v8089_v13 }
0x13d4   : > { %6988 = vmatprep.subr.bf16.mxu0 %v8090_v21 }
0x13d7   : > { %6989 = vmatpush3.bf16.msra.mxu0 %v8091_v44 }
0x146f   : > { %v7568_v20 = vpop.f32.mrb[160].mxu1 }
0x1470   : > { %v5091_v17 = vadd.f32 %v7568_v20, %v10419_v56  ;;  %v5082_v14 = vpop.f32.mrb[161].mxu1 }
0x1471   : > { %v5083_v58 = vadd.f32 %v10419_v56, %v5082_v14  ;;  %v7569_v28 = vpop.f32.mrb[162].mxu1 }
0x1472   : > { %v6508_v39 = vmul.f32 -1.442695, %v5091_v17  ;;  %v5094_v10 = vadd.f32 %v7569_v28, %v10419_v56  ;;  %v5085_v3 = vpop.f32.mrb[163].mxu1 }
0x1473   : > { %v6506_v55 = vmul.f32 -1.442695, %v5083_v58  ;;  %v5086_v15 = vadd.f32 %v10419_v56, %v5085_v3 }
0x1474   : > { %8204 = vpow2.f32 %v6508_v39  ;;  %v6509_v1 = vmul.f32 -1.442695, %v5094_v10 }
0x1475   : > { %8206 = vpow2.f32 %v6506_v55  ;;  %v6507_v62 = vmul.f32 -1.442695, %v5086_v15 }
0x1476   : > { %8208 = vpow2.f32 %v6509_v1 }
0x1477   : > { %8210 = vpow2.f32 %v6507_v62 }
0x147e   : > { %v8205_v57 = vpop.eup %8204 }
0x147f   : > { %v8207_v38 = vpop.eup %8206  ;;  %v5195_v22 = vadd.f32 1.0, %v8205_v57  ;;  %v7572_v40 = vpop.f32.mrb[164].mxu1 }
0x1480   : > { %v8209_v13 = vpop.eup %8208  ;;  %v5193_v21 = vadd.f32 1.0, %v8207_v38  ;;  %v5107_v44 = vadd.f32 %v7572_v40, %v10419_v56  ;;  %v5098_v0 = vpop.f32.mrb[165].mxu1  ;;  %v10524_v40 = vld [vmem:[%s10955_s29] ss:$0 sm:$0xff]  ;;  %s10998_s29 = sld [smem:[#allocation94_spill]] }
0x1481   : > { %v8211_v33 = vpop.eup %8210  ;;  %8212 = vrcp.f32 %v5195_v22  ;;  %v5196_v16 = vadd.f32 1.0, %v8209_v13  ;;  %v5099_v20 = vadd.f32 %v10419_v56, %v5098_v0  ;;  %v7573_v17 = vpop.f32.mrb[166].mxu1 }
0x1482   : > { %8214 = vrcp.f32 %v5193_v21  ;;  %v5194_v14 = vadd.f32 1.0, %v8211_v33  ;;  %v6512_v58 = vmul.f32 -1.442695, %v5107_v44  ;;  %v5110_v28 = vadd.f32 %v7573_v17, %v10419_v56  ;;  %v5101_v39 = vpop.f32.mrb[167].mxu1 }
0x1483   : > { %8216 = vrcp.f32 %v5196_v16  ;;  %v6510_v10 = vmul.f32 -1.442695, %v5099_v20  ;;  %v5102_v3 = vadd.f32 %v10419_v56, %v5101_v39 }
0x1484   : > { %8218 = vrcp.f32 %v5194_v14  ;;  %v6513_v55 = vmul.f32 -1.442695, %v5110_v28 }
0x1485   : > { %8220 = vpow2.f32 %v6512_v58  ;;  %v6511_v15 = vmul.f32 -1.442695, %v5102_v3 }
0x1486   : > { %8222 = vpow2.f32 %v6510_v10  ;;  %s10999_s4 = smov %s10998_s29  ;;  %s10696_s19 = scalar_lea.hbm %s10998_s29, %s6589_s11 }
0x1487   : > { %8224 = vpow2.f32 %v6513_v55 }
0x1488   : > { %8226 = vpow2.f32 %v6511_v15 }
0x148b   : > { %v10431_v1 = vpop.eup %8212 }
0x148c   : > { %v10433_v62 = vpop.eup %8214 }
0x148d   : > { %v10435_v57 = vpop.eup %8216 }
0x148e   : > { %v10441_v22 = vpop.eup %8218  ;;  %v6543_v26 = vpack.c.bf16 %v10435_v57, %v10431_v1 }
0x148f   : > { %v8221_v13 = vpop.eup %8220  ;;  %v6540_v21 = vpack.c.bf16 %v10441_v22, %v10433_v62  ;;  %v7576_v44 = vpop.f32.mrb[168].mxu1 }
0x1490   : > { %v8223_v0 = vpop.eup %8222  ;;  %v5199_v33 = vadd.f32 1.0, %v8221_v13  ;;  %v5123_v16 = vadd.f32 %v7576_v44, %v10419_v56  ;;  %v5114_v20 = vpop.f32.mrb[169].mxu1 }
0x1491   : > { %v8225_v17 = vpop.eup %8224  ;;  %v5197_v14 = vadd.f32 1.0, %v8223_v0  ;;  %v5115_v58 = vadd.f32 %v10419_v56, %v5114_v20  ;;  %v7577_v28 = vpop.f32.mrb[170].mxu1  ;;  %6541 = vmatmul.mubr.msk.bf16.vlgmr.msra.gmra.mrb[176].mxu0 %vm10446_vm9, %v6540_v21 }
0x1492   : > { %v8227_v39 = vpop.eup %8226  ;;  %8228 = vrcp.f32 %v5199_v33  ;;  %v5200_v10 = vadd.f32 1.0, %v8225_v17  ;;  %v6516_v3 = vmul.f32 -1.442695, %v5123_v16  ;;  %v5126_v55 = vadd.f32 %v7577_v28, %v10419_v56  ;;  %v5117_v15 = vpop.f32.mrb[171].mxu1  ;;  %5443 = vmatprep.mubr.bf16.mxu0 %v10089_v24 }
0x1493   : > { %8230 = vrcp.f32 %v5197_v14  ;;  %v5198_v13 = vadd.f32 1.0, %v8227_v39  ;;  %v6514_v44 = vmul.f32 -1.442695, %v5115_v58  ;;  %v5118_v0 = vadd.f32 %v10419_v56, %v5117_v15 }
0x1494   : > { %8232 = vrcp.f32 %v5200_v10  ;;  %v6517_v20 = vmul.f32 -1.442695, %v5126_v55 }
0x1495   : > { %8234 = vrcp.f32 %v5198_v13  ;;  %v6515_v54 = vmul.f32 -1.442695, %v5118_v0 }
0x1496   : > { %8236 = vpow2.f32 %v6516_v3 }
0x1497   : > { %8238 = vpow2.f32 %v6514_v44 }
0x1498   : > { %8240 = vpow2.f32 %v6517_v20 }
0x1499   : > { %8242 = vpow2.f32 %v6515_v54  ;;  %6544 = vmatmul.mubr.msk.bf16.gmra.mrb[180].mxu0 %vm10446_vm9, %v6543_v26 }
0x149a   : > { %5451 = vmatprep.mubr.bf16.mxu0 %v10100_v6 }
0x149c   : > { %v10464_v21 = vpop.eup %8228 }
0x149d   : > { %v10466_v24 = vpop.eup %8230 }
0x149e   : > { %v10468_v33 = vpop.eup %8232 }
0x149f   : > { %v10470_v16 = vpop.eup %8234  ;;  %v7580_v17 = vpop.f32.mrb[172].mxu1  ;;  %v6549_v14 = vpack.c.bf16 %v10468_v33, %v10464_v21 }
0x14a0   : > { %v8237_v58 = vpop.eup %8236  ;;  %v5139_v54 = vadd.f32 %v7580_v17, %v10419_v56  ;;  %v5130_v28 = vpop.f32.mrb[173].mxu1  ;;  %v6546_v26 = vpack.c.bf16 %v10470_v16, %v10466_v24 }
0x14a1   : > { %v8239_v6 = vpop.eup %8238  ;;  %v5203_v39 = vadd.f32 1.0, %v8237_v58  ;;  %v5131_v10 = vadd.f32 %v10419_v56, %v5130_v28  ;;  %v7581_v3 = vpop.f32.mrb[174].mxu1 }
0x14a2   : > { %v8241_v55 = vpop.eup %8240  ;;  %v5201_v15 = vadd.f32 1.0, %v8239_v6  ;;  %v5142_v13 = vadd.f32 %v7581_v3, %v10419_v56  ;;  %6547 = vmatmul.mubr.msk.bf16.gmra.mrb[184].mxu0 %vm10446_vm9, %v6546_v26  ;;  %v5133_v44 = vpop.f32.mrb[175].mxu1  ;;  %v6520_v17 = vmul.f32 -1.442695, %v5139_v54 }
0x14a3   : > { %v8243_v0 = vpop.eup %8242  ;;  %8244 = vrcp.f32 %v5203_v39  ;;  %v5204_v20 = vadd.f32 1.0, %v8241_v55  ;;  %v5134_v4 = vadd.f32 %v10419_v56, %v5133_v44  ;;  %5459 = vmatprep.mubr.bf16.mxu0 %v10112_v52  ;;  %v6518_v28 = vmul.f32 -1.442695, %v5131_v10 }
0x14a4   : > { %8246 = vrcp.f32 %v5201_v15  ;;  %v5202_v58 = vadd.f32 1.0, %v8243_v0  ;;  %v6521_v8 = vmul.f32 -1.442695, %v5142_v13 }
0x14a5   : > { %8248 = vrcp.f32 %v5204_v20  ;;  %v6519_v6 = vmul.f32 -1.442695, %v5134_v4 }
0x14a6   : > { %8250 = vrcp.f32 %v5202_v58 }
0x14a7   : > { %8252 = vpow2.f32 %v6520_v17 }
0x14a8   : > { %8254 = vpow2.f32 %v6518_v28  ;;  %v8096_v28 = vld [vmem:[#allocation31 + $0x20] sm:$0xff]  }
0x14a9   : > { %8256 = vpow2.f32 %v6521_v8 }
0x14aa   : > { %8258 = vpow2.f32 %v6519_v6  ;;  %6550 = vmatmul.mubr.msk.bf16.gmra.mrb[188].mxu0 %vm10446_vm9, %v6549_v14  ;;  %v8097_v6 = vld [vmem:[#allocation31 + $0x28] sm:$0xff]  }
0x14ab   : > { %5467 = vmatprep.mubr.bf16.mxu0 %v10124_v5 }
0x14ad   : > { %v10486_v54 = vpop.eup %8244 }
0x14ae   : > { %v10488_v56 = vpop.eup %8246 }
0x14af   : > { %v10490_v52 = vpop.eup %8248 }
0x14b0   : > { %v10492_v26 = vpop.eup %8250  ;;  %v6555_v4 = vpack.c.bf16 %v10490_v52, %v10486_v54 }
0x14b1   : > { %10950 = vst [vmem:[#allocation70_spill] sm:$0xff] %v10492_v26  ;;  %v8253_v39 = vpop.eup %8252  ;;  %v6552_v8 = vpack.c.bf16 %v10492_v26, %v10488_v56 }
0x14b2   : > { %v8255_v10 = vpop.eup %8254  ;;  %v5207_v3 = vadd.f32 1.0, %v8253_v39  ;;  %v8099_v39 = vld [vmem:[#allocation31 + $0x38] sm:$0xff]  }
0x14b3   : > { %v8257_v14 = vpop.eup %8256  ;;  %v5205_v55 = vadd.f32 1.0, %v8255_v10  ;;  %6553 = vmatmul.mubr.msk.bf16.gmra.mrb[192].mxu0 %vm10446_vm9, %v6552_v8  ;;  %v8100_v8 = vld [vmem:[#allocation32] sm:$0xff]  }
0x14b4   : > { %v8259_v5 = vpop.eup %8258  ;;  %8260 = vrcp.f32 %v5207_v3  ;;  %v5208_v15 = vadd.f32 1.0, %v8257_v14  ;;  %5475 = vmatprep.mubr.bf16.mxu0 %v10136_v11 }
0x14b5   : > { %8262 = vrcp.f32 %v5205_v55  ;;  %v5206_v13 = vadd.f32 1.0, %v8259_v5 }
0x14b6   : > { %8264 = vrcp.f32 %v5208_v15 }
0x14b7   : > { %8266 = vrcp.f32 %v5206_v13 }
0x14bb   : > { %6556 = vmatmul.mubr.msk.bf16.gmra.mrb[196].mxu0 %vm10446_vm9, %v6555_v4  ;;  %v8098_v4 = vld [vmem:[#allocation31 + $0x30] sm:$0xff]  }
0x14bc   : > { %5483 = vmatprep.mubr.bf16.mxu0 %v10148_v18  ;;  %v8095_v18 = vld [vmem:[#allocation31 + $0x18] sm:$0xff]  }
0x14bd   : > { %7588 = vmatprep.subr.bf16.mxu1 %v8095_v18 }
0x14be   : > { %v10504_v44 = vpop.eup %8260  ;;  %7589 = vmatpush3.bf16.msra.mxu1 %v8095_v18 }
0x14bf   : > { %10951 = vst [vmem:[#allocation71_spill] sm:$0xff] %v10504_v44  ;;  %v10506_v0 = vpop.eup %8262  ;;  %7590 = vmatprep.subr.bf16.mxu1 %v8096_v28 }
0x14c0   : > { %10952 = vst [vmem:[#allocation72_spill] sm:$0xff] %v10506_v0  ;;  %v10508_v20 = vpop.eup %8264 }
0x14c1   : > { %10953 = vst [vmem:[#allocation73_spill] sm:$0xff] %v10508_v20  ;;  %v10510_v17 = vpop.eup %8266  ;;  %v6561_v11 = vpack.c.bf16 %v10508_v20, %v10504_v44 }
0x14c2   : > { %10954 = vst [vmem:[#allocation74_spill] sm:$0xff] %v10510_v17  ;;  %v6558_v58 = vpack.c.bf16 %v10510_v17, %v10506_v0  ;;  %7591 = vmatpush3.bf16.msra.mxu1 %v8096_v28 }
0x14c3   : > { %7592 = vmatprep.subr.bf16.mxu1 %v8097_v6 }
0x14c4   : > { %6559 = vmatmul.mubr.msk.bf16.gmra.mrb[200].mxu0 %vm10446_vm9, %v6558_v58 }
0x14c5   : > { %5491 = vmatprep.mubr.bf16.mxu0 %v10160_v46 }
0x14c6   : > { %7593 = vmatpush3.bf16.msra.mxu1 %v8097_v6 }
0x14c7   : > { %7594 = vmatprep.subr.bf16.mxu1 %v8098_v4 }
0x14ca   : > { %7595 = vmatpush3.bf16.msra.mxu1 %v8098_v4 }
0x14cb   : > { %7596 = vmatprep.subr.bf16.mxu1 %v8099_v39 }
0x14cc   : > { %6562 = vmatmul.mubr.msk.bf16.gmra.mrb[204].mxu0 %vm10446_vm9, %v6561_v11 }
0x14ce   : > { %7597 = vmatpush3.bf16.msra.mxu1 %v8099_v39 }
0x14cf   : > { %7614 = vmatprep.subr.bf16.mxu1 %v8100_v8 }
0x1564   : > { %v6990_v46 = vpop.f32.mrb[176].mxu0 }
0x1565   : > { %v6991_v10 = vpop.f32.mrb[177].mxu0 }
0x1566   : > { %v6992_v3 = vadd.f32 %v6991_v10, %v6990_v46  ;;  %v6993_v14 = vpop.f32.mrb[178].mxu0 }
0x1567   : > { %v6994_v55 = vpop.f32.mrb[179].mxu0 }
0x1568   : > { %v5438_v5 = vadd.f32 %v6992_v3, %v10524_v40  ;;  %v6995_v15 = vadd.f32 %v6994_v55, %v6993_v14 }
0x156a   : > { %v5441_v13 = vadd.f32 %v6995_v15, %v10524_v40  ;;  %v5500_v11 = vmax.f32 %v5438_v5, 0.0  ;;  %v8101_v15 = vld [vmem:[#allocation32 + $0x8] sm:$0xff]  }
0x156c   : > { %v5501_v58 = vmax.f32 %v5441_v13, 0.0  ;;  %v6996_v18 = vpop.f32.mrb[180].mxu0 }
0x156d   : > { %v6997_v28 = vpop.f32.mrb[181].mxu0 }
0x156e   : > { %v6998_v6 = vadd.f32 %v6997_v28, %v6996_v18  ;;  %v6999_v4 = vpop.f32.mrb[182].mxu0  ;;  %v5532_v39 = vpack.c.bf16 %v5501_v58, %v5500_v11  ;;  %v8102_v58 = vld [vmem:[#allocation32 + $0x10] sm:$0xff]  }
0x156f   : > { %v7000_v17 = vpop.f32.mrb[183].mxu0 }
0x1570   : > { %v5446_v20 = vadd.f32 %v6998_v6, %v10524_v40  ;;  %v7001_v0 = vadd.f32 %v7000_v17, %v6999_v4  ;;  %7598 = vmatprep.mubr.bf16.mxu1 %v5532_v39 }
0x1572   : > { %v5449_v46 = vadd.f32 %v7001_v0, %v10524_v40  ;;  %v5502_v10 = vmax.f32 %v5446_v20, 0.0 }
0x1574   : > { %v5503_v44 = vmax.f32 %v5449_v46, 0.0 }
0x1575   : > { %v7002_v3 = vpop.f32.mrb[184].mxu0 }
0x1576   : > { %v5533_v14 = vpack.c.bf16 %v5503_v44, %v5502_v10  ;;  %v7003_v55 = vpop.f32.mrb[185].mxu0  ;;  %v8103_v44 = vld [vmem:[#allocation32 + $0x18] sm:$0xff]  }
0x1577   : > { %v7004_v5 = vadd.f32 %v7003_v55, %v7002_v3  ;;  %v7005_v13 = vpop.f32.mrb[186].mxu0 }
0x1578   : > { %v7006_v36 = vpop.f32.mrb[187].mxu0  ;;  %7599 = vmatmul.mubr.bf16.vlgmr.msra.gmra.mrb[176].mxu1 %v5533_v14 }
0x1579   : > { %v5454_v18 = vadd.f32 %v7004_v5, %v10524_v40  ;;  %v7007_v11 = vadd.f32 %v7006_v36, %v7005_v13  ;;  %7615 = vmatpush3.bf16.msra.mxu1 %v8100_v8  ;;  %v8104_v36 = vld [vmem:[#allocation32 + $0x20] sm:$0xff]  }
0x157a   : > { %7616 = vmatprep.subr.bf16.mxu1 %v8101_v15 }
0x157b   : > { %v5457_v17 = vadd.f32 %v7007_v11, %v10524_v40  ;;  %v5504_v28 = vmax.f32 %v5454_v18, 0.0  ;;  %v8105_v11 = vld [vmem:[#allocation32 + $0x28] sm:$0xff]  }
0x157d   : > { %v5505_v0 = vmax.f32 %v5457_v17, 0.0  ;;  %v7008_v20 = vpop.f32.mrb[188].mxu0  ;;  %7617 = vmatpush3.bf16.msra.mxu1 %v8101_v15 }
0x157e   : > { %v7009_v6 = vpop.f32.mrb[189].mxu0  ;;  %7618 = vmatprep.subr.bf16.mxu1 %v8102_v58 }
0x157f   : > { %v7010_v4 = vadd.f32 %v7009_v6, %v7008_v20  ;;  %v7011_v39 = vpop.f32.mrb[190].mxu0  ;;  %v5534_v46 = vpack.c.bf16 %v5505_v0, %v5504_v28 }
0x1580   : > { %v7012_v10 = vpop.f32.mrb[191].mxu0 }
0x1581   : > { %v5462_v3 = vadd.f32 %v7010_v4, %v10524_v40  ;;  %v7013_v14 = vadd.f32 %v7012_v10, %v7011_v39  ;;  %7602 = vmatprep.mubr.bf16.mxu1 %v5534_v46  ;;  %7619 = vmatpush3.bf16.msra.mxu1 %v8102_v58 }
0x1582   : > { %7620 = vmatprep.subr.bf16.mxu1 %v8103_v44 }
0x1583   : > { %v5465_v8 = vadd.f32 %v7013_v14, %v10524_v40  ;;  %v5506_v55 = vmax.f32 %v5462_v3, 0.0 }
0x1585   : > { %v5507_v5 = vmax.f32 %v5465_v8, 0.0  ;;  %7621 = vmatpush3.bf16.msra.mxu1 %v8103_v44 }
0x1586   : > { %v7014_v15 = vpop.f32.mrb[192].mxu0  ;;  %7622 = vmatprep.subr.bf16.mxu1 %v8104_v36 }
0x1587   : > { %v7015_v13 = vpop.f32.mrb[193].mxu0  ;;  %v5535_v18 = vpack.c.bf16 %v5507_v5, %v5506_v55 }
0x1588   : > { %v7016_v17 = vadd.f32 %v7015_v13, %v7014_v15  ;;  %v7017_v28 = vpop.f32.mrb[194].mxu0 }
0x1589   : > { %v7018_v0 = vpop.f32.mrb[195].mxu0  ;;  %7603 = vmatmul.mubr.bf16.gmra.mrb[180].mxu1 %v5535_v18 }
0x158a   : > { %v5470_v20 = vadd.f32 %v7016_v17, %v10524_v40  ;;  %v7019_v6 = vadd.f32 %v7018_v0, %v7017_v28  ;;  %7623 = vmatpush3.bf16.msra.mxu1 %v8104_v36 }
0x158b   : > { %7624 = vmatprep.subr.bf16.mxu1 %v8105_v11 }
0x158c   : > { %v5473_v58 = vadd.f32 %v7019_v6, %v10524_v40  ;;  %v5508_v4 = vmax.f32 %v5470_v20, 0.0 }
0x158e   : > { %v5509_v39 = vmax.f32 %v5473_v58, 0.0  ;;  %v7020_v46 = vpop.f32.mrb[196].mxu0  ;;  %7625 = vmatpush3.bf16.msra.mxu1 %v8105_v11 }
0x158f   : > { %v7021_v44 = vpop.f32.mrb[197].mxu0 }
0x1590   : > { %v7022_v10 = vadd.f32 %v7021_v44, %v7020_v46  ;;  %v7023_v3 = vpop.f32.mrb[198].mxu0  ;;  %v5536_v14 = vpack.c.bf16 %v5509_v39, %v5508_v4 }
0x1591   : > { %v7024_v8 = vpop.f32.mrb[199].mxu0 }
0x1592   : > { %v5478_v55 = vadd.f32 %v7022_v10, %v10524_v40  ;;  %v7025_v5 = vadd.f32 %v7024_v8, %v7023_v3  ;;  %7606 = vmatprep.mubr.bf16.mxu1 %v5536_v14 }
0x1594   : > { %v5481_v15 = vadd.f32 %v7025_v5, %v10524_v40  ;;  %v5510_v13 = vmax.f32 %v5478_v55, 0.0 }
0x1596   : > { %v5511_v36 = vmax.f32 %v5481_v15, 0.0 }
0x1597   : > { %v7026_v18 = vpop.f32.mrb[200].mxu0 }
0x1598   : > { %v7027_v17 = vpop.f32.mrb[201].mxu0  ;;  %v5537_v28 = vpack.c.bf16 %v5511_v36, %v5510_v13 }
0x1599   : > { %v7028_v0 = vadd.f32 %v7027_v17, %v7026_v18  ;;  %v7029_v20 = vpop.f32.mrb[202].mxu0 }
0x159a   : > { %v7030_v6 = vpop.f32.mrb[203].mxu0  ;;  %7607 = vmatmul.mubr.bf16.gmra.mrb[184].mxu1 %v5537_v28  ;;  %v8106_v28 = vld [vmem:[#allocation32 + $0x30] sm:$0xff]  }
0x159b   : > { %v5486_v11 = vadd.f32 %v7028_v0, %v10524_v40  ;;  %v7031_v58 = vadd.f32 %v7030_v6, %v7029_v20  ;;  %7626 = vmatprep.subr.bf16.mxu1 %v8106_v28  ;;  %v8107_v0 = vld [vmem:[#allocation32 + $0x38] sm:$0xff]   ;;  %v6563_v20 = vld [vmem:[%s10956_s22] ss:$0 sm:$0xff]  ;;  %s5997_s22 = scalar_lea.sflag [#allocation4], %s9664_s15 }
0x159c   : > { %7627 = vmatpush3.bf16.msra.mxu1 %v8106_v28 }
0x159d   : > { %v5489_v4 = vadd.f32 %v7031_v58, %v10524_v40  ;;  %v5512_v39 = vmax.f32 %v5486_v11, 0.0  ;;  %7628 = vmatprep.subr.bf16.mxu1 %v8107_v0 }
0x159f   : > { %v5513_v46 = vmax.f32 %v5489_v4, 0.0  ;;  %v7032_v44 = vpop.f32.mrb[204].mxu0 }
0x15a0   : > { %v7033_v10 = vpop.f32.mrb[205].mxu0  ;;  %7629 = vmatpush3.bf16.msra.mxu1 %v8107_v0 }
0x15a1   : > { %v7034_v3 = vadd.f32 %v7033_v10, %v7032_v44  ;;  %v7035_v14 = vpop.f32.mrb[206].mxu0  ;;  %v5538_v8 = vpack.c.bf16 %v5513_v46, %v5512_v39 }
0x15a2   : > { %v7036_v55 = vpop.f32.mrb[207].mxu0 }
0x15a3   : > { %v5494_v5 = vadd.f32 %v7034_v3, %v10524_v40  ;;  %v7037_v15 = vadd.f32 %v7036_v55, %v7035_v14  ;;  %7610 = vmatprep.mubr.bf16.mxu1 %v5538_v8 }
0x15a5   : > { %v5497_v13 = vadd.f32 %v7037_v15, %v10524_v40  ;;  %v5514_v36 = vmax.f32 %v5494_v5, 0.0 }
0x15a7   : > { %v5515_v18 = vmax.f32 %v5497_v13, 0.0 }
0x15a9   : > { %v5539_v17 = vpack.c.bf16 %v5515_v18, %v5514_v36 }
0x15ab   : > { %7611 = vmatmul.mubr.bf16.gmra.mrb[188].mxu1 %v5539_v17 }
0x164b   : > { %v7600_v6 = vpop.f32.mrb[176].mxu1 }
0x164c   : > { %v5638_v11 = vadd.f32 %v7600_v6, %v6563_v20  ;;  %v5629_v58 = vpop.f32.mrb[177].mxu1 }
0x164d   : > { %v5630_v4 = vadd.f32 %v6563_v20, %v5629_v58  ;;  %v7601_v39 = vpop.f32.mrb[178].mxu1 }
0x164e   : > { %v5641_v40 = vadd.f32 %v7601_v39, %v6563_v20  ;;  %v5632_v46 = vpop.f32.mrb[179].mxu1  ;;  %v5694_v10 = vmax.f32 %v5638_v11, 0.0 }
0x164f   : > { %v5633_v44 = vadd.f32 %v6563_v20, %v5632_v46  ;;  %v5692_v14 = vmax.f32 %v5630_v4, 0.0 }
0x1650   : > { %v5695_v3 = vmax.f32 %v5641_v40, 0.0 }
0x1651   : > { %v5693_v8 = vmax.f32 %v5633_v44, 0.0 }
0x1652   : > { %v5725_v55 = vpack.c.bf16 %v5695_v3, %v5694_v10 }
0x1653   : > { %v5724_v5 = vpack.c.bf16 %v5693_v8, %v5692_v14 }
0x1655   : > { %7630 = vmatprep.mubr.bf16.mxu1 %v5724_v5 }
0x1656   : > { %7631 = vmatmul.mubr.bf16.vlgmr.msra.gmra.mrb[192].mxu1 %v5725_v55 }
0x165c   : > { %v7604_v15 = vpop.f32.mrb[180].mxu1 }
0x165d   : > { %v5654_v13 = vadd.f32 %v7604_v15, %v6563_v20  ;;  %v5645_v36 = vpop.f32.mrb[181].mxu1 }
0x165e   : > { %v5646_v18 = vadd.f32 %v6563_v20, %v5645_v36  ;;  %v7605_v17 = vpop.f32.mrb[182].mxu1 }
0x165f   : > { %v5657_v28 = vadd.f32 %v7605_v17, %v6563_v20  ;;  %v5648_v0 = vpop.f32.mrb[183].mxu1  ;;  %v5698_v58 = vmax.f32 %v5654_v13, 0.0 }
0x1660   : > { %v5649_v6 = vadd.f32 %v6563_v20, %v5648_v0  ;;  %v5696_v26 = vmax.f32 %v5646_v18, 0.0 }
0x1661   : > { %v5699_v39 = vmax.f32 %v5657_v28, 0.0 }
0x1662   : > { %v5697_v46 = vmax.f32 %v5649_v6, 0.0 }
0x1663   : > { %v5727_v11 = vpack.c.bf16 %v5699_v39, %v5698_v58 }
0x1664   : > { %v5726_v40 = vpack.c.bf16 %v5697_v46, %v5696_v26 }
0x1666   : > { %7634 = vmatprep.mubr.bf16.mxu1 %v5726_v40 }
0x1667   : > { %7635 = vmatmul.mubr.bf16.gmra.mrb[196].mxu1 %v5727_v11 }
0x166d   : > { %v7608_v4 = vpop.f32.mrb[184].mxu1 }
0x166e   : > { %v5670_v44 = vadd.f32 %v7608_v4, %v6563_v20  ;;  %v5661_v10 = vpop.f32.mrb[185].mxu1 }
0x166f   : > { %v5662_v3 = vadd.f32 %v6563_v20, %v5661_v10  ;;  %v7609_v14 = vpop.f32.mrb[186].mxu1 }
0x1670   : > { %v5673_v8 = vadd.f32 %v7609_v14, %v6563_v20  ;;  %v5664_v55 = vpop.f32.mrb[187].mxu1  ;;  %v5702_v15 = vmax.f32 %v5670_v44, 0.0 }
0x1671   : > { %v5665_v5 = vadd.f32 %v6563_v20, %v5664_v55  ;;  %v5700_v17 = vmax.f32 %v5662_v3, 0.0  ;;  %v10548_v3 = vld [vmem:[%s10957_s25] ss:$0 sm:$0xff]  ;;  %s8866_s25 = sshll.u32 %s8997_s20, 4  ;;  %s8867_s25 = int_to_ptr.vmem [resolvable:$false] %s8866_s25 }
0x1672   : > { %v5703_v36 = vmax.f32 %v5673_v8, 0.0  ;;  %s8868_s11 = scalar_lea.vmem %s8867_s25, 8192  ;;  %p8869_p13 = scmp.lt.s32.totalorder %s10698_s18, %s8867_s25 }
0x1673   : > { %v5701_v0 = vmax.f32 %v5665_v5, 0.0  ;;  %p8870_p0 = scmp.lt.s32.totalorder %s8868_s11, %s8862_s7 }
0x1674   : > { %v5729_v13 = vpack.c.bf16 %v5703_v36, %v5702_v15 }
0x1675   : > { %v5728_v28 = vpack.c.bf16 %v5701_v0, %v5700_v17  ;;  %v10958_v0 = vmax.f32 %v9756_v19, 0.0  ;;  %p8871_p2 = por %p8870_p0, %p8869_p13 }
0x1677   : > { %7638 = vmatprep.mubr.bf16.mxu1 %v5728_v28  ;;  %p8872_p8 = pnand %p8871_p2, %p8865_p1 }
0x1678   : > { %7639 = vmatmul.mubr.bf16.gmra.mrb[200].mxu1 %v5729_v13 }
0x167e   : > { %v7612_v18 = vpop.f32.mrb[188].mxu1 }
0x167f   : > { %v5686_v26 = vadd.f32 %v7612_v18, %v6563_v20  ;;  %v5677_v6 = vpop.f32.mrb[189].mxu1 }
0x1680   : > { %v5678_v58 = vadd.f32 %v6563_v20, %v5677_v6  ;;  %v7613_v39 = vpop.f32.mrb[190].mxu1 }
0x1681   : > { %v5689_v46 = vadd.f32 %v7613_v39, %v6563_v20  ;;  %v5680_v11 = vpop.f32.mrb[191].mxu1  ;;  %v5706_v4 = vmax.f32 %v5686_v26, 0.0  ;;  %v10959_v26 = vmax.f32 %v9754_v29, 0.0 }
0x1682   : > { %v5681_v40 = vadd.f32 %v6563_v20, %v5680_v11  ;;  %v5704_v14 = vmax.f32 %v5678_v58, 0.0 }
0x1683   : > { %v5707_v10 = vmax.f32 %v5689_v46, 0.0  ;;  %v10960_v46 = vmax.f32 %v9758_v30, 0.0 }
0x1684   : > { %v5705_v55 = vmax.f32 %v5681_v40, 0.0 }
0x1685   : > { %v5731_v44 = vpack.c.bf16 %v5707_v10, %v5706_v4  ;;  %v10961_v4 = vmax.f32 %v9760_v35, 0.0  ;;  %v5244_v35 = vsel %vm10437_vm8, %v10433_v62, 0.0 }
0x1686   : > { %v5730_v8 = vpack.c.bf16 %v5705_v55, %v5704_v14  ;;  %v5246_v14 = vsel %vm10437_vm8, %v10431_v1, 0.0 }
0x1688   : > { %7642 = vmatprep.mubr.bf16.mxu1 %v5730_v8 }
0x1689   : > { %7643 = vmatmul.mubr.bf16.gmra.mrb[204].mxu1 %v5731_v44 }
0x1729   : > { %v7632_v5 = vpop.f32.mrb[192].mxu1 }
0x172a   : > { %v5830_v15 = vadd.f32 %v7632_v5, %v10548_v3  ;;  %v5821_v36 = vpop.f32.mrb[193].mxu1 }
0x172b   : > { %v5822_v17 = vadd.f32 %v10548_v3, %v5821_v36  ;;  %v7633_v20 = vpop.f32.mrb[194].mxu1 }
0x172c   : > { %v5886_v13 = vadd.f32 %v5830_v15, %v10958_v0  ;;  %v5833_v28 = vadd.f32 %v7633_v20, %v10548_v3  ;;  %v5824_v18 = vpop.f32.mrb[195].mxu1  ;;  %v10963_v20 = vmax.f32 %v9774_v45, 0.0 }
0x172d   : > { %v5884_v6 = vadd.f32 %v5822_v17, %v10959_v26  ;;  %v5825_v58 = vadd.f32 %v10548_v3, %v5824_v18 }
0x172e   : > { %v5902_v39 = vadd.f32 %v5886_v13, %v9842_v41  ;;  %v5887_v11 = vadd.f32 %v5833_v28, %v10960_v46  ;;  %v10964_v28 = vmax.f32 %v9778_v49, 0.0 }
0x172f   : > { %v5900_v40 = vadd.f32 %v5884_v6, %v9845_v42  ;;  %v5885_v19 = vadd.f32 %v5825_v58, %v10961_v4  ;;  %v10965_v6 = vmax.f32 %v9780_v51, 0.0  ;;  %v5248_v51 = vsel %vm10437_vm8, %v10466_v24, 0.0 }
0x1730   : > { %v5918_v10 = vadd.f32 %v5902_v39, %v10213_v12  ;;  %v5903_v29 = vadd.f32 %v5887_v11, %v9852_v50  ;;  %v5247_v50 = vsel %vm10437_vm8, %v10435_v57, 0.0  ;;  %v10962_v57 = vmax.f32 %v9776_v48, 0.0 }
0x1731   : > { %v5916_v41 = vadd.f32 %v5900_v40, %v10199_v53  ;;  %v5901_v30 = vadd.f32 %v5885_v19, %v9857_v59  ;;  %v5245_v59 = vsel %vm10437_vm8, %v10441_v22, 0.0  ;;  %v5250_v39 = vsel %vm10437_vm8, %v10464_v21, 0.0 }
0x1732   : > { %v5934_v55 = vadd.f32 %v5918_v10, %v5246_v14  ;;  %v5919_v42 = vadd.f32 %v5903_v29, %v10219_v2  ;;  %v10967_v14 = vld [vmem:[#allocation51_spill] sm:$0xff] }
0x1733   : > { %v5932_v12 = vadd.f32 %v5916_v41, %v5244_v35  ;;  %v5917_v44 = vadd.f32 %v5901_v30, %v10203_v23  ;;  %v10968_v41 = vmax.f32 %v10967_v14, 0.0  ;;  %v10992_v14 = vld [vmem:[#allocation65_spill] sm:$0xff] }
0x1734   : > { %5950 = vst [vmem:[%s10207_s13 + $0x20] sm:$0xff] %v5934_v55  ;;  %v5935_v1 = vadd.f32 %v5919_v42, %v5247_v50  ;;  %v10969_v55 = vld [vmem:[#allocation58_spill] sm:$0xff]  ;;  %v10970_v42 = vld [vmem:[#allocation52_spill] sm:$0xff] }
0x1735   : > { %5948 = vst [vmem:[%s10207_s13] sm:$0xff] %v5932_v12  ;;  %v5933_v53 = vadd.f32 %v5917_v44, %v5245_v59  ;;  %v10971_v12 = vmax.f32 %v10970_v42, 0.0  ;;  %v10972_v44 = vld [vmem:[#allocation59_spill] sm:$0xff]  ;;  %v10973_v59 = vld [vmem:[#allocation53_spill] sm:$0xff] }
0x1736   : > { %5951 = vst [vmem:[%s10207_s13 + $0x30] sm:$0xff] %v5935_v1 }
0x1737   : > { %5949 = vst [vmem:[%s10207_s13 + $0x10] sm:$0xff] %v5933_v53  ;;  %v10974_v53 = vmax.f32 %v10973_v59, 0.0 }
0x173a   : > { %v7636_v62 = vpop.f32.mrb[196].mxu1 }
0x173b   : > { %v5846_v2 = vadd.f32 %v7636_v62, %v10548_v3  ;;  %v5837_v8 = vpop.f32.mrb[197].mxu1 }
0x173c   : > { %v5838_v5 = vadd.f32 %v10548_v3, %v5837_v8  ;;  %v7637_v15 = vpop.f32.mrb[198].mxu1 }
0x173d   : > { %v5890_v23 = vadd.f32 %v5846_v2, %v10962_v57  ;;  %v5849_v36 = vadd.f32 %v7637_v15, %v10548_v3  ;;  %v5840_v17 = vpop.f32.mrb[199].mxu1  ;;  %v10975_v2 = vld [vmem:[#allocation60_spill] sm:$0xff]  ;;  %v10976_v57 = vld [vmem:[#allocation61_spill] sm:$0xff] }
0x173e   : > { %v5888_v22 = vadd.f32 %v5838_v5, %v10963_v20  ;;  %v5841_v0 = vadd.f32 %v10548_v3, %v5840_v17  ;;  %v5254_v5 = vsel %vm10437_vm8, %v10486_v54, 0.0  ;;  %v5252_v17 = vsel %vm10437_vm8, %v10488_v56, 0.0 }
0x173f   : > { %v5906_v13 = vadd.f32 %v5890_v23, %v9880_v32  ;;  %v5891_v18 = vadd.f32 %v5849_v36, %v10964_v28 }
0x1740   : > { %v5904_v26 = vadd.f32 %v5888_v22, %v9883_v43  ;;  %v5889_v48 = vadd.f32 %v5841_v0, %v10965_v6  ;;  %v5255_v22 = vsel %vm10437_vm8, %v10490_v52, 0.0  ;;  %v10978_v6 = vld [vmem:[#allocation55_spill] sm:$0xff] }
0x1741   : > { %v5922_v58 = vadd.f32 %v5906_v13, %v10254_v7  ;;  %v5907_v45 = vadd.f32 %v5891_v18, %v9892_v60  ;;  %v5251_v60 = vsel %vm10437_vm8, %v10468_v33, 0.0  ;;  %v10966_v33 = vmax.f32 %v9796_v61, 0.0  ;;  %v10977_v13 = vld [vmem:[#allocation70_spill] sm:$0xff] }
0x1742   : > { %v5920_v32 = vadd.f32 %v5904_v26, %v10234_v25  ;;  %v5905_v49 = vadd.f32 %v5889_v48, %v9895_v63  ;;  %v5249_v63 = vsel %vm10437_vm8, %v10470_v16, 0.0 }
0x1743   : > { %v5938_v46 = vadd.f32 %v5922_v58, %v5250_v39  ;;  %v5923_v43 = vadd.f32 %v5907_v45, %v10261_v27  ;;  %v10980_v39 = vld [vmem:[#allocation54_spill] sm:$0xff] }
0x1744   : > { %v5936_v7 = vadd.f32 %v5920_v32, %v5248_v51  ;;  %v5921_v11 = vadd.f32 %v5905_v49, %v10241_v37  ;;  %v10981_v32 = vmax.f32 %v10980_v39, 0.0  ;;  %v10982_v51 = vld [vmem:[#allocation62_spill] sm:$0xff] }
0x1745   : > { %5954 = vst [vmem:[%s10207_s13 + $0x60] sm:$0xff] %v5938_v46  ;;  %v5939_v21 = vadd.f32 %v5923_v43, %v5251_v60 }
0x1746   : > { %5952 = vst [vmem:[%s10207_s13 + $0x40] sm:$0xff] %v5936_v7  ;;  %v5937_v25 = vadd.f32 %v5921_v11, %v5249_v63  ;;  %v10983_v7 = vld [vmem:[#allocation56_spill] sm:$0xff] }
0x1747   : > { %5955 = vst [vmem:[%s10207_s13 + $0x70] sm:$0xff] %v5939_v21  ;;  %v10984_v60 = vmax.f32 %v10983_v7, 0.0  ;;  %v10985_v21 = vld [vmem:[#allocation63_spill] sm:$0xff] }
0x1748   : > { %5953 = vst [vmem:[%s10207_s13 + $0x50] sm:$0xff] %v5937_v25  ;;  %v10986_v25 = vld [vmem:[#allocation57_spill] sm:$0xff] }
0x174b   : > { %v7640_v24 = vpop.f32.mrb[200].mxu1 }
0x174c   : > { %v5862_v27 = vadd.f32 %v7640_v24, %v10548_v3  ;;  %v5853_v40 = vpop.f32.mrb[201].mxu1  ;;  %v10987_v24 = vmax.f32 %v10986_v25, 0.0 }
0x174d   : > { %v5854_v4 = vadd.f32 %v10548_v3, %v5853_v40  ;;  %v7641_v19 = vpop.f32.mrb[202].mxu1  ;;  %v10988_v40 = vld [vmem:[#allocation68_spill] sm:$0xff] }
0x174e   : > { %v5894_v37 = vadd.f32 %v5862_v27, %v10966_v33  ;;  %v5865_v10 = vadd.f32 %v7641_v19, %v10548_v3  ;;  %v5856_v29 = vpop.f32.mrb[203].mxu1  ;;  %v10989_v19 = vld [vmem:[#allocation64_spill] sm:$0xff] }
0x174f   : > { %v5892_v16 = vadd.f32 %v5854_v4, %v10968_v41  ;;  %v5857_v30 = vadd.f32 %v10548_v3, %v5856_v29 }
0x1750   : > { %v5910_v35 = vadd.f32 %v5894_v37, %v10969_v55  ;;  %v5895_v50 = vadd.f32 %v5865_v10, %v10971_v12  ;;  %v10990_v37 = vld [vmem:[#allocation71_spill] sm:$0xff] }
0x1751   : > { %v5908_v1 = vadd.f32 %v5892_v16, %v10972_v44  ;;  %v5893_v61 = vadd.f32 %v5857_v30, %v10974_v53  ;;  %v5258_v10 = vsel %vm10437_vm8, %v10990_v37, 0.0  ;;  %v10993_v30 = vld [vmem:[#allocation72_spill] sm:$0xff] }
0x1752   : > { %v5926_v62 = vadd.f32 %v5910_v35, %v10296_v31  ;;  %v5911_v8 = vadd.f32 %v5895_v50, %v10975_v2  ;;  %v5256_v55 = vsel %vm10437_vm8, %v10993_v30, 0.0  ;;  %v10994_v35 = vld [vmem:[#allocation69_spill] sm:$0xff] }
0x1753   : > { %v5924_v15 = vadd.f32 %v5908_v1, %v10275_v9  ;;  %v5909_v23 = vadd.f32 %v5893_v61, %v10976_v57  ;;  %v5253_v9 = vsel %vm10437_vm8, %v10977_v13, 0.0  ;;  %v10995_v50 = vld [vmem:[#allocation73_spill] sm:$0xff]  ;;  %v10996_v1 = vld [vmem:[#allocation67_spill] sm:$0xff]  ;;  %v10997_v61 = vld [vmem:[#allocation74_spill] sm:$0xff] }
0x1754   : > { %v5942_v36 = vadd.f32 %v5926_v62, %v5254_v5  ;;  %v5927_v20 = vadd.f32 %v5911_v8, %v10303_v47  ;;  %v5259_v44 = vsel %vm10437_vm8, %v10995_v50, 0.0  ;;  %v5257_v62 = vsel %vm10437_vm8, %v10997_v61, 0.0 }
0x1755   : > { %v5940_v31 = vadd.f32 %v5924_v15, %v5252_v17  ;;  %v5925_v0 = vadd.f32 %v5909_v23, %v10282_v34  ;;  %v10979_v34 = vmax.f32 %v10978_v6, 0.0 }
0x1756   : > { %5958 = vst [vmem:[%s10207_s13 + $0xa0] sm:$0xff] %v5942_v36  ;;  %v5943_v54 = vadd.f32 %v5927_v20, %v5255_v22 }
0x1757   : > { %5956 = vst [vmem:[%s10207_s13 + $0x80] sm:$0xff] %v5940_v31  ;;  %v5941_v28 = vadd.f32 %v5925_v0, %v5253_v9 }
0x1758   : > { %5959 = vst [vmem:[%s10207_s13 + $0xb0] sm:$0xff] %v5943_v54 }
0x1759   : > { %5957 = vst [vmem:[%s10207_s13 + $0x90] sm:$0xff] %v5941_v28 }
0x175c   : > { %v7644_v56 = vpop.f32.mrb[204].mxu1 }
0x175d   : > { %v5878_v47 = vadd.f32 %v7644_v56, %v10548_v3  ;;  %v5869_v18 = vpop.f32.mrb[205].mxu1 }
0x175e   : > { %v5870_v26 = vadd.f32 %v10548_v3, %v5869_v18  ;;  %v7645_v52 = vpop.f32.mrb[206].mxu1 }
0x175f   : > { %v5898_v48 = vadd.f32 %v5878_v47, %v10979_v34  ;;  %v5881_v58 = vadd.f32 %v7645_v52, %v10548_v3  ;;  %v5872_v45 = vpop.f32.mrb[207].mxu1 }
0x1760   : > { %v5896_v49 = vadd.f32 %v5870_v26, %v10981_v32  ;;  %v5873_v46 = vadd.f32 %v10548_v3, %v5872_v45  ;;  %v10991_v3 = vld [vmem:[#allocation66_spill] sm:$0xff] }
0x1761   : > { %v5914_v43 = vadd.f32 %v5898_v48, %v10982_v51  ;;  %v5899_v11 = vadd.f32 %v5881_v58, %v10984_v60 }
0x1762   : > { %v5912_v63 = vadd.f32 %v5896_v49, %v10985_v21  ;;  %v5897_v27 = vadd.f32 %v5873_v46, %v10987_v24 }
0x1763   : > { %v5930_v4 = vadd.f32 %v5914_v43, %v10988_v40  ;;  %v5915_v33 = vadd.f32 %v5899_v11, %v10989_v19 }
0x1764   : > { %v5928_v29 = vadd.f32 %v5912_v63, %v10991_v3  ;;  %v5913_v41 = vadd.f32 %v5897_v27, %v10992_v14 }
0x1765   : > { %v5946_v16 = vadd.f32 %v5930_v4, %v5258_v10  ;;  %v5931_v42 = vadd.f32 %v5915_v33, %v10994_v35 }
0x1766   : > { %v5944_v12 = vadd.f32 %v5928_v29, %v5256_v55  ;;  %v5929_v59 = vadd.f32 %v5913_v41, %v10996_v1 }
0x1767   : > { %5962 = vst [vmem:[%s10207_s13 + $0xe0] sm:$0xff] %v5946_v16  ;;  %v5947_v53 = vadd.f32 %v5931_v42, %v5259_v44 }
0x1768   : > { %5960 = vst [vmem:[%s10207_s13 + $0xc0] sm:$0xff] %v5944_v12  ;;  %v5945_v2 = vadd.f32 %v5929_v59, %v5257_v62 }
0x1769   : > { %5963 = vst [vmem:[%s10207_s13 + $0xf0] sm:$0xff] %v5947_v53 }
0x176a   : > { %5961 = vst [vmem:[%s10207_s13 + $0xd0] sm:$0xff] %v5945_v2 }
0x176b   : > { %8875 = shalt.err (!%p8872_p8)
}
0x176c   : > { %s8876_s13 = scalar_lea.hbm %s10696_s19, 4096  ;;  %s8880_s29 = scalar_lea.hbm %s10999_s4, 8192 }
0x176d   : > { %p8877_p6 = scmp.ne.s32.totalorder %s10696_s19, %s8876_s13  ;;  %p8881_p3 = scmp.lt.u32.totalorder %s10696_s19, %s10999_s4 }
0x176e   : > { %p8882_p5 = scmp.lt.u32.totalorder %s8880_s29, %s8876_s13  ;;  %p8884_p7 = scmp.lt.u32.totalorder %s8876_s13, %s10696_s19 }
0x176f   : > { %p8878_p10 = pnand %p8877_p6, %p11000_p4 }
0x1770   : > { %p8883_p9 = por %p8882_p5, %p8881_p3 }
0x1771   : > { %p8879_p11 = pneg %p8878_p10 }
0x1772   : > { %p8885_p12 = por %p8884_p7, %p8883_p9 }
0x1774   : > { %p8886_p1 = pnand %p8885_p12, %p8879_p11 }
0x1776   : > { %8889 = shalt.err (!%p8886_p1)
}
0x1777   : > { %s8998_s7 = smov 256   ;;  %s8999_s11 = smov 16  }
0x1778   : > { %7724 = dma.vmem_to_hbm [thread:$0]  (%p11000_p4), %s10698_s18, 4096, %s10696_s19, %s5997_s22, %s8998_s7, %s8998_s7, %s8999_s11  }
0x1779 PF: > { %s11001_s2 = sld [smem:[#allocation47_spill]]  ;;  %p11002_p13 = scmp.ne.s32.totalorder %s10891_s17, 0 }
0x177a   : > { %p11003_p0 = scmp.ge.s32.totalorder %s8968_s30, 2 }
0x177c   : > { %p7789_p2 = pnand %p11003_p0, %p11002_p13 }
0x177f   : > { %s6026_s8 = sand.u32 1, %s11001_s2  }
0x1780   : > { %s6027_s13 = scalar_lea.sflag [#allocation4], %s6026_s8 }
0x1781   : > { %8951 = dma.done.wait (!%p7789_p2), %s6027_s13, 4096  }
0x1782   : > { %8953 = vsyncadd (!%p7789_p2), %s6027_s13, 4294963200  ;;  %s11004_s29 = sld [smem:[#allocation48_spill]]  ;;  %p48_p8 = scmp.ge.s32.totalorder %s9588_s1, 4  }
0x1783   : > { %s11005_s2 = smov %s8964_s6  ;;  %s11006_s6 = smov %s9600_s5 }
0x1784   : > { %s11007_s30 = smov %s9588_s1  ;;  %50 = sbr.rel (!%p48_p8) target bundleno = 36 (0x24), region = 261 }
0x178b   :  { %6032 = vsyncpa [#allocation3], 1 }
0x178c   :  { %6034 = vsyncpa [#allocation3 + $0x1], 1 }
0x178d   :  { %6035 = vsyncpa [#allocation6], 1 }
0x178e   :  { %6036 = vsyncpa [#allocation9], 1 }
0x178f   :  { %6037 = vsyncpa [#allocation12], 1 }
0x1790   :  { %6038 = vsyncpa [#allocation15], 1 }
0x1791   :  { %6039 = vsyncpa [#allocation18], 1 }
0x1792   :  { %6040 = vsyncpa [#allocation21], 1 }
0x1793   :  { %6041 = vsyncpa [#allocation24], 1 }
0x1794   :  { %6042 = vsyncpa [#allocation27], 1 }
0x1795   :  { %6043 = vsyncpa [#allocation30], 1 }
0x1796   :  { %6044 = vsyncpa [#allocation33], 1 }
0x1797   :  { %6045 = vsyncpa [#allocation4], 1 }
0x1798   :  { %6047 = vsyncpa [#allocation4 + $0x1], 1 }

</bundles_post_ra>
